<compile_context>
chip_gen: v5e
topology: v5e:2x2
jax: 0.10.0
libtpu: 0.0.40
codegen_flags: <defaults>
</compile_context>

<pallas_src>
import numpy as np
import jax
import jax.numpy as jnp
from jax.experimental import pallas as pl
from jax.experimental.pallas import tpu as pltpu


# MXU operand dtype for the conv matmuls.  fp32 by default so the self-check against the
# fp32 reference stays tight; set to jnp.bfloat16 on v6e/v7x for ~2x MXU throughput and
# half the weight/input DMA (InstanceNorm / head math stays fp32 either way).
MM_DTYPE = jnp.float32
EPS = 1e-5


def _mm(a, b):
    """MXU matmul with fp32 accumulation; operands cast to MM_DTYPE."""
    return jnp.dot(a.astype(MM_DTYPE), b.astype(MM_DTYPE),
                   preferred_element_type=jnp.float32)


# ---------------------------------------------------------------------------
# Fused kernel: whole Discriminator forward for one image per grid step
# ---------------------------------------------------------------------------
def make_fused_kernel(n_layers):
    """refs layout: x, (sr, v, g, gt) * n_layers, fc_w_t, fc_b, out.

    x_ref  : (1, H, W*C_in)            image, channels-last-on-lanes
    sr_ref : (3, Ho, H_in)             0/1 row selectors (stride-2 + padding on rows)
    v_ref  : (3, W_in*C_in, Wo*C_out)  conv weights folded with column stride/padding
    g_ref  : (Wo*C_out, C_out)         0/1 channel-grouping mask (per-channel sums)
    gt_ref : (C_out, Wo*C_out)         g transposed (per-channel broadcast)
    fc_w_t : (fLen, fLen2), fc_b: (1, fLen2)
    out_ref: (1, 1, fLen2)             per-image logits
    """
    def kernel(*refs):
        x_ref = refs[0]
        fcw_ref = refs[1 + 4 * n_layers]
        fcb_ref = refs[2 + 4 * n_layers]
        out_ref = refs[3 + 4 * n_layers]

        a = x_ref[0]                                              # (H, W*C_in)
        g = None
        inv_n = 1.0
        for l in range(n_layers):
            sr_ref, v_ref, g_ref, gt_ref = refs[1 + 4 * l: 5 + 4 * l]
            c_out = g_ref.shape[1]
            ho = sr_ref.shape[1]
            wo = g_ref.shape[0] // c_out
            inv_n = 1.0 / float(ho * wo)

            # Conv2d(k=3, s=2, p=1) as 3+3 lane-dense matmuls.  Conv bias intentionally
            # omitted: a per-channel constant is cancelled exactly by InstanceNorm.
            y = None
            for dy in range(3):
                r = _mm(sr_ref[dy], a)                            # (Ho, W_in*C_in)
                t = _mm(r, v_ref[dy])                             # (Ho, Wo*C_out)
                y = t if y is None else y + t

            # InstanceNorm2d(affine=False, eps=1e-5) + ReLU, stats in fp32.
            g = g_ref[...]
            gt = gt_ref[...]
            mu = jnp.dot(jnp.sum(y, axis=0, keepdims=True), g,
                         preferred_element_type=jnp.float32) * inv_n          # (1, C_out)
            yc = y - jnp.dot(mu, gt, preferred_element_type=jnp.float32)
            var = jnp.dot(jnp.sum(yc * yc, axis=0, keepdims=True), g,
                          preferred_element_type=jnp.float32) * inv_n
            rstd = jax.lax.rsqrt(var + EPS)                                    # (1, C_out)
            a = jnp.maximum(
                yc * jnp.dot(rstd, gt, preferred_element_type=jnp.float32), 0.0)

        # Fused head: AvgPool2d(eSize) (= per-channel spatial mean) + Linear(fLen, fLen2)
        feat = jnp.dot(jnp.sum(a, axis=0, keepdims=True), g,
                       preferred_element_type=jnp.float32) * inv_n             # (1, fLen)
        logits = jnp.dot(feat, fcw_ref[...],
                         preferred_element_type=jnp.float32) + fcb_ref[...]    # (1, fLen2)
        out_ref[0] = logits

    return kernel


# ---------------------------------------------------------------------------
# pallas_call wrapper
# ---------------------------------------------------------------------------
def _const_map(ndim):
    return lambda b: (0,) * ndim


def _resident_spec(arr):
    # Full-array block with a constant index_map -> DMA'd once, VMEM-resident for the
    # whole batch grid.
    return pl.BlockSpec(arr.shape, _const_map(arr.ndim))


def discriminator_forward(packed, x):
    """x: (B, 3, iSize, iSize) NCHW (PyTorch convention).  Returns a scalar."""
    B, c_in, H, W = x.shape
    # One-time layout glue on the input only: (B, H, W*C_in), channels-last on lanes.
    x_hwc = jnp.transpose(x, (0, 2, 3, 1)).reshape(B, H, W * c_in).astype(MM_DTYPE)

    layers = packed["layers"]
    n = len(layers)

    inputs = [x_hwc]
    in_specs = [pl.BlockSpec((1, H, W * c_in), lambda b: (b, 0, 0))]
    for L in layers:
        for name in ("sr", "v", "g", "gt"):
            arr = L[name]
            inputs.append(arr)
            in_specs.append(_resident_spec(arr))
    inputs += [packed["fc_w_t"], packed["fc_b"]]
    in_specs += [_resident_spec(packed["fc_w_t"]), _resident_spec(packed["fc_b"])]

    f_len2 = packed["fc_w_t"].shape[1]
    logits = pl.pallas_call(
        make_fused_kernel(n),
        out_shape=jax.ShapeDtypeStruct((B, 1, f_len2), jnp.float32),
        grid=(B,),
        in_specs=in_specs,
        out_specs=pl.BlockSpec((1, 1, f_len2), lambda b: (b, 0, 0)),
        compiler_params=pltpu.CompilerParams(dimension_semantics=("parallel",)),
    )(*inputs)

    return jnp.mean(logits)           # final .mean() over the (B, fLen2) logits


# ---------------------------------------------------------------------------
# Parameter construction / packing
# ---------------------------------------------------------------------------
def cnn_channel_list(iSize, eSize, iCh, sCh, eCh, oCh, mCh):
    """Replicates Cnn's channel-list construction; #convs = log2(iSize/eSize)."""
    n_convs = int(round(np.log2(iSize / eSize)))
    chs = n_convs - 1
    mids = [int(min(min(sCh * 2 ** i, eCh * 2 ** (chs - 1 - i)), mCh)) for i in range(chs)]
    return [iCh] + mids + [oCh]


def init_discriminator_params(key, iSize=64, fLen=16, fLen2=4, eSize=8,
                              mChannel=128, sChannel=8):
    c_list = cnn_channel_list(iSize, eSize, 3, sChannel, fLen, fLen, mChannel)
    params = {"convs": []}
    for i in range(len(c_list) - 1):
        key, kw, kb = jax.random.split(key, 3)
        cin, cout = c_list[i], c_list[i + 1]
        bound = 1.0 / np.sqrt(cin * 9)
        w = jax.random.uniform(kw, (cout, cin, 3, 3), jnp.float32, -bound, bound)
        b = jax.random.uniform(kb, (cout,), jnp.float32, -bound, bound)
        params["convs"].append((w, b))
    key, kw, kb = jax.random.split(key, 3)
    bound = 1.0 / np.sqrt(fLen)
    params["fc_w"] = jax.random.uniform(kw, (fLen2, fLen), jnp.float32, -bound, bound)
    params["fc_b"] = jax.random.uniform(kb, (fLen2,), jnp.float32, -bound, bound)
    return params, c_list


def pack_params(params, iSize):
    """Fold conv weights with the stride-2/padding selection structure into per-layer
    matmul operands, plus the constant row-selector and channel-grouping matrices."""
    packed = {
        "layers": [],
        "fc_w_t": jnp.asarray(params["fc_w"]).T.astype(jnp.float32),   # (fLen, fLen2)
        "fc_b": jnp.asarray(params["fc_b"]).reshape(1, -1).astype(jnp.float32),
    }
    h = iSize
    for (w, b) in params["convs"]:
        c_out, c_in = int(w.shape[0]), int(w.shape[1])
        s_in, s_out = h, h // 2
        idx_out = np.arange(s_out)
        idx_in = np.arange(s_in)
        # Row selectors: sr[dy][ho, hi] = 1 iff hi == 2*ho + dy - 1 (zero rows = padding)
        sr = np.stack([(idx_in[None, :] == 2 * idx_out[:, None] + dy - 1).astype(np.float32)
                       for dy in range(3)])                              # (3, s_out, s_in)
        # Column selectors: sc[dx][wi, wo] = 1 iff wi == 2*wo + dx - 1
        sc = np.stack([(idx_in[:, None] == 2 * idx_out[None, :] + dx - 1).astype(np.float32)
                       for dx in range(3)])                              # (3, s_in, s_out)
        # V[dy][wi*C_in+ci, wo*C_out+co] = sum_dx W[co,ci,dy,dx] * sc[dx][wi,wo]
        v = jnp.einsum('oiyx,xwv->ywivo', w.astype(jnp.float32), jnp.asarray(sc))
        v = v.reshape(3, s_in * c_in, s_out * c_out)
        # Channel-grouping mask for InstanceNorm / AvgPool stats.
        g = np.tile(np.eye(c_out, dtype=np.float32), (s_out, 1))         # (s_out*c_out, c_out)
        packed["layers"].append({
            "sr": jnp.asarray(sr, dtype=MM_DTYPE),
            "v": v.astype(MM_DTYPE),
            "g": jnp.asarray(g),
            "gt": jnp.asarray(g.T),
        })
        # conv bias `b` deliberately unused: InstanceNorm cancels a per-channel constant.
        h = s_out
    return packed


# ---------------------------------------------------------------------------
# Pure-JAX reference (PyTorch semantics, incl. conv bias)
# ---------------------------------------------------------------------------
def ref_forward(params, x):
    y = x
    for (w, b) in params["convs"]:
        y = jax.lax.conv_general_dilated(
            y, w, window_strides=(2, 2), padding=((1, 1), (1, 1)),
            dimension_numbers=("NCHW", "OIHW", "NCHW"))
        y = y + b[None, :, None, None]
        mu = jnp.mean(y, axis=(2, 3), keepdims=True)
        var = jnp.mean((y - mu) ** 2, axis=(2, 3), keepdims=True)
        y = (y - mu) / jnp.sqrt(var + EPS)
        y = jnp.maximum(y, 0.0)
    feat = jnp.mean(y, axis=(2, 3))                     # AvgPool2d(eSize) + squeeze
    logits = feat @ params["fc_w"].T + params["fc_b"]
    return jnp.mean(logits)


if __name__ == "__main__":
    key = jax.random.PRNGKey(0)
    kp, kx = jax.random.split(key)
    iSize = 64                                          # small config (512 is PyTorch default)
    params, c_list = init_discriminator_params(kp, iSize=iSize)
    packed = pack_params(params, iSize)
    x = jax.random.normal(kx, (2, 3, iSize, iSize), jnp.float32)

    fwd = jax.jit(lambda xx: discriminator_forward(packed, xx))
    out = jax.block_until_ready(fwd(x))
    ref = jax.block_until_ready(ref_forward(params, x))
    np.testing.assert_allclose(np.asarray(out), np.asarray(ref), rtol=1e-3, atol=1e-3)
    print("KERNEL_OK")
</pallas_src>

<mosaic_0001>
module attributes {stable_mosaic.version = 11 : i64} {
  func.func @kernel(%arg0: i32, %arg1: memref<1x64x192xf32, #tpu.memory_space<vmem>>, %arg2: memref<3x32x64xf32, #tpu.memory_space<vmem>>, %arg3: memref<3x192x256xf32, #tpu.memory_space<vmem>>, %arg4: memref<256x8xf32, #tpu.memory_space<vmem>>, %arg5: memref<8x256xf32, #tpu.memory_space<vmem>>, %arg6: memref<3x16x32xf32, #tpu.memory_space<vmem>>, %arg7: memref<3x256x256xf32, #tpu.memory_space<vmem>>, %arg8: memref<256x16xf32, #tpu.memory_space<vmem>>, %arg9: memref<16x256xf32, #tpu.memory_space<vmem>>, %arg10: memref<3x8x16xf32, #tpu.memory_space<vmem>>, %arg11: memref<3x256x128xf32, #tpu.memory_space<vmem>>, %arg12: memref<128x16xf32, #tpu.memory_space<vmem>>, %arg13: memref<16x128xf32, #tpu.memory_space<vmem>>, %arg14: memref<16x4xf32, #tpu.memory_space<vmem>>, %arg15: memref<1x4xf32, #tpu.memory_space<vmem>>, %arg16: memref<1x1x4xf32, #tpu.memory_space<vmem>>) attributes {dimension_semantics = [#tpu.dimension_semantics<parallel>], iteration_bounds = array<i64: 2>, scalar_prefetch = 0 : i64, scratch_operands = 0 : i64, tpu.core_type = #tpu.core_type<tc>, window_params = [{transform_indices = @transform_0, window_bounds = array<i64: 1, 64, 192>}, {pipeline_mode = #tpu.pipeline_mode<synchronous>, transform_indices = @transform_1, window_bounds = array<i64: 3, 32, 64>}, {pipeline_mode = #tpu.pipeline_mode<synchronous>, transform_indices = @transform_2, window_bounds = array<i64: 3, 192, 256>}, {pipeline_mode = #tpu.pipeline_mode<synchronous>, transform_indices = @transform_3, window_bounds = array<i64: 256, 8>}, {pipeline_mode = #tpu.pipeline_mode<synchronous>, transform_indices = @transform_4, window_bounds = array<i64: 8, 256>}, {pipeline_mode = #tpu.pipeline_mode<synchronous>, transform_indices = @transform_5, window_bounds = array<i64: 3, 16, 32>}, {pipeline_mode = #tpu.pipeline_mode<synchronous>, transform_indices = @transform_6, window_bounds = array<i64: 3, 256, 256>}, {pipeline_mode = #tpu.pipeline_mode<synchronous>, transform_indices = @transform_7, window_bounds = array<i64: 256, 16>}, {pipeline_mode = #tpu.pipeline_mode<synchronous>, transform_indices = @transform_8, window_bounds = array<i64: 16, 256>}, {pipeline_mode = #tpu.pipeline_mode<synchronous>, transform_indices = @transform_9, window_bounds = array<i64: 3, 8, 16>}, {pipeline_mode = #tpu.pipeline_mode<synchronous>, transform_indices = @transform_10, window_bounds = array<i64: 3, 256, 128>}, {pipeline_mode = #tpu.pipeline_mode<synchronous>, transform_indices = @transform_11, window_bounds = array<i64: 128, 16>}, {pipeline_mode = #tpu.pipeline_mode<synchronous>, transform_indices = @transform_12, window_bounds = array<i64: 16, 128>}, {pipeline_mode = #tpu.pipeline_mode<synchronous>, transform_indices = @transform_13, window_bounds = array<i64: 16, 4>}, {pipeline_mode = #tpu.pipeline_mode<synchronous>, transform_indices = @transform_14, window_bounds = array<i64: 1, 4>}, {transform_indices = @transform_15, window_bounds = array<i64: 1, 1, 4>}]} {
    %c0 = arith.constant 0 : index
    %c0_0 = arith.constant 0 : index
    %c0_1 = arith.constant 0 : index
    %0 = vector.load %arg1[%c0, %c0_0, %c0_1] : memref<1x64x192xf32, #tpu.memory_space<vmem>>, vector<1x64x192xf32>
    %1 = vector.shape_cast %0 : vector<1x64x192xf32> to vector<64x192xf32>
    %c0_2 = arith.constant 0 : index
    %c0_3 = arith.constant 0 : index
    %c0_4 = arith.constant 0 : index
    %2 = vector.load %arg2[%c0_2, %c0_3, %c0_4] : memref<3x32x64xf32, #tpu.memory_space<vmem>>, vector<1x32x64xf32>
    %3 = vector.shape_cast %2 : vector<1x32x64xf32> to vector<32x64xf32>
    %cst = arith.constant dense<0.000000e+00> : vector<32x192xf32>
    %4 = tpu.matmul %3, %1, %cst {dimension_numbers = #tpu.dot_dimension_numbers<[1], [0], [0], [1], [0, 0, 1, 1], [], []>} : vector<32x64xf32>, vector<64x192xf32>, vector<32x192xf32> -> vector<32x192xf32>
    %c0_5 = arith.constant 0 : index
    %c0_6 = arith.constant 0 : index
    %c0_7 = arith.constant 0 : index
    %5 = vector.load %arg3[%c0_5, %c0_6, %c0_7] : memref<3x192x256xf32, #tpu.memory_space<vmem>>, vector<1x192x256xf32>
    %6 = vector.shape_cast %5 : vector<1x192x256xf32> to vector<192x256xf32>
    %cst_8 = arith.constant dense<0.000000e+00> : vector<32x256xf32>
    %7 = tpu.matmul %4, %6, %cst_8 {dimension_numbers = #tpu.dot_dimension_numbers<[1], [0], [0], [1], [0, 0, 1, 1], [], []>} : vector<32x192xf32>, vector<192x256xf32>, vector<32x256xf32> -> vector<32x256xf32>
    %c1 = arith.constant 1 : index
    %c0_9 = arith.constant 0 : index
    %c0_10 = arith.constant 0 : index
    %8 = vector.load %arg2[%c1, %c0_9, %c0_10] : memref<3x32x64xf32, #tpu.memory_space<vmem>>, vector<1x32x64xf32>
    %9 = vector.shape_cast %8 : vector<1x32x64xf32> to vector<32x64xf32>
    %cst_11 = arith.constant dense<0.000000e+00> : vector<32x192xf32>
    %10 = tpu.matmul %9, %1, %cst_11 {dimension_numbers = #tpu.dot_dimension_numbers<[1], [0], [0], [1], [0, 0, 1, 1], [], []>} : vector<32x64xf32>, vector<64x192xf32>, vector<32x192xf32> -> vector<32x192xf32>
    %c1_12 = arith.constant 1 : index
    %c0_13 = arith.constant 0 : index
    %c0_14 = arith.constant 0 : index
    %11 = vector.load %arg3[%c1_12, %c0_13, %c0_14] : memref<3x192x256xf32, #tpu.memory_space<vmem>>, vector<1x192x256xf32>
    %12 = vector.shape_cast %11 : vector<1x192x256xf32> to vector<192x256xf32>
    %cst_15 = arith.constant dense<0.000000e+00> : vector<32x256xf32>
    %13 = tpu.matmul %10, %12, %cst_15 {dimension_numbers = #tpu.dot_dimension_numbers<[1], [0], [0], [1], [0, 0, 1, 1], [], []>} : vector<32x192xf32>, vector<192x256xf32>, vector<32x256xf32> -> vector<32x256xf32>
    %14 = arith.addf %7, %13 : vector<32x256xf32>
    %c2 = arith.constant 2 : index
    %c0_16 = arith.constant 0 : index
    %c0_17 = arith.constant 0 : index
    %15 = vector.load %arg2[%c2, %c0_16, %c0_17] : memref<3x32x64xf32, #tpu.memory_space<vmem>>, vector<1x32x64xf32>
    %16 = vector.shape_cast %15 : vector<1x32x64xf32> to vector<32x64xf32>
    %cst_18 = arith.constant dense<0.000000e+00> : vector<32x192xf32>
    %17 = tpu.matmul %16, %1, %cst_18 {dimension_numbers = #tpu.dot_dimension_numbers<[1], [0], [0], [1], [0, 0, 1, 1], [], []>} : vector<32x64xf32>, vector<64x192xf32>, vector<32x192xf32> -> vector<32x192xf32>
    %c2_19 = arith.constant 2 : index
    %c0_20 = arith.constant 0 : index
    %c0_21 = arith.constant 0 : index
    %18 = vector.load %arg3[%c2_19, %c0_20, %c0_21] : memref<3x192x256xf32, #tpu.memory_space<vmem>>, vector<1x192x256xf32>
    %19 = vector.shape_cast %18 : vector<1x192x256xf32> to vector<192x256xf32>
    %cst_22 = arith.constant dense<0.000000e+00> : vector<32x256xf32>
    %20 = tpu.matmul %17, %19, %cst_22 {dimension_numbers = #tpu.dot_dimension_numbers<[1], [0], [0], [1], [0, 0, 1, 1], [], []>} : vector<32x192xf32>, vector<192x256xf32>, vector<32x256xf32> -> vector<32x256xf32>
    %21 = arith.addf %14, %20 : vector<32x256xf32>
    %c0_23 = arith.constant 0 : index
    %c0_24 = arith.constant 0 : index
    %22 = vector.load %arg4[%c0_23, %c0_24] : memref<256x8xf32, #tpu.memory_space<vmem>>, vector<256x8xf32>
    %c0_25 = arith.constant 0 : index
    %c0_26 = arith.constant 0 : index
    %23 = vector.load %arg5[%c0_25, %c0_26] : memref<8x256xf32, #tpu.memory_space<vmem>>, vector<8x256xf32>
    %cst_27 = arith.constant dense<0.000000e+00> : vector<256xf32>
    %24 = vector.multi_reduction <add>, %21, %cst_27 [0] : vector<32x256xf32> to vector<256xf32>
    %25 = vector.shape_cast %24 : vector<256xf32> to vector<1x256xf32>
    %cst_28 = arith.constant dense<0.000000e+00> : vector<1x8xf32>
    %26 = tpu.matmul %25, %22, %cst_28 {dimension_numbers = #tpu.dot_dimension_numbers<[1], [0], [0], [1], [0, 0, 1, 1], [], []>} : vector<1x256xf32>, vector<256x8xf32>, vector<1x8xf32> -> vector<1x8xf32>
    %cst_29 = arith.constant 9.765625E-4 : f32
    %27 = vector.broadcast %cst_29 : f32 to vector<1x8xf32>
    %28 = arith.mulf %26, %27 : vector<1x8xf32>
    %cst_30 = arith.constant dense<0.000000e+00> : vector<1x256xf32>
    %29 = tpu.matmul %28, %23, %cst_30 {dimension_numbers = #tpu.dot_dimension_numbers<[1], [0], [0], [1], [0, 0, 1, 1], [], []>} : vector<1x8xf32>, vector<8x256xf32>, vector<1x256xf32> -> vector<1x256xf32>
    %30 = vector.broadcast %29 : vector<1x256xf32> to vector<32x256xf32>
    %31 = arith.subf %21, %30 : vector<32x256xf32>
    %32 = arith.mulf %31, %31 : vector<32x256xf32>
    %cst_31 = arith.constant dense<0.000000e+00> : vector<256xf32>
    %33 = vector.multi_reduction <add>, %32, %cst_31 [0] : vector<32x256xf32> to vector<256xf32>
    %34 = vector.shape_cast %33 : vector<256xf32> to vector<1x256xf32>
    %cst_32 = arith.constant dense<0.000000e+00> : vector<1x8xf32>
    %35 = tpu.matmul %34, %22, %cst_32 {dimension_numbers = #tpu.dot_dimension_numbers<[1], [0], [0], [1], [0, 0, 1, 1], [], []>} : vector<1x256xf32>, vector<256x8xf32>, vector<1x8xf32> -> vector<1x8xf32>
    %cst_33 = arith.constant 9.765625E-4 : f32
    %36 = vector.broadcast %cst_33 : f32 to vector<1x8xf32>
    %37 = arith.mulf %35, %36 : vector<1x8xf32>
    %cst_34 = arith.constant 9.99999974E-6 : f32
    %38 = vector.broadcast %cst_34 : f32 to vector<1x8xf32>
    %39 = arith.addf %37, %38 : vector<1x8xf32>
    %40 = math.rsqrt %39 : vector<1x8xf32>
    %cst_35 = arith.constant dense<0.000000e+00> : vector<1x256xf32>
    %41 = tpu.matmul %40, %23, %cst_35 {dimension_numbers = #tpu.dot_dimension_numbers<[1], [0], [0], [1], [0, 0, 1, 1], [], []>} : vector<1x8xf32>, vector<8x256xf32>, vector<1x256xf32> -> vector<1x256xf32>
    %42 = vector.broadcast %41 : vector<1x256xf32> to vector<32x256xf32>
    %43 = arith.mulf %31, %42 : vector<32x256xf32>
    %cst_36 = arith.constant 0.000000e+00 : f32
    %44 = vector.broadcast %cst_36 : f32 to vector<32x256xf32>
    %45 = arith.maximumf %43, %44 : vector<32x256xf32>
    %c0_37 = arith.constant 0 : index
    %c0_38 = arith.constant 0 : index
    %c0_39 = arith.constant 0 : index
    %46 = vector.load %arg6[%c0_37, %c0_38, %c0_39] : memref<3x16x32xf32, #tpu.memory_space<vmem>>, vector<1x16x32xf32>
    %47 = vector.shape_cast %46 : vector<1x16x32xf32> to vector<16x32xf32>
    %cst_40 = arith.constant dense<0.000000e+00> : vector<16x256xf32>
    %48 = tpu.matmul %47, %45, %cst_40 {dimension_numbers = #tpu.dot_dimension_numbers<[1], [0], [0], [1], [0, 0, 1, 1], [], []>} : vector<16x32xf32>, vector<32x256xf32>, vector<16x256xf32> -> vector<16x256xf32>
    %c0_41 = arith.constant 0 : index
    %c0_42 = arith.constant 0 : index
    %c0_43 = arith.constant 0 : index
    %49 = vector.load %arg7[%c0_41, %c0_42, %c0_43] : memref<3x256x256xf32, #tpu.memory_space<vmem>>, vector<1x256x256xf32>
    %50 = vector.shape_cast %49 : vector<1x256x256xf32> to vector<256x256xf32>
    %cst_44 = arith.constant dense<0.000000e+00> : vector<16x256xf32>
    %51 = tpu.matmul %48, %50, %cst_44 {dimension_numbers = #tpu.dot_dimension_numbers<[1], [0], [0], [1], [0, 0, 1, 1], [], []>} : vector<16x256xf32>, vector<256x256xf32>, vector<16x256xf32> -> vector<16x256xf32>
    %c1_45 = arith.constant 1 : index
    %c0_46 = arith.constant 0 : index
    %c0_47 = arith.constant 0 : index
    %52 = vector.load %arg6[%c1_45, %c0_46, %c0_47] : memref<3x16x32xf32, #tpu.memory_space<vmem>>, vector<1x16x32xf32>
    %53 = vector.shape_cast %52 : vector<1x16x32xf32> to vector<16x32xf32>
    %cst_48 = arith.constant dense<0.000000e+00> : vector<16x256xf32>
    %54 = tpu.matmul %53, %45, %cst_48 {dimension_numbers = #tpu.dot_dimension_numbers<[1], [0], [0], [1], [0, 0, 1, 1], [], []>} : vector<16x32xf32>, vector<32x256xf32>, vector<16x256xf32> -> vector<16x256xf32>
    %c1_49 = arith.constant 1 : index
    %c0_50 = arith.constant 0 : index
    %c0_51 = arith.constant 0 : index
    %55 = vector.load %arg7[%c1_49, %c0_50, %c0_51] : memref<3x256x256xf32, #tpu.memory_space<vmem>>, vector<1x256x256xf32>
    %56 = vector.shape_cast %55 : vector<1x256x256xf32> to vector<256x256xf32>
    %cst_52 = arith.constant dense<0.000000e+00> : vector<16x256xf32>
    %57 = tpu.matmul %54, %56, %cst_52 {dimension_numbers = #tpu.dot_dimension_numbers<[1], [0], [0], [1], [0, 0, 1, 1], [], []>} : vector<16x256xf32>, vector<256x256xf32>, vector<16x256xf32> -> vector<16x256xf32>
    %58 = arith.addf %51, %57 : vector<16x256xf32>
    %c2_53 = arith.constant 2 : index
    %c0_54 = arith.constant 0 : index
    %c0_55 = arith.constant 0 : index
    %59 = vector.load %arg6[%c2_53, %c0_54, %c0_55] : memref<3x16x32xf32, #tpu.memory_space<vmem>>, vector<1x16x32xf32>
    %60 = vector.shape_cast %59 : vector<1x16x32xf32> to vector<16x32xf32>
    %cst_56 = arith.constant dense<0.000000e+00> : vector<16x256xf32>
    %61 = tpu.matmul %60, %45, %cst_56 {dimension_numbers = #tpu.dot_dimension_numbers<[1], [0], [0], [1], [0, 0, 1, 1], [], []>} : vector<16x32xf32>, vector<32x256xf32>, vector<16x256xf32> -> vector<16x256xf32>
    %c2_57 = arith.constant 2 : index
    %c0_58 = arith.constant 0 : index
    %c0_59 = arith.constant 0 : index
    %62 = vector.load %arg7[%c2_57, %c0_58, %c0_59] : memref<3x256x256xf32, #tpu.memory_space<vmem>>, vector<1x256x256xf32>
    %63 = vector.shape_cast %62 : vector<1x256x256xf32> to vector<256x256xf32>
    %cst_60 = arith.constant dense<0.000000e+00> : vector<16x256xf32>
    %64 = tpu.matmul %61, %63, %cst_60 {dimension_numbers = #tpu.dot_dimension_numbers<[1], [0], [0], [1], [0, 0, 1, 1], [], []>} : vector<16x256xf32>, vector<256x256xf32>, vector<16x256xf32> -> vector<16x256xf32>
    %65 = arith.addf %58, %64 : vector<16x256xf32>
    %c0_61 = arith.constant 0 : index
    %c0_62 = arith.constant 0 : index
    %66 = vector.load %arg8[%c0_61, %c0_62] : memref<256x16xf32, #tpu.memory_space<vmem>>, vector<256x16xf32>
    %c0_63 = arith.constant 0 : index
    %c0_64 = arith.constant 0 : index
    %67 = vector.load %arg9[%c0_63, %c0_64] : memref<16x256xf32, #tpu.memory_space<vmem>>, vector<16x256xf32>
    %cst_65 = arith.constant dense<0.000000e+00> : vector<256xf32>
    %68 = vector.multi_reduction <add>, %65, %cst_65 [0] : vector<16x256xf32> to vector<256xf32>
    %69 = vector.shape_cast %68 : vector<256xf32> to vector<1x256xf32>
    %cst_66 = arith.constant dense<0.000000e+00> : vector<1x16xf32>
    %70 = tpu.matmul %69, %66, %cst_66 {dimension_numbers = #tpu.dot_dimension_numbers<[1], [0], [0], [1], [0, 0, 1, 1], [], []>} : vector<1x256xf32>, vector<256x16xf32>, vector<1x16xf32> -> vector<1x16xf32>
    %cst_67 = arith.constant 3.906250e-03 : f32
    %71 = vector.broadcast %cst_67 : f32 to vector<1x16xf32>
    %72 = arith.mulf %70, %71 : vector<1x16xf32>
    %cst_68 = arith.constant dense<0.000000e+00> : vector<1x256xf32>
    %73 = tpu.matmul %72, %67, %cst_68 {dimension_numbers = #tpu.dot_dimension_numbers<[1], [0], [0], [1], [0, 0, 1, 1], [], []>} : vector<1x16xf32>, vector<16x256xf32>, vector<1x256xf32> -> vector<1x256xf32>
    %74 = vector.broadcast %73 : vector<1x256xf32> to vector<16x256xf32>
    %75 = arith.subf %65, %74 : vector<16x256xf32>
    %76 = arith.mulf %75, %75 : vector<16x256xf32>
    %cst_69 = arith.constant dense<0.000000e+00> : vector<256xf32>
    %77 = vector.multi_reduction <add>, %76, %cst_69 [0] : vector<16x256xf32> to vector<256xf32>
    %78 = vector.shape_cast %77 : vector<256xf32> to vector<1x256xf32>
    %cst_70 = arith.constant dense<0.000000e+00> : vector<1x16xf32>
    %79 = tpu.matmul %78, %66, %cst_70 {dimension_numbers = #tpu.dot_dimension_numbers<[1], [0], [0], [1], [0, 0, 1, 1], [], []>} : vector<1x256xf32>, vector<256x16xf32>, vector<1x16xf32> -> vector<1x16xf32>
    %cst_71 = arith.constant 3.906250e-03 : f32
    %80 = vector.broadcast %cst_71 : f32 to vector<1x16xf32>
    %81 = arith.mulf %79, %80 : vector<1x16xf32>
    %cst_72 = arith.constant 9.99999974E-6 : f32
    %82 = vector.broadcast %cst_72 : f32 to vector<1x16xf32>
    %83 = arith.addf %81, %82 : vector<1x16xf32>
    %84 = math.rsqrt %83 : vector<1x16xf32>
    %cst_73 = arith.constant dense<0.000000e+00> : vector<1x256xf32>
    %85 = tpu.matmul %84, %67, %cst_73 {dimension_numbers = #tpu.dot_dimension_numbers<[1], [0], [0], [1], [0, 0, 1, 1], [], []>} : vector<1x16xf32>, vector<16x256xf32>, vector<1x256xf32> -> vector<1x256xf32>
    %86 = vector.broadcast %85 : vector<1x256xf32> to vector<16x256xf32>
    %87 = arith.mulf %75, %86 : vector<16x256xf32>
    %cst_74 = arith.constant 0.000000e+00 : f32
    %88 = vector.broadcast %cst_74 : f32 to vector<16x256xf32>
    %89 = arith.maximumf %87, %88 : vector<16x256xf32>
    %c0_75 = arith.constant 0 : index
    %c0_76 = arith.constant 0 : index
    %c0_77 = arith.constant 0 : index
    %90 = vector.load %arg10[%c0_75, %c0_76, %c0_77] : memref<3x8x16xf32, #tpu.memory_space<vmem>>, vector<1x8x16xf32>
    %91 = vector.shape_cast %90 : vector<1x8x16xf32> to vector<8x16xf32>
    %cst_78 = arith.constant dense<0.000000e+00> : vector<8x256xf32>
    %92 = tpu.matmul %91, %89, %cst_78 {dimension_numbers = #tpu.dot_dimension_numbers<[1], [0], [0], [1], [0, 0, 1, 1], [], []>} : vector<8x16xf32>, vector<16x256xf32>, vector<8x256xf32> -> vector<8x256xf32>
    %c0_79 = arith.constant 0 : index
    %c0_80 = arith.constant 0 : index
    %c0_81 = arith.constant 0 : index
    %93 = vector.load %arg11[%c0_79, %c0_80, %c0_81] : memref<3x256x128xf32, #tpu.memory_space<vmem>>, vector<1x256x128xf32>
    %94 = vector.shape_cast %93 : vector<1x256x128xf32> to vector<256x128xf32>
    %cst_82 = arith.constant dense<0.000000e+00> : vector<8x128xf32>
    %95 = tpu.matmul %92, %94, %cst_82 {dimension_numbers = #tpu.dot_dimension_numbers<[1], [0], [0], [1], [0, 0, 1, 1], [], []>} : vector<8x256xf32>, vector<256x128xf32>, vector<8x128xf32> -> vector<8x128xf32>
    %c1_83 = arith.constant 1 : index
    %c0_84 = arith.constant 0 : index
    %c0_85 = arith.constant 0 : index
    %96 = vector.load %arg10[%c1_83, %c0_84, %c0_85] : memref<3x8x16xf32, #tpu.memory_space<vmem>>, vector<1x8x16xf32>
    %97 = vector.shape_cast %96 : vector<1x8x16xf32> to vector<8x16xf32>
    %cst_86 = arith.constant dense<0.000000e+00> : vector<8x256xf32>
    %98 = tpu.matmul %97, %89, %cst_86 {dimension_numbers = #tpu.dot_dimension_numbers<[1], [0], [0], [1], [0, 0, 1, 1], [], []>} : vector<8x16xf32>, vector<16x256xf32>, vector<8x256xf32> -> vector<8x256xf32>
    %c1_87 = arith.constant 1 : index
    %c0_88 = arith.constant 0 : index
    %c0_89 = arith.constant 0 : index
    %99 = vector.load %arg11[%c1_87, %c0_88, %c0_89] : memref<3x256x128xf32, #tpu.memory_space<vmem>>, vector<1x256x128xf32>
    %100 = vector.shape_cast %99 : vector<1x256x128xf32> to vector<256x128xf32>
    %cst_90 = arith.constant dense<0.000000e+00> : vector<8x128xf32>
    %101 = tpu.matmul %98, %100, %cst_90 {dimension_numbers = #tpu.dot_dimension_numbers<[1], [0], [0], [1], [0, 0, 1, 1], [], []>} : vector<8x256xf32>, vector<256x128xf32>, vector<8x128xf32> -> vector<8x128xf32>
    %102 = arith.addf %95, %101 : vector<8x128xf32>
    %c2_91 = arith.constant 2 : index
    %c0_92 = arith.constant 0 : index
    %c0_93 = arith.constant 0 : index
    %103 = vector.load %arg10[%c2_91, %c0_92, %c0_93] : memref<3x8x16xf32, #tpu.memory_space<vmem>>, vector<1x8x16xf32>
    %104 = vector.shape_cast %103 : vector<1x8x16xf32> to vector<8x16xf32>
    %cst_94 = arith.constant dense<0.000000e+00> : vector<8x256xf32>
    %105 = tpu.matmul %104, %89, %cst_94 {dimension_numbers = #tpu.dot_dimension_numbers<[1], [0], [0], [1], [0, 0, 1, 1], [], []>} : vector<8x16xf32>, vector<16x256xf32>, vector<8x256xf32> -> vector<8x256xf32>
    %c2_95 = arith.constant 2 : index
    %c0_96 = arith.constant 0 : index
    %c0_97 = arith.constant 0 : index
    %106 = vector.load %arg11[%c2_95, %c0_96, %c0_97] : memref<3x256x128xf32, #tpu.memory_space<vmem>>, vector<1x256x128xf32>
    %107 = vector.shape_cast %106 : vector<1x256x128xf32> to vector<256x128xf32>
    %cst_98 = arith.constant dense<0.000000e+00> : vector<8x128xf32>
    %108 = tpu.matmul %105, %107, %cst_98 {dimension_numbers = #tpu.dot_dimension_numbers<[1], [0], [0], [1], [0, 0, 1, 1], [], []>} : vector<8x256xf32>, vector<256x128xf32>, vector<8x128xf32> -> vector<8x128xf32>
    %109 = arith.addf %102, %108 : vector<8x128xf32>
    %c0_99 = arith.constant 0 : index
    %c0_100 = arith.constant 0 : index
    %110 = vector.load %arg12[%c0_99, %c0_100] : memref<128x16xf32, #tpu.memory_space<vmem>>, vector<128x16xf32>
    %c0_101 = arith.constant 0 : index
    %c0_102 = arith.constant 0 : index
    %111 = vector.load %arg13[%c0_101, %c0_102] : memref<16x128xf32, #tpu.memory_space<vmem>>, vector<16x128xf32>
    %cst_103 = arith.constant dense<0.000000e+00> : vector<128xf32>
    %112 = vector.multi_reduction <add>, %109, %cst_103 [0] : vector<8x128xf32> to vector<128xf32>
    %113 = vector.shape_cast %112 : vector<128xf32> to vector<1x128xf32>
    %cst_104 = arith.constant dense<0.000000e+00> : vector<1x16xf32>
    %114 = tpu.matmul %113, %110, %cst_104 {dimension_numbers = #tpu.dot_dimension_numbers<[1], [0], [0], [1], [0, 0, 1, 1], [], []>} : vector<1x128xf32>, vector<128x16xf32>, vector<1x16xf32> -> vector<1x16xf32>
    %cst_105 = arith.constant 1.562500e-02 : f32
    %115 = vector.broadcast %cst_105 : f32 to vector<1x16xf32>
    %116 = arith.mulf %114, %115 : vector<1x16xf32>
    %cst_106 = arith.constant dense<0.000000e+00> : vector<1x128xf32>
    %117 = tpu.matmul %116, %111, %cst_106 {dimension_numbers = #tpu.dot_dimension_numbers<[1], [0], [0], [1], [0, 0, 1, 1], [], []>} : vector<1x16xf32>, vector<16x128xf32>, vector<1x128xf32> -> vector<1x128xf32>
    %118 = vector.broadcast %117 : vector<1x128xf32> to vector<8x128xf32>
    %119 = arith.subf %109, %118 : vector<8x128xf32>
    %120 = arith.mulf %119, %119 : vector<8x128xf32>
    %cst_107 = arith.constant dense<0.000000e+00> : vector<128xf32>
    %121 = vector.multi_reduction <add>, %120, %cst_107 [0] : vector<8x128xf32> to vector<128xf32>
    %122 = vector.shape_cast %121 : vector<128xf32> to vector<1x128xf32>
    %cst_108 = arith.constant dense<0.000000e+00> : vector<1x16xf32>
    %123 = tpu.matmul %122, %110, %cst_108 {dimension_numbers = #tpu.dot_dimension_numbers<[1], [0], [0], [1], [0, 0, 1, 1], [], []>} : vector<1x128xf32>, vector<128x16xf32>, vector<1x16xf32> -> vector<1x16xf32>
    %cst_109 = arith.constant 1.562500e-02 : f32
    %124 = vector.broadcast %cst_109 : f32 to vector<1x16xf32>
    %125 = arith.mulf %123, %124 : vector<1x16xf32>
    %cst_110 = arith.constant 9.99999974E-6 : f32
    %126 = vector.broadcast %cst_110 : f32 to vector<1x16xf32>
    %127 = arith.addf %125, %126 : vector<1x16xf32>
    %128 = math.rsqrt %127 : vector<1x16xf32>
    %cst_111 = arith.constant dense<0.000000e+00> : vector<1x128xf32>
    %129 = tpu.matmul %128, %111, %cst_111 {dimension_numbers = #tpu.dot_dimension_numbers<[1], [0], [0], [1], [0, 0, 1, 1], [], []>} : vector<1x16xf32>, vector<16x128xf32>, vector<1x128xf32> -> vector<1x128xf32>
    %130 = vector.broadcast %129 : vector<1x128xf32> to vector<8x128xf32>
    %131 = arith.mulf %119, %130 : vector<8x128xf32>
    %cst_112 = arith.constant 0.000000e+00 : f32
    %132 = vector.broadcast %cst_112 : f32 to vector<8x128xf32>
    %133 = arith.maximumf %131, %132 : vector<8x128xf32>
    %cst_113 = arith.constant dense<0.000000e+00> : vector<128xf32>
    %134 = vector.multi_reduction <add>, %133, %cst_113 [0] : vector<8x128xf32> to vector<128xf32>
    %135 = vector.shape_cast %134 : vector<128xf32> to vector<1x128xf32>
    %cst_114 = arith.constant dense<0.000000e+00> : vector<1x16xf32>
    %136 = tpu.matmul %135, %110, %cst_114 {dimension_numbers = #tpu.dot_dimension_numbers<[1], [0], [0], [1], [0, 0, 1, 1], [], []>} : vector<1x128xf32>, vector<128x16xf32>, vector<1x16xf32> -> vector<1x16xf32>
    %cst_115 = arith.constant 1.562500e-02 : f32
    %137 = vector.broadcast %cst_115 : f32 to vector<1x16xf32>
    %138 = arith.mulf %136, %137 : vector<1x16xf32>
    %c0_116 = arith.constant 0 : index
    %c0_117 = arith.constant 0 : index
    %139 = vector.load %arg14[%c0_116, %c0_117] : memref<16x4xf32, #tpu.memory_space<vmem>>, vector<16x4xf32>
    %cst_118 = arith.constant dense<0.000000e+00> : vector<1x4xf32>
    %140 = tpu.matmul %138, %139, %cst_118 {dimension_numbers = #tpu.dot_dimension_numbers<[1], [0], [0], [1], [0, 0, 1, 1], [], []>} : vector<1x16xf32>, vector<16x4xf32>, vector<1x4xf32> -> vector<1x4xf32>
    %c0_119 = arith.constant 0 : index
    %c0_120 = arith.constant 0 : index
    %141 = vector.load %arg15[%c0_119, %c0_120] : memref<1x4xf32, #tpu.memory_space<vmem>>, vector<1x4xf32>
    %142 = arith.addf %140, %141 : vector<1x4xf32>
    %c0_121 = arith.constant 0 : index
    %c0_122 = arith.constant 0 : index
    %c0_123 = arith.constant 0 : index
    %143 = vector.load %arg16[%c0_121, %c0_122, %c0_123] : memref<1x1x4xf32, #tpu.memory_space<vmem>>, vector<1x1x4xf32>
    %144 = vector.shape_cast %143 : vector<1x1x4xf32> to vector<1x4xf32>
    %145 = vector.shape_cast %142 : vector<1x4xf32> to vector<1x1x4xf32>
    tpu.vector_store %arg16[%c0_121, %c0_122, %c0_123], %145 {strides = array<i32>} : memref<1x1x4xf32, #tpu.memory_space<vmem>>, vector<1x1x4xf32>,
    return
  }
  func.func @transform_0(%arg0: i32) -> (i32, i32, i32) {
    %c0_i32 = arith.constant 0 : i32
    %c0_i32_0 = arith.constant 0 : i32
    %c0_i32_1 = arith.constant 0 : i32
    return %arg0, %c0_i32, %c0_i32_0 : i32, i32, i32
  }
  func.func @transform_1(%arg0: i32) -> (i32, i32, i32) {
    %c0_i32 = arith.constant 0 : i32
    %c0_i32_0 = arith.constant 0 : i32
    %c0_i32_1 = arith.constant 0 : i32
    %c0_i32_2 = arith.constant 0 : i32
    return %c0_i32, %c0_i32_0, %c0_i32_1 : i32, i32, i32
  }
  func.func @transform_2(%arg0: i32) -> (i32, i32, i32) {
    %c0_i32 = arith.constant 0 : i32
    %c0_i32_0 = arith.constant 0 : i32
    %c0_i32_1 = arith.constant 0 : i32
    %c0_i32_2 = arith.constant 0 : i32
    return %c0_i32, %c0_i32_0, %c0_i32_1 : i32, i32, i32
  }
  func.func @transform_3(%arg0: i32) -> (i32, i32) {
    %c0_i32 = arith.constant 0 : i32
    %c0_i32_0 = arith.constant 0 : i32
    %c0_i32_1 = arith.constant 0 : i32
    return %c0_i32, %c0_i32_0 : i32, i32
  }
  func.func @transform_4(%arg0: i32) -> (i32, i32) {
    %c0_i32 = arith.constant 0 : i32
    %c0_i32_0 = arith.constant 0 : i32
    %c0_i32_1 = arith.constant 0 : i32
    return %c0_i32, %c0_i32_0 : i32, i32
  }
  func.func @transform_5(%arg0: i32) -> (i32, i32, i32) {
    %c0_i32 = arith.constant 0 : i32
    %c0_i32_0 = arith.constant 0 : i32
    %c0_i32_1 = arith.constant 0 : i32
    %c0_i32_2 = arith.constant 0 : i32
    return %c0_i32, %c0_i32_0, %c0_i32_1 : i32, i32, i32
  }
  func.func @transform_6(%arg0: i32) -> (i32, i32, i32) {
    %c0_i32 = arith.constant 0 : i32
    %c0_i32_0 = arith.constant 0 : i32
    %c0_i32_1 = arith.constant 0 : i32
    %c0_i32_2 = arith.constant 0 : i32
    return %c0_i32, %c0_i32_0, %c0_i32_1 : i32, i32, i32
  }
  func.func @transform_7(%arg0: i32) -> (i32, i32) {
    %c0_i32 = arith.constant 0 : i32
    %c0_i32_0 = arith.constant 0 : i32
    %c0_i32_1 = arith.constant 0 : i32
    return %c0_i32, %c0_i32_0 : i32, i32
  }
  func.func @transform_8(%arg0: i32) -> (i32, i32) {
    %c0_i32 = arith.constant 0 : i32
    %c0_i32_0 = arith.constant 0 : i32
    %c0_i32_1 = arith.constant 0 : i32
    return %c0_i32, %c0_i32_0 : i32, i32
  }
  func.func @transform_9(%arg0: i32) -> (i32, i32, i32) {
    %c0_i32 = arith.constant 0 : i32
    %c0_i32_0 = arith.constant 0 : i32
    %c0_i32_1 = arith.constant 0 : i32
    %c0_i32_2 = arith.constant 0 : i32
    return %c0_i32, %c0_i32_0, %c0_i32_1 : i32, i32, i32
  }
  func.func @transform_10(%arg0: i32) -> (i32, i32, i32) {
    %c0_i32 = arith.constant 0 : i32
    %c0_i32_0 = arith.constant 0 : i32
    %c0_i32_1 = arith.constant 0 : i32
    %c0_i32_2 = arith.constant 0 : i32
    return %c0_i32, %c0_i32_0, %c0_i32_1 : i32, i32, i32
  }
  func.func @transform_11(%arg0: i32) -> (i32, i32) {
    %c0_i32 = arith.constant 0 : i32
    %c0_i32_0 = arith.constant 0 : i32
    %c0_i32_1 = arith.constant 0 : i32
    return %c0_i32, %c0_i32_0 : i32, i32
  }
  func.func @transform_12(%arg0: i32) -> (i32, i32) {
    %c0_i32 = arith.constant 0 : i32
    %c0_i32_0 = arith.constant 0 : i32
    %c0_i32_1 = arith.constant 0 : i32
    return %c0_i32, %c0_i32_0 : i32, i32
  }
  func.func @transform_13(%arg0: i32) -> (i32, i32) {
    %c0_i32 = arith.constant 0 : i32
    %c0_i32_0 = arith.constant 0 : i32
    %c0_i32_1 = arith.constant 0 : i32
    return %c0_i32, %c0_i32_0 : i32, i32
  }
  func.func @transform_14(%arg0: i32) -> (i32, i32) {
    %c0_i32 = arith.constant 0 : i32
    %c0_i32_0 = arith.constant 0 : i32
    %c0_i32_1 = arith.constant 0 : i32
    return %c0_i32, %c0_i32_0 : i32, i32
  }
  func.func @transform_15(%arg0: i32) -> (i32, i32, i32) {
    %c0_i32 = arith.constant 0 : i32
    %c0_i32_0 = arith.constant 0 : i32
    %c0_i32_1 = arith.constant 0 : i32
    return %arg0, %c0_i32, %c0_i32_0 : i32, i32, i32
  }
}

</mosaic_0001>

<bundles_post_ra>
// kernel: _lambda_.1
= control target key start
LH: loop header
LB: loop body
LE: loop exit
PB: predicated region body
PF: predicated region fallthrough
CT: control target
= control target key end

     0   :  { %s5386_s0 = inlined_call_operand.vmem [shape: f32[2,64,192], index: 0, kind: input, shape index: {}]   ;;  %s5387_s1 = inlined_call_operand.hbm [shape: f32[3,32,64], index: 1, kind: input, shape index: {}]   ;;  %s5388_s2 = inlined_call_operand.vmem [shape: f32[3,192,256], index: 2, kind: input, shape index: {}]   ;;  %s5389_s3 = inlined_call_operand.hbm [shape: f32[256,8], index: 3, kind: input, shape index: {}]   ;;  %s5390_s4 = inlined_call_operand.hbm [shape: f32[8,256], index: 4, kind: input, shape index: {}]   ;;  %s5391_s5 = inlined_call_operand.hbm [shape: f32[3,16,32], index: 5, kind: input, shape index: {}]   ;;  %s5392_s6 = inlined_call_operand.hbm [shape: f32[3,256,256], index: 6, kind: input, shape index: {}]   ;;  %s5393_s7 = inlined_call_operand.vmem [shape: f32[256,16], index: 7, kind: input, shape index: {}]   ;;  %s5394_s8 = inlined_call_operand.hbm [shape: f32[16,256], index: 8, kind: input, shape index: {}]   ;;  %s5395_s9 = inlined_call_operand.hbm [shape: f32[3,8,16], index: 9, kind: input, shape index: {}]   ;;  %s5396_s10 = inlined_call_operand.hbm [shape: f32[3,256,128], index: 10, kind: input, shape index: {}]   ;;  %s5397_s11 = inlined_call_operand.hbm [shape: f32[128,16], index: 11, kind: input, shape index: {}]   ;;  %s5398_s12 = inlined_call_operand.hbm [shape: f32[16,128], index: 12, kind: input, shape index: {}]   ;;  %s5399_s13 = inlined_call_operand.hbm [shape: f32[16,4], index: 13, kind: input, shape index: {}]   ;;  %s5400_s14 = inlined_call_operand.vmem [shape: f32[1,4], index: 14, kind: input, shape index: {}]   ;;  %s5401_s15 = inlined_call_operand.vmem [shape: f32[2,1,4], index: 15, kind: output, shape index: {}]  }
   0x1   :  { %5404 = sst [smem:[#allocation26_spill]] %s5389_s3 }
   0x2   :  { %5405 = sst [smem:[#allocation27_spill]] %s5391_s5 }
   0x3   :  { %5406 = sst [smem:[#allocation28_spill]] %s5394_s8 }
   0x4   :  { %5407 = sst [smem:[#allocation29_spill]] %s5396_s10 }
   0x5   :  { %20 = vsyncpa [#allocation3], 0 }
   0x6   :  { %21 = vsyncpa [#allocation5], 0 }
   0x7   :  { %22 = vsyncpa [#allocation8], 0 }
   0x8   :  { %23 = vsyncpa [#allocation11], 0 }
   0x9   :  { %24 = vsyncpa [#allocation14], 0 }
   0xa   :  { %25 = vsyncpa [#allocation17], 0  ;;  %s4135_s18 = smov 0  }
   0xb LB: > { %5408 = sst [smem:[#allocation25_spill]] %s4038_s18  ;;  %s4141_s19 = sadd.s32 4294967295, %s4038_s18   ;;  %s4038_s18 = sphi %s4135_s18, %s31_s18  }
   0xc   : > { %p3338_p0 = scmp.ge.s32.totalorder %s4038_s18, 1  ;;  %p382_p1 = scmp.lt.s32.totalorder %s4038_s18, 3 }
   0xd   : > { %p3627_p2 = scmp.eq.s32.totalorder %s4141_s19, 0  ;;  %s5409_s3 = sld [smem:[#allocation26_spill]] }
   0xe   : > { %p4149_p3 = pnand %p3338_p0, %p382_p1  ;;  %s5411_s5 = sld [smem:[#allocation27_spill]] }
   0xf   : > { %s4040_s27 = smov [#allocation4]   ;;  %s4041_s30 = smov [#allocation7]  }
  0x10   : > { %p3593_p4 = pneg %p4149_p3  ;;  %s412_s28 = sshll.u32 %s4040_s27, 4  ;;  %s413_s28 = int_to_ptr.vmem [resolvable:$true] %s412_s28 }
  0x11   : > { %s438_s16 = sshll.u32 %s4041_s30, 4  ;;  %s4042_s17 = smov 128   ;;  %s439_s16 = int_to_ptr.vmem [resolvable:$true] %s438_s16 }
  0x12   : > { %p4160_p5 = pnand %p3627_p2, %p3593_p4  ;;  %s4043_s20 = smov 8  }
  0x13   : > { %s410_s22 = sshll.u32 %s5409_s3, 4  ;;  %s5413_s8 = sld [smem:[#allocation28_spill]]  ;;  %s411_s22 = int_to_ptr.hbm [resolvable:$true] %s410_s22 }
  0x14   : > { %s436_s26 = sshll.u32 %s5411_s5, 4  ;;  %s4044_s27 = smov [#allocation10]   ;;  %s437_s26 = int_to_ptr.hbm [resolvable:$true] %s436_s26 }
  0x15   : > { %3599 = dma.hbm_to_vmem [thread:$0]  (!%p4160_p5), %s411_s22, 4096, %s413_s28, [#allocation5], %s4042_s17, %s4042_s17, %s4043_s20  }
  0x16   : > { %3605 = dma.hbm_to_vmem [thread:$0]  (!%p4160_p5), %s437_s26, 768, %s439_s16, [#allocation8], %s4042_s17, %s4042_s17, %s4043_s20  }
  0x17   : > { %s469_s30 = sshll.u32 %s4044_s27, 4  ;;  %s5414_s10 = sld [smem:[#allocation29_spill]]  ;;  %s470_s30 = int_to_ptr.vmem [resolvable:$true] %s469_s30 }
  0x18   : > { %s5403_s22 = smov 256   ;;  %s4046_s28 = smov 16  }
  0x19   : > { %s467_s25 = sshll.u32 %s5413_s8, 4  ;;  %s523_s21 = sshll.u32 %s5398_s12, 4  ;;  %s468_s25 = int_to_ptr.hbm [resolvable:$true] %s467_s25  ;;  %s524_s21 = int_to_ptr.hbm [resolvable:$true] %s523_s21 }
  0x1a   : > { %3611 = dma.hbm_to_vmem [thread:$0]  (!%p4160_p5), %s468_s25, 512, %s470_s30, [#allocation11], %s5403_s22, %s5403_s22, %s4046_s28  }
  0x1b   : > { %s4047_s24 = smov [#allocation13]   ;;  %s4048_s3 = smov [#allocation16]  }
  0x1c   : > { %s497_s27 = sshll.u32 %s4047_s24, 4  ;;  %s525_s5 = sshll.u32 %s4048_s3, 4  ;;  %s498_s27 = int_to_ptr.vmem [resolvable:$true] %s497_s27  ;;  %s526_s5 = int_to_ptr.vmem [resolvable:$true] %s525_s5 }
  0x1d   : > { %s495_s18 = sshll.u32 %s5414_s10, 4  ;;  %s393_s25 = sshll.u32 %s5387_s1, 4  ;;  %s496_s18 = int_to_ptr.hbm [resolvable:$true] %s495_s18  ;;  %s394_s25 = int_to_ptr.hbm [resolvable:$true] %s393_s25 }
  0x1e   : > { %3617 = dma.hbm_to_vmem [thread:$0]  (!%p4160_p5), %s496_s18, 12288, %s498_s27, [#allocation14], %s4042_s17, %s4042_s17, %s4043_s20  }
  0x1f   : > { %3623 = dma.hbm_to_vmem [thread:$0]  (!%p4160_p5), %s524_s21, 256, %s526_s5, [#allocation17], %s4042_s17, %s4042_s17, %s4043_s20  }
  0x20   : > { %s425_s16 = sshll.u32 %s5390_s4, 4  ;;  %s4049_s24 = smov [#allocation2]   ;;  %s426_s16 = int_to_ptr.hbm [resolvable:$true] %s425_s16 }
  0x21   : > { %s395_s18 = sshll.u32 %s4049_s24, 4  ;;  %s4050_s8 = smov [#allocation6]   ;;  %s396_s18 = int_to_ptr.vmem [resolvable:$true] %s395_s18 }
  0x22   : > { %3596 = dma.hbm_to_vmem [thread:$0]  (!%p4160_p5), %s394_s25, 1536, %s396_s18, [#allocation3], %s4042_s17, %s4042_s17, %s4043_s20  }
  0x23   : > { %s427_s10 = sshll.u32 %s4050_s8, 4  ;;  %s450_s21 = sshll.u32 %s5392_s6, 4  ;;  %s428_s10 = int_to_ptr.vmem [resolvable:$true] %s427_s10  ;;  %s451_s21 = int_to_ptr.hbm [resolvable:$true] %s450_s21 }
  0x24   : > { %3602 = dma.hbm_to_vmem [thread:$0]  (!%p4160_p5), %s426_s16, 256, %s428_s10, [#allocation5]  }
  0x25   : > { %s481_s26 = sshll.u32 %s5395_s9, 4  ;;  %s4051_s24 = smov [#allocation9]   ;;  %s482_s26 = int_to_ptr.hbm [resolvable:$true] %s481_s26 }
  0x26   : > { %s452_s22 = sshll.u32 %s4051_s24, 4  ;;  %s5415_s25 = smov 256   ;;  %s453_s22 = int_to_ptr.vmem [resolvable:$true] %s452_s22 }
  0x27   : > { %3608 = dma.hbm_to_vmem [thread:$0]  (!%p4160_p5), %s451_s21, 24576, %s453_s22, [#allocation8], %s5415_s25, %s5415_s25, %s4046_s28  }
  0x28   : > { %s4052_s18 = smov [#allocation12]   ;;  %s509_s16 = sshll.u32 %s5397_s11, 4  ;;  %s510_s16 = int_to_ptr.hbm [resolvable:$true] %s509_s16 }
  0x29   : > { %s483_s8 = sshll.u32 %s4052_s18, 4  ;;  %s537_s30 = sshll.u32 %s5399_s13, 4  ;;  %s484_s8 = int_to_ptr.vmem [resolvable:$true] %s483_s8  ;;  %s538_s30 = int_to_ptr.hbm [resolvable:$true] %s537_s30 }
  0x2a   : > { %3614 = dma.hbm_to_vmem [thread:$0]  (!%p4160_p5), %s482_s26, 384, %s484_s8, [#allocation11], %s4042_s17, %s4042_s17, %s4043_s20  }
  0x2b   : > { %s4053_s24 = smov [#allocation15]   ;;  %s4054_s28 = smov [#allocation18]  }
  0x2c   : > { %s511_s22 = sshll.u32 %s4053_s24, 4  ;;  %s539_s21 = sshll.u32 %s4054_s28, 4  ;;  %s512_s22 = int_to_ptr.vmem [resolvable:$true] %s511_s22  ;;  %s540_s21 = int_to_ptr.vmem [resolvable:$true] %s539_s21 }
  0x2d   : > { %3620 = dma.hbm_to_vmem [thread:$0]  (!%p4160_p5), %s510_s16, 2048, %s512_s22, [#allocation14], %s4042_s17, %s4042_s17, %s4043_s20  }
  0x2e   : > { %3626 = dma.hbm_to_vmem [thread:$0]  (!%p4160_p5), %s538_s30, 256, %s540_s21, [#allocation17], %s4042_s17, %s4042_s17, %s4043_s20  }
  0x2f   : > { %566 = sbr.rel (%p4149_p3) target bundleno = 3475 (0xd93), region = 80 }
  0x34   : > { %4013 = dma.done.wait (%p3627_p2), [#allocation3], 1536  }
  0x35   : > { %4015 = vsyncadd (%p3627_p2), [#allocation3], 4294965760 }
  0x36   : > { %4017 = dma.done.wait (%p3627_p2), [#allocation5], 4352  }
  0x37   : > { %4019 = vsyncadd (%p3627_p2), [#allocation5], 4294962944 }
  0x38   : > { %4021 = dma.done.wait (%p3627_p2), [#allocation8], 25344  }
  0x39   : > { %4023 = vsyncadd (%p3627_p2), [#allocation8], 4294941952 }
  0x3a   : > { %4025 = dma.done.wait (%p3627_p2), [#allocation11], 896  }
  0x3b   : > { %4027 = vsyncadd (%p3627_p2), [#allocation11], 4294966400 }
  0x3c   : > { %4029 = dma.done.wait (%p3627_p2), [#allocation14], 14336  }
  0x3d   : > { %4031 = vsyncadd (%p3627_p2), [#allocation14], 4294952960 }
  0x3e   : > { %4033 = dma.done.wait (%p3627_p2), [#allocation17], 512  }
  0x3f   : > { %4035 = vsyncadd (%p3627_p2), [#allocation17], 4294966784  ;;  %p663_p6 = scmp.lt.s32.totalorder %s4141_s19, 1  ;;  %vm691_vm0 = vcmask 523264   ;;  %v811_v16 = vld [vmem:[#allocation2 + $0x20] sm:$0xff]  ;;  %v3411_v18 = vld [vmem:[%s5388_s2 + $0x270] sm:$0xff] }
  0x40   : > { %v687_v17 = vld [vmem:[#allocation2] sm:$0xff]  ;;  %v3412_v19 = vld [vmem:[%s5388_s2 + $0x278] sm:$0xff]  ;;  %v3427_v20 = vld [vmem:[%s5388_s2 + $0x2f0] sm:$0xff]  ;;  %vm1543_vm1 = vcmask 64512   ;;  %vm1738_vm5 = vcmask 261120   ;;  %vm2466_vm6 = vcmask 130048  }
  0x41   : > { %s5418_s19 = smov (!%p663_p6, %s4141_s19), 1  ;;  %v3428_v21 = vld [vmem:[%s5388_s2 + $0x2f8] sm:$0xff]  ;;  %v3409_v22 = vld [vmem:[%s5388_s2 + $0x260] sm:$0xff]  ;;  %v3410_v23 = vld [vmem:[%s5388_s2 + $0x268] sm:$0xff]  ;;  %vm3180_vm13 = vcmask 24576  }
  0x42   : > { %s3540_s23 = sshll.u32 %s5418_s19, 7  ;;  %v3425_v24 = vld [vmem:[%s5388_s2 + $0x2e0] sm:$0xff]  ;;  %v3426_v25 = vld [vmem:[%s5388_s2 + $0x2e8] sm:$0xff]  ;;  %v3407_v26 = vld [vmem:[%s5388_s2 + $0x250] sm:$0xff] }
  0x43   : > { %s4277_s20 = scalar_lea.vmem %s5386_s0, %s3540_s23  ;;  %v3408_v27 = vld [vmem:[%s5388_s2 + $0x258] sm:$0xff]  ;;  %v812_v28 = vld [vmem:[#allocation2 + $0x28] sm:$0xff]  ;;  %v3405_v29 = vld [vmem:[%s5388_s2 + $0x240] sm:$0xff]  ;;  %s670_s23 = scalar_lea.vmem %s5401_s15, %s5418_s19 }
  0x44   : > { %v4280_v0 = vld [vmem:[%s4277_s20 + $0x70] sm:$0xff]  ;;  %v4283_v1 = vld [vmem:[%s4277_s20 + $0x78] sm:$0xff]  ;;  %v4286_v2 = vld [vmem:[%s4277_s20 + $0x60] sm:$0xff] }
  0x45   : > { %835 = vmatpush.msra.mxu2 %v4280_v0  ;;  %864 = vmatpush.msra.mxu3 %v4283_v1  ;;  %v4291_v3 = vld [vmem:[%s4277_s20 + $0x68] sm:$0xff]  ;;  %v4294_v4 = vld [vmem:[%s4277_s20 + $0x50] sm:$0xff]  ;;  %v4297_v5 = vld [vmem:[%s4277_s20 + $0x58] sm:$0xff] }
  0x46   : > { %712 = vmatpush.msra.mxu0 %v4280_v0  ;;  %741 = vmatpush.msra.mxu1 %v4283_v1  ;;  %v4304_v6 = vld [vmem:[%s4277_s20 + $0x40] sm:$0xff]  ;;  %v4307_v7 = vld [vmem:[%s4277_s20 + $0x48] sm:$0xff]  ;;  %v4314_v8 = vld [vmem:[%s4277_s20 + $0x30] sm:$0xff] }
  0x47   : > { %836 = vmatpush.msra.mxu2 %v4286_v2  ;;  %865 = vmatpush.msra.mxu3 %v4291_v3  ;;  %v4317_v9 = vld [vmem:[%s4277_s20 + $0x38] sm:$0xff]  ;;  %v4324_v10 = vld [vmem:[%s4277_s20 + $0x20] sm:$0xff]  ;;  %v4327_v11 = vld [vmem:[%s4277_s20 + $0x28] sm:$0xff] }
  0x48   : > { %713 = vmatpush.msra.mxu0 %v4286_v2  ;;  %742 = vmatpush.msra.mxu1 %v4291_v3  ;;  %v4334_v12 = vld [vmem:[%s4277_s20 + $0x10] sm:$0xff]  ;;  %v4337_v13 = vld [vmem:[%s4277_s20 + $0x18] sm:$0xff]  ;;  %v4344_v14 = vld [vmem:[%s4277_s20] sm:$0xff] }
  0x49   : > { %837 = vmatpush.msra.mxu2 %v4294_v4  ;;  %866 = vmatpush.msra.mxu3 %v4297_v5  ;;  %v4347_v15 = vld [vmem:[%s4277_s20 + $0x8] sm:$0xff]  ;;  %v3403_v32 = vld [vmem:[%s5388_s2 + $0x230] sm:$0xff]  ;;  %v3404_v33 = vld [vmem:[%s5388_s2 + $0x238] sm:$0xff] }
  0x4a   : > { %714 = vmatpush.msra.mxu0 %v4294_v4  ;;  %743 = vmatpush.msra.mxu1 %v4297_v5  ;;  %v3406_v30 = vld [vmem:[%s5388_s2 + $0x248] sm:$0xff]  ;;  %v3423_v34 = vld [vmem:[%s5388_s2 + $0x2d0] sm:$0xff]  ;;  %v3424_v35 = vld [vmem:[%s5388_s2 + $0x2d8] sm:$0xff] }
  0x4b   : > { %838 = vmatpush.msra.mxu2 %v4304_v6  ;;  %867 = vmatpush.msra.mxu3 %v4307_v7  ;;  %v688_v31 = vld [vmem:[#allocation2 + $0x8] sm:$0xff]  ;;  %v3401_v36 = vld [vmem:[%s5388_s2 + $0x220] sm:$0xff]  ;;  %v3399_v40 = vld [vmem:[%s5388_s2 + $0x210] sm:$0xff] }
  0x4c   : > { %715 = vmatpush.msra.mxu0 %v4304_v6  ;;  %744 = vmatpush.msra.mxu1 %v4307_v7  ;;  %v3402_v37 = vld [vmem:[%s5388_s2 + $0x228] sm:$0xff]  ;;  %v3421_v38 = vld [vmem:[%s5388_s2 + $0x2c0] sm:$0xff]  ;;  %v3400_v41 = vld [vmem:[%s5388_s2 + $0x218] sm:$0xff] }
  0x4d   : > { %839 = vmatpush.msra.mxu2 %v4314_v8  ;;  %868 = vmatpush.msra.mxu3 %v4317_v9  ;;  %v3422_v39 = vld [vmem:[%s5388_s2 + $0x2c8] sm:$0xff]  ;;  %v813_v42 = vld [vmem:[#allocation2 + $0x30] sm:$0xff]  ;;  %v3397_v43 = vld [vmem:[%s5388_s2 + $0x200] sm:$0xff] }
  0x4e   : > { %716 = vmatpush.msra.mxu0 %v4314_v8  ;;  %745 = vmatpush.msra.mxu1 %v4317_v9  ;;  %v3398_v44 = vld [vmem:[%s5388_s2 + $0x208] sm:$0xff]  ;;  %v689_v45 = vld [vmem:[#allocation2 + $0x10] sm:$0xff]  ;;  %v3396_v47 = vld [vmem:[%s5388_s2 + $0x1f8] sm:$0xff] }
  0x4f   : > { %840 = vmatpush.msra.mxu2 %v4324_v10  ;;  %869 = vmatpush.msra.mxu3 %v4327_v11  ;;  %v3395_v46 = vld [vmem:[%s5388_s2 + $0x1f0] sm:$0xff]  ;;  %v3420_v49 = vld [vmem:[%s5388_s2 + $0x2b8] sm:$0xff]  ;;  %v3393_v50 = vld [vmem:[%s5388_s2 + $0x1e0] sm:$0xff] }
  0x50   : > { %717 = vmatpush.msra.mxu0 %v4324_v10  ;;  %746 = vmatpush.msra.mxu1 %v4327_v11  ;;  %v3419_v48 = vld [vmem:[%s5388_s2 + $0x2b0] sm:$0xff]  ;;  %v3394_v51 = vld [vmem:[%s5388_s2 + $0x1e8] sm:$0xff]  ;;  %v3417_v52 = vld [vmem:[%s5388_s2 + $0x2a0] sm:$0xff] }
  0x51   : > { %841 = vmatpush.msra.mxu2 %v4334_v12  ;;  %870 = vmatpush.msra.mxu3 %v4337_v13  ;;  %v3418_v53 = vld [vmem:[%s5388_s2 + $0x2a8] sm:$0xff]  ;;  %v3391_v54 = vld [vmem:[%s5388_s2 + $0x1d0] sm:$0xff]  ;;  %v3392_v55 = vld [vmem:[%s5388_s2 + $0x1d8] sm:$0xff] }
  0x52   : > { %718 = vmatpush.msra.mxu0 %v4334_v12  ;;  %747 = vmatpush.msra.mxu1 %v4337_v13  ;;  %v814_v56 = vld [vmem:[#allocation2 + $0x38] sm:$0xff]  ;;  %v3389_v57 = vld [vmem:[%s5388_s2 + $0x1c0] sm:$0xff]  ;;  %v3390_v58 = vld [vmem:[%s5388_s2 + $0x1c8] sm:$0xff] }
  0x53   : > { %842 = vmatpush.msra.mxu2 %v4344_v14  ;;  %871 = vmatpush.msra.mxu3 %v4347_v15  ;;  %v690_v59 = vld [vmem:[#allocation2 + $0x18] sm:$0xff]  ;;  %v3387_v60 = vld [vmem:[%s5388_s2 + $0x1b0] sm:$0xff] }
  0x54   : > { %3373 = vmatmul.msk.f32.vlgmr.msra.gmra.mxu2 %vm691_vm0, %v811_v16  ;;  %3377 = vmatmul.msk.f32.vlgmr.msra.gmra.mxu3 %vm691_vm0, %v811_v16  ;;  %v3388_v61 = vld [vmem:[%s5388_s2 + $0x1b8] sm:$0xff]  ;;  %v3415_v62 = vld [vmem:[%s5388_s2 + $0x290] sm:$0xff]  ;;  %v3385_v16 = vld [vmem:[%s5388_s2 + $0x1a0] sm:$0xff] }
  0x55   : > { %719 = vmatpush.msra.mxu0 %v4344_v14  ;;  %748 = vmatpush.msra.mxu1 %v4347_v15  ;;  %v3416_v63 = vld [vmem:[%s5388_s2 + $0x298] sm:$0xff] }
  0x56   : > { %3365 = vmatmul.msk.f32.vlgmr.msra.gmra.mxu0 %vm691_vm0, %v687_v17  ;;  %3369 = vmatmul.msk.f32.vlgmr.msra.gmra.mxu1 %vm691_vm0, %v687_v17  ;;  %v3386_v17 = vld [vmem:[%s5388_s2 + $0x1a8] sm:$0xff] }
  0x57   : > { %946 = vmatpush.msrb.mxu0 %v3411_v18  ;;  %1004 = vmatpush.msrb.mxu2 %v3412_v19  ;;  %v3383_v18 = vld [vmem:[%s5388_s2 + $0x190] sm:$0xff]  ;;  %v3384_v19 = vld [vmem:[%s5388_s2 + $0x198] sm:$0xff] }
  0x58   : > { %983 = vmatpush.msrb.mxu1 %v3427_v20  ;;  %1041 = vmatpush.msrb.mxu3 %v3428_v21  ;;  %v3381_v20 = vld [vmem:[%s5388_s2 + $0x180] sm:$0xff] }
  0x59   : > { %947 = vmatpush.msrb.mxu0 %v3409_v22  ;;  %1005 = vmatpush.msrb.mxu2 %v3410_v23  ;;  %v3413_v21 = vld [vmem:[%s5388_s2 + $0x280] sm:$0xff]  ;;  %v3382_v22 = vld [vmem:[%s5388_s2 + $0x188] sm:$0xff] }
  0x5a   : > { %984 = vmatpush.msrb.mxu1 %v3425_v24  ;;  %1042 = vmatpush.msrb.mxu3 %v3426_v25  ;;  %v3414_v23 = vld [vmem:[%s5388_s2 + $0x288] sm:$0xff]  ;;  %v792_v24 = vld [vmem:[%s5388_s2 + $0xf0] sm:$0xff]  ;;  %v793_v25 = vld [vmem:[%s5388_s2 + $0xf8] sm:$0xff] }
  0x5b   : > { %948 = vmatpush.msrb.mxu0 %v3407_v26  ;;  %1006 = vmatpush.msrb.mxu2 %v3408_v27  ;;  %v790_v26 = vld [vmem:[%s5388_s2 + $0xe0] sm:$0xff]  ;;  %v791_v27 = vld [vmem:[%s5388_s2 + $0xe8] sm:$0xff] }
  0x5c   : > { %3374 = vmatmul.msk.f32.gmra.mxu2 %vm691_vm0, %v812_v28  ;;  %3378 = vmatmul.msk.f32.gmra.mxu3 %vm691_vm0, %v812_v28  ;;  %v788_v28 = vld [vmem:[%s5388_s2 + $0xd0] sm:$0xff] }
  0x5d   : > { %949 = vmatpush.msrb.mxu0 %v3405_v29  ;;  %1007 = vmatpush.msrb.mxu2 %v3406_v30  ;;  %v789_v29 = vld [vmem:[%s5388_s2 + $0xd8] sm:$0xff]  ;;  %v786_v30 = vld [vmem:[%s5388_s2 + $0xc0] sm:$0xff] }
  0x5e   : > { %3366 = vmatmul.msk.f32.gmra.mxu0 %vm691_vm0, %v688_v31  ;;  %3370 = vmatmul.msk.f32.gmra.mxu1 %vm691_vm0, %v688_v31  ;;  %v787_v31 = vld [vmem:[%s5388_s2 + $0xc8] sm:$0xff] }
  0x5f   : > { %950 = vmatpush.msrb.mxu0 %v3403_v32  ;;  %1008 = vmatpush.msrb.mxu2 %v3404_v33  ;;  %v784_v32 = vld [vmem:[%s5388_s2 + $0xb0] sm:$0xff]  ;;  %v785_v33 = vld [vmem:[%s5388_s2 + $0xb8] sm:$0xff] }
  0x60   : > { %985 = vmatpush.msrb.mxu1 %v3423_v34  ;;  %1043 = vmatpush.msrb.mxu3 %v3424_v35  ;;  %v782_v34 = vld [vmem:[%s5388_s2 + $0xa0] sm:$0xff]  ;;  %v783_v35 = vld [vmem:[%s5388_s2 + $0xa8] sm:$0xff] }
  0x61   : > { %951 = vmatpush.msrb.mxu0 %v3401_v36  ;;  %1009 = vmatpush.msrb.mxu2 %v3402_v37  ;;  %v780_v36 = vld [vmem:[%s5388_s2 + $0x90] sm:$0xff]  ;;  %v781_v37 = vld [vmem:[%s5388_s2 + $0x98] sm:$0xff] }
  0x62   : > { %986 = vmatpush.msrb.mxu1 %v3421_v38  ;;  %1044 = vmatpush.msrb.mxu3 %v3422_v39  ;;  %v778_v38 = vld [vmem:[%s5388_s2 + $0x80] sm:$0xff]  ;;  %v779_v39 = vld [vmem:[%s5388_s2 + $0x88] sm:$0xff] }
  0x63   : > { %952 = vmatpush.msrb.mxu0 %v3399_v40  ;;  %1010 = vmatpush.msrb.mxu2 %v3400_v41  ;;  %v776_v40 = vld [vmem:[%s5388_s2 + $0x70] sm:$0xff]  ;;  %v777_v41 = vld [vmem:[%s5388_s2 + $0x78] sm:$0xff] }
  0x64   : > { %3375 = vmatmul.msk.f32.gmra.mxu2 %vm691_vm0, %v813_v42  ;;  %3379 = vmatmul.msk.f32.gmra.mxu3 %vm691_vm0, %v813_v42  ;;  %v774_v42 = vld [vmem:[%s5388_s2 + $0x60] sm:$0xff] }
  0x65   : > { %953 = vmatpush.msrb.mxu0 %v3397_v43  ;;  %1011 = vmatpush.msrb.mxu2 %v3398_v44  ;;  %v775_v43 = vld [vmem:[%s5388_s2 + $0x68] sm:$0xff]  ;;  %v809_v44 = vld [vmem:[%s5388_s2 + $0x178] sm:$0xff] }
  0x66   : > { %3367 = vmatmul.msk.f32.gmra.mxu0 %vm691_vm0, %v689_v45  ;;  %3371 = vmatmul.msk.f32.gmra.mxu1 %vm691_vm0, %v689_v45  ;;  %v772_v45 = vld [vmem:[%s5388_s2 + $0x50] sm:$0xff] }
  0x67   : > { %954 = vmatpush.msrb.mxu0 %v3395_v46  ;;  %1012 = vmatpush.msrb.mxu2 %v3396_v47  ;;  %v773_v46 = vld [vmem:[%s5388_s2 + $0x58] sm:$0xff]  ;;  %v807_v47 = vld [vmem:[%s5388_s2 + $0x168] sm:$0xff] }
  0x68   : > { %987 = vmatpush.msrb.mxu1 %v3419_v48  ;;  %1045 = vmatpush.msrb.mxu3 %v3420_v49  ;;  %v770_v48 = vld [vmem:[%s5388_s2 + $0x40] sm:$0xff]  ;;  %v771_v49 = vld [vmem:[%s5388_s2 + $0x48] sm:$0xff] }
  0x69   : > { %955 = vmatpush.msrb.mxu0 %v3393_v50  ;;  %1013 = vmatpush.msrb.mxu2 %v3394_v51  ;;  %v805_v50 = vld [vmem:[%s5388_s2 + $0x158] sm:$0xff]  ;;  %v768_v51 = vld [vmem:[%s5388_s2 + $0x30] sm:$0xff] }
  0x6a   : > { %988 = vmatpush.msrb.mxu1 %v3417_v52  ;;  %1046 = vmatpush.msrb.mxu3 %v3418_v53  ;;  %v769_v52 = vld [vmem:[%s5388_s2 + $0x38] sm:$0xff]  ;;  %v803_v53 = vld [vmem:[%s5388_s2 + $0x148] sm:$0xff] }
  0x6b   : > { %956 = vmatpush.msrb.mxu0 %v3391_v54  ;;  %1014 = vmatpush.msrb.mxu2 %v3392_v55  ;;  %v766_v54 = vld [vmem:[%s5388_s2 + $0x20] sm:$0xff]  ;;  %v767_v55 = vld [vmem:[%s5388_s2 + $0x28] sm:$0xff] }
  0x6c   : > { %3376 = vmatmul.msk.f32.gmra.mxu2 %vm691_vm0, %v814_v56  ;;  %3380 = vmatmul.msk.f32.gmra.mxu3 %vm691_vm0, %v814_v56  ;;  %v801_v56 = vld [vmem:[%s5388_s2 + $0x138] sm:$0xff] }
  0x6d   : > { %957 = vmatpush.msrb.mxu0 %v3389_v57  ;;  %1015 = vmatpush.msrb.mxu2 %v3390_v58  ;;  %v764_v57 = vld [vmem:[%s5388_s2 + $0x10] sm:$0xff]  ;;  %v765_v58 = vld [vmem:[%s5388_s2 + $0x18] sm:$0xff] }
  0x6e   : > { %3368 = vmatmul.msk.f32.gmra.mxu0 %vm691_vm0, %v690_v59  ;;  %3372 = vmatmul.msk.f32.gmra.mxu1 %vm691_vm0, %v690_v59  ;;  %v799_v59 = vld [vmem:[%s5388_s2 + $0x128] sm:$0xff] }
  0x6f   : > { %958 = vmatpush.msrb.mxu0 %v3387_v60  ;;  %1016 = vmatpush.msrb.mxu2 %v3388_v61 }
  0x70   : > { %989 = vmatpush.msrb.mxu1 %v3415_v62  ;;  %1047 = vmatpush.msrb.mxu3 %v3416_v63  ;;  %v762_v62 = vld [vmem:[%s5388_s2] sm:$0xff]  ;;  %v763_v63 = vld [vmem:[%s5388_s2 + $0x8] sm:$0xff] }
  0x71   : > { %959 = vmatpush.msrb.mxu0 %v3385_v16  ;;  %1017 = vmatpush.msrb.mxu2 %v3386_v17  ;;  %v797_v16 = vld [vmem:[%s5388_s2 + $0x118] sm:$0xff]  ;;  %v808_v17 = vld [vmem:[%s5388_s2 + $0x170] sm:$0xff] }
  0x72   : > { %990 = vmatpush.msrb.mxu1 %v3413_v21  ;;  %1048 = vmatpush.msrb.mxu3 %v3414_v23 }
  0x73   : > { %960 = vmatpush.msrb.mxu0 %v3383_v18  ;;  %1018 = vmatpush.msrb.mxu2 %v3384_v19  ;;  %v795_v18 = vld [vmem:[%s5388_s2 + $0x108] sm:$0xff]  ;;  %v806_v19 = vld [vmem:[%s5388_s2 + $0x160] sm:$0xff] }
  0x74   : > { %1169 = vmatpush.msra.mxu3 %v809_v44  ;;  %3541 = vmatpush.msra.mxu1 %v808_v17  ;;  %v3478_v44 = vld [vmem:[%s5388_s2 + $0x3c8] sm:$0xff] }
  0x75   : > { %961 = vmatpush.msrb.mxu0 %v3381_v20  ;;  %1019 = vmatpush.msrb.mxu2 %v3382_v22  ;;  %v804_v20 = vld [vmem:[%s5388_s2 + $0x150] sm:$0xff] }
  0x76   : > { %1170 = vmatpush.msra.mxu3 %v807_v47  ;;  %3542 = vmatpush.msra.mxu1 %v806_v19  ;;  %v3497_v47 = vld [vmem:[%s5388_s2 + $0x460] sm:$0xff] }
  0x77   : > { %1074 = vmatpush.msra.mxu0 %v792_v24  ;;  %1132 = vmatpush.msra.mxu2 %v793_v25  ;;  %v802_v24 = vld [vmem:[%s5388_s2 + $0x140] sm:$0xff]  ;;  %v800_v25 = vld [vmem:[%s5388_s2 + $0x130] sm:$0xff] }
  0x78   : > { %1171 = vmatpush.msra.mxu3 %v805_v50  ;;  %3543 = vmatpush.msra.mxu1 %v804_v20  ;;  %v3500_v50 = vld [vmem:[%s5388_s2 + $0x478] sm:$0xff] }
  0x79   : > { %1075 = vmatpush.msra.mxu0 %v790_v26  ;;  %1133 = vmatpush.msra.mxu2 %v791_v27  ;;  %v798_v26 = vld [vmem:[%s5388_s2 + $0x120] sm:$0xff] }
  0x7a   : > { %1172 = vmatpush.msra.mxu3 %v803_v53  ;;  %3544 = vmatpush.msra.mxu1 %v802_v24 }
  0x7b   : > { %1076 = vmatpush.msra.mxu0 %v788_v28  ;;  %1134 = vmatpush.msra.mxu2 %v789_v29  ;;  %v796_v29 = vld [vmem:[%s5388_s2 + $0x110] sm:$0xff] }
  0x7c   : > { %1173 = vmatpush.msra.mxu3 %v801_v56  ;;  %3545 = vmatpush.msra.mxu1 %v800_v25  ;;  %v3469_v56 = vld [vmem:[%s5388_s2 + $0x380] sm:$0xff] }
  0x7d   : > { %1077 = vmatpush.msra.mxu0 %v786_v30  ;;  %1135 = vmatpush.msra.mxu2 %v787_v31  ;;  %v794_v31 = vld [vmem:[%s5388_s2 + $0x100] sm:$0xff] }
  0x7e   : > { %1174 = vmatpush.msra.mxu3 %v799_v59  ;;  %3546 = vmatpush.msra.mxu1 %v798_v26  ;;  %v3467_v59 = vld [vmem:[%s5388_s2 + $0x370] sm:$0xff] }
  0x7f   : > { %1078 = vmatpush.msra.mxu0 %v784_v32  ;;  %1136 = vmatpush.msra.mxu2 %v785_v33 }
  0x80   : > { %1175 = vmatpush.msra.mxu3 %v797_v16  ;;  %3547 = vmatpush.msra.mxu1 %v796_v29  ;;  %v3496_v16 = vld [vmem:[%s5388_s2 + $0x458] sm:$0xff] }
  0x81   : > { %1079 = vmatpush.msra.mxu0 %v782_v34  ;;  %1137 = vmatpush.msra.mxu2 %v783_v35 }
  0x82   : > { %1176 = vmatpush.msra.mxu3 %v795_v18  ;;  %3548 = vmatpush.msra.mxu1 %v794_v31  ;;  %v3491_v18 = vld [vmem:[%s5388_s2 + $0x430] sm:$0xff] }
  0x83   : > { %1080 = vmatpush.msra.mxu0 %v780_v36  ;;  %1138 = vmatpush.msra.mxu2 %v781_v37  ;;  %v3481_v36 = vld [vmem:[%s5388_s2 + $0x3e0] sm:$0xff]  ;;  %v3482_v37 = vld [vmem:[%s5388_s2 + $0x3e8] sm:$0xff] }
  0x85   : > { %1081 = vmatpush.msra.mxu0 %v778_v38  ;;  %1139 = vmatpush.msra.mxu2 %v779_v39  ;;  %v3479_v38 = vld [vmem:[%s5388_s2 + $0x3d0] sm:$0xff]  ;;  %v3480_v39 = vld [vmem:[%s5388_s2 + $0x3d8] sm:$0xff] }
  0x87   : > { %1082 = vmatpush.msra.mxu0 %v776_v40  ;;  %1140 = vmatpush.msra.mxu2 %v777_v41 }
  0x89   : > { %1083 = vmatpush.msra.mxu0 %v774_v42  ;;  %1141 = vmatpush.msra.mxu2 %v775_v43  ;;  %v3499_v42 = vld [vmem:[%s5388_s2 + $0x470] sm:$0xff]  ;;  %v3477_v43 = vld [vmem:[%s5388_s2 + $0x3c0] sm:$0xff] }
  0x8b   : > { %1084 = vmatpush.msra.mxu0 %v772_v45  ;;  %1142 = vmatpush.msra.mxu2 %v773_v46  ;;  %v3475_v45 = vld [vmem:[%s5388_s2 + $0x3b0] sm:$0xff]  ;;  %v3476_v46 = vld [vmem:[%s5388_s2 + $0x3b8] sm:$0xff] }
  0x8d   : > { %1085 = vmatpush.msra.mxu0 %v770_v48  ;;  %1143 = vmatpush.msra.mxu2 %v771_v49  ;;  %v3473_v48 = vld [vmem:[%s5388_s2 + $0x3a0] sm:$0xff]  ;;  %v3474_v49 = vld [vmem:[%s5388_s2 + $0x3a8] sm:$0xff] }
  0x8f   : > { %1086 = vmatpush.msra.mxu0 %v768_v51  ;;  %1144 = vmatpush.msra.mxu2 %v769_v52  ;;  %v3471_v51 = vld [vmem:[%s5388_s2 + $0x390] sm:$0xff]  ;;  %v3472_v52 = vld [vmem:[%s5388_s2 + $0x398] sm:$0xff] }
  0x91   : > { %1087 = vmatpush.msra.mxu0 %v766_v54  ;;  %1145 = vmatpush.msra.mxu2 %v767_v55  ;;  %v3495_v55 = vld [vmem:[%s5388_s2 + $0x450] sm:$0xff] }
  0x93   : > { %1088 = vmatpush.msra.mxu0 %v764_v57  ;;  %1146 = vmatpush.msra.mxu2 %v765_v58  ;;  %v3470_v57 = vld [vmem:[%s5388_s2 + $0x388] sm:$0xff] }
  0x94   : > { %v3498_v58 = vld [vmem:[%s5388_s2 + $0x468] sm:$0xff] }
  0x95   : > { %1089 = vmatpush.msra.mxu0 %v762_v62  ;;  %1147 = vmatpush.msra.mxu2 %v763_v63  ;;  %v3465_v62 = vld [vmem:[%s5388_s2 + $0x360] sm:$0xff]  ;;  %v3466_v63 = vld [vmem:[%s5388_s2 + $0x368] sm:$0xff] }
  0xd3   : > { %v4650_v21 = vpop.f32.mrf.mxu1  ;;  %v721_v32 = vpop.f32.mrf.mxu0 }
  0xd7   : > { %v844_v60 = vpop.f32.mrf.mxu2  ;;  %v873_v61 = vpop.f32.mrf.mxu3 }
  0xd8   : > { %962 = vmatmul.f32.vlgmr.msrb.gmra.mxu0 %v844_v60  ;;  %3429 = vmatmul.msk.f32.vlgmr.msrb.gmra.mxu1 %vm691_vm0, %v873_v61 }
  0xd9   : > { %1020 = vmatmul.f32.vlgmr.msrb.gmra.mxu2 %v844_v60  ;;  %3433 = vmatmul.msk.f32.vlgmr.msrb.gmra.mxu3 %vm691_vm0, %v873_v61  ;;  %v3493_v60 = vld [vmem:[%s5388_s2 + $0x440] sm:$0xff]  ;;  %v3468_v61 = vld [vmem:[%s5388_s2 + $0x378] sm:$0xff] }
  0xda   : > { %1111 = vmatpush.msrb.mxu0 %v808_v17  ;;  %1244 = vmatpush.msrb.mxu1 %v4283_v1  ;;  %v3463_v17 = vld [vmem:[%s5388_s2 + $0x350] sm:$0xff] }
  0xdb   : > { %v753_v30 = vpop.f32.mrf.mxu1  ;;  %v724_v1 = vpop.f32.mrf.mxu0  ;;  %1363 = vmatpush.msrb.mxu3 %v3499_v42 }
  0xdc   : > { %1112 = vmatpush.msrb.mxu0 %v806_v19  ;;  %1245 = vmatpush.msrb.mxu1 %v4291_v3  ;;  %v3464_v19 = vld [vmem:[%s5388_s2 + $0x358] sm:$0xff] }
  0xdd   : > { %1364 = vmatpush.msrb.mxu3 %v3497_v47 }
  0xde   : > { %1113 = vmatpush.msrb.mxu0 %v804_v20  ;;  %1246 = vmatpush.msrb.mxu1 %v4297_v5  ;;  %v1191_v5 = vld [vmem:[#allocation2 + $0x40] sm:$0xff] }
  0xdf   : > { %v847_v22 = vpop.f32.mrf.mxu2  ;;  %v876_v23 = vpop.f32.mrf.mxu3  ;;  %1365 = vmatpush.msrb.mxu3 %v3495_v55 }
  0xe0   : > { %965 = vmatmul.f32.gmra.mxu0 %v847_v22  ;;  %3430 = vmatmul.msk.f32.gmra.mxu1 %vm691_vm0, %v876_v23 }
  0xe1   : > { %1023 = vmatmul.f32.gmra.mxu2 %v847_v22  ;;  %3434 = vmatmul.msk.f32.gmra.mxu3 %vm691_vm0, %v876_v23  ;;  %v3461_v22 = vld [vmem:[%s5388_s2 + $0x340] sm:$0xff]  ;;  %v3462_v23 = vld [vmem:[%s5388_s2 + $0x348] sm:$0xff] }
  0xe2   : > { %1114 = vmatpush.msrb.mxu0 %v802_v24  ;;  %1247 = vmatpush.msrb.mxu1 %v4307_v7  ;;  %v1194_v7 = vld [vmem:[#allocation2 + $0x58] sm:$0xff]  ;;  %v3494_v24 = vld [vmem:[%s5388_s2 + $0x448] sm:$0xff] }
  0xe3   : > { %v756_v35 = vpop.f32.mrf.mxu1  ;;  %1366 = vmatpush.msrb.mxu3 %v3493_v60  ;;  %v1480_v60 = vld [vmem:[#allocation4 + $0xf0] sm:$0xff] }
  0xe4   : > { %1115 = vmatpush.msrb.mxu0 %v800_v25  ;;  %1248 = vmatpush.msrb.mxu1 %v4317_v9  ;;  %v3459_v25 = vld [vmem:[%s5388_s2 + $0x330] sm:$0xff] }
  0xe5   : > { %1367 = vmatpush.msrb.mxu3 %v3491_v18  ;;  %v1477_v18 = vld [vmem:[#allocation4 + $0xd8] sm:$0xff] }
  0xe6   : > { %1116 = vmatpush.msrb.mxu0 %v798_v26  ;;  %1249 = vmatpush.msrb.mxu1 %v4327_v11  ;;  %v3489_v26 = vld [vmem:[%s5388_s2 + $0x420] sm:$0xff] }
  0xe7   : > { %v850_v27 = vpop.f32.mrf.mxu2  ;;  %v879_v28 = vpop.f32.mrf.mxu3  ;;  %1368 = vmatpush.msrb.mxu3 %v3489_v26  ;;  %v1475_v26 = vld [vmem:[#allocation4 + $0xc8] sm:$0xff] }
  0xe8   : > { %968 = vmatmul.f32.gmra.mxu0 %v850_v27  ;;  %3431 = vmatmul.msk.f32.gmra.mxu1 %vm691_vm0, %v879_v28 }
  0xe9   : > { %1026 = vmatmul.f32.gmra.mxu2 %v850_v27  ;;  %3435 = vmatmul.msk.f32.gmra.mxu3 %vm691_vm0, %v879_v28  ;;  %v3460_v27 = vld [vmem:[%s5388_s2 + $0x338] sm:$0xff] }
  0xea   : > { %1117 = vmatpush.msrb.mxu0 %v796_v29  ;;  %1250 = vmatpush.msrb.mxu1 %v4337_v13  ;;  %v3492_v28 = vld [vmem:[%s5388_s2 + $0x438] sm:$0xff]  ;;  %v3457_v29 = vld [vmem:[%s5388_s2 + $0x320] sm:$0xff] }
  0xeb   : > { %v759_v3 = vpop.f32.mrf.mxu1 }
  0xec   : > { %1118 = vmatpush.msrb.mxu0 %v794_v31  ;;  %1251 = vmatpush.msrb.mxu1 %v4347_v15  ;;  %v3484_v15 = vld [vmem:[%s5388_s2 + $0x3f8] sm:$0xff]  ;;  %v3490_v31 = vld [vmem:[%s5388_s2 + $0x428] sm:$0xff] }
  0xef   : > { %v853_v33 = vpop.f32.mrf.mxu2  ;;  %v882_v34 = vpop.f32.mrf.mxu3 }
  0xf0   : > { %971 = vmatmul.f32.gmra.mxu0 %v853_v33  ;;  %3432 = vmatmul.msk.f32.gmra.mxu1 %vm691_vm0, %v882_v34 }
  0xf1   : > { %1029 = vmatmul.f32.gmra.mxu2 %v853_v33  ;;  %3436 = vmatmul.msk.f32.gmra.mxu3 %vm691_vm0, %v882_v34  ;;  %v3455_v33 = vld [vmem:[%s5388_s2 + $0x310] sm:$0xff]  ;;  %v3488_v34 = vld [vmem:[%s5388_s2 + $0x418] sm:$0xff] }
  0xf8   : > { %1090 = vmatmul.f32.vlgmr.msra.gmra.mxu0 %v721_v32  ;;  %3439 = vmatmul.msk.f32.vlgmr.msra.gmra.mxu1 %vm691_vm0, %v756_v35 }
  0xf9   : > { %1148 = vmatmul.f32.vlgmr.msra.gmra.mxu2 %v721_v32  ;;  %3441 = vmatmul.msk.f32.vlgmr.msra.gmra.mxu3 %vm691_vm0, %v4650_v21  ;;  %v3487_v32 = vld [vmem:[%s5388_s2 + $0x410] sm:$0xff] }
  0xfa   : > { %1215 = vmatpush.msra.mxu0 %v4280_v0  ;;  %v727_v0 = vpop.f32.mrf.mxu0  ;;  %1421 = vmatpush.msra.mxu1 %v3500_v50 }
  0xfb   : > { %1369 = vmatpush.msrb.mxu3 %v3487_v32 }
  0xfc   : > { %1216 = vmatpush.msra.mxu0 %v4286_v2  ;;  %1422 = vmatpush.msra.mxu1 %v3498_v58 }
  0xfe   : > { %1217 = vmatpush.msra.mxu0 %v4294_v4  ;;  %v1192_v4 = vld [vmem:[#allocation2 + $0x48] sm:$0xff]  ;;  %1423 = vmatpush.msra.mxu1 %v3496_v16 }
 0x100   : > { %1093 = vmatmul.f32.gmra.mxu0 %v724_v1  ;;  %3440 = vmatmul.msk.f32.gmra.mxu1 %vm691_vm0, %v759_v3 }
 0x101   : > { %1151 = vmatmul.f32.gmra.mxu2 %v724_v1  ;;  %3442 = vmatmul.msk.f32.gmra.mxu3 %vm691_vm0, %v753_v30 }
 0x102   : > { %1218 = vmatpush.msra.mxu0 %v4304_v6  ;;  %v730_v2 = vpop.f32.mrf.mxu0  ;;  %v1193_v6 = vld [vmem:[#allocation2 + $0x50] sm:$0xff]  ;;  %1424 = vmatpush.msra.mxu1 %v3494_v24 }
 0x104   : > { %1219 = vmatpush.msra.mxu0 %v4314_v8  ;;  %1425 = vmatpush.msra.mxu1 %v3492_v28  ;;  %v1474_v28 = vld [vmem:[#allocation4 + $0xc0] sm:$0xff] }
 0x106   : > { %1220 = vmatpush.msra.mxu0 %v4324_v10  ;;  %1426 = vmatpush.msra.mxu1 %v3490_v31 }
 0x108   : > { %1096 = vmatmul.f32.gmra.mxu0 %v727_v0  ;;  %3449 = vmatmul.msk.f32.vlgmr.msrb.gmra.mxu1 %vm691_vm0, %v1191_v5 }
 0x109   : > { %1154 = vmatmul.f32.gmra.mxu2 %v727_v0  ;;  %3443 = vmatmul.msk.f32.gmra.mxu3 %vm691_vm0, %v756_v35  ;;  %v3456_v35 = vld [vmem:[%s5388_s2 + $0x318] sm:$0xff]  ;;  %v3453_v0 = vld [vmem:[%s5388_s2 + $0x300] sm:$0xff] }
 0x10a   : > { %1221 = vmatpush.msra.mxu0 %v4334_v12  ;;  %1427 = vmatpush.msra.mxu1 %v3488_v34  ;;  %v1472_v34 = vld [vmem:[#allocation4 + $0xb0] sm:$0xff] }
 0x10c   : > { %1222 = vmatpush.msra.mxu0 %v4344_v14  ;;  %v3483_v14 = vld [vmem:[%s5388_s2 + $0x3f0] sm:$0xff] }
 0x10d   : > { %1326 = vmatpush.msrb.mxu2 %v3483_v14 }
 0x10f   : > { %1327 = vmatpush.msrb.mxu2 %v3481_v36 }
 0x110   : > { %1099 = vmatmul.f32.gmra.mxu0 %v730_v2  ;;  %3450 = vmatmul.msk.f32.gmra.mxu1 %vm691_vm0, %v1192_v4 }
 0x111   : > { %1157 = vmatmul.f32.gmra.mxu2 %v730_v2  ;;  %3444 = vmatmul.msk.f32.gmra.mxu3 %vm691_vm0, %v759_v3  ;;  %v3454_v2 = vld [vmem:[%s5388_s2 + $0x308] sm:$0xff] }
 0x112   : > { %1328 = vmatpush.msrb.mxu2 %v3479_v38 }
 0x114   : > { %1329 = vmatpush.msrb.mxu2 %v3477_v43 }
 0x116   : > { %1330 = vmatpush.msrb.mxu2 %v3475_v45 }
 0x118   : > { %3437 = vmatmul.msk.f32.vlgmr.msrb.gmra.mxu0 %vm691_vm0, %v4650_v21  ;;  %3451 = vmatmul.msk.f32.gmra.mxu1 %vm691_vm0, %v1193_v6 }
 0x119   : > { %1384 = vmatpush.msrb.mxu0 %v3484_v15  ;;  %1331 = vmatpush.msrb.mxu2 %v3473_v48 }
 0x11b   : > { %1385 = vmatpush.msrb.mxu0 %v3482_v37  ;;  %1332 = vmatpush.msrb.mxu2 %v3471_v51 }
 0x11d   : > { %1386 = vmatpush.msrb.mxu0 %v3480_v39  ;;  %1333 = vmatpush.msrb.mxu2 %v3469_v56 }
 0x11f   : > { %1387 = vmatpush.msrb.mxu0 %v3478_v44  ;;  %1334 = vmatpush.msrb.mxu2 %v3467_v59  ;;  %v1481_v59 = vld [vmem:[#allocation4 + $0xf8] sm:$0xff] }
 0x120   : > { %3438 = vmatmul.msk.f32.gmra.mxu0 %vm691_vm0, %v753_v30  ;;  %3452 = vmatmul.msk.f32.gmra.mxu1 %vm691_vm0, %v1194_v7  ;;  %v3458_v30 = vld [vmem:[%s5388_s2 + $0x328] sm:$0xff] }
 0x121   : > { %1388 = vmatpush.msrb.mxu0 %v3476_v46  ;;  %1335 = vmatpush.msrb.mxu2 %v3465_v62  ;;  %v1465_v62 = vld [vmem:[#allocation4 + $0x78] sm:$0xff] }
 0x123   : > { %1389 = vmatpush.msrb.mxu0 %v3474_v49  ;;  %1336 = vmatpush.msrb.mxu2 %v3463_v17  ;;  %v1464_v17 = vld [vmem:[#allocation4 + $0x70] sm:$0xff] }
 0x125   : > { %1390 = vmatpush.msrb.mxu0 %v3472_v52  ;;  %1337 = vmatpush.msrb.mxu2 %v3461_v22  ;;  %v1463_v22 = vld [vmem:[#allocation4 + $0x68] sm:$0xff] }
 0x127   : > { %1391 = vmatpush.msrb.mxu0 %v3470_v57  ;;  %1338 = vmatpush.msrb.mxu2 %v3459_v25  ;;  %v1462_v25 = vld [vmem:[#allocation4 + $0x60] sm:$0xff] }
 0x128   : > { %3445 = vmatmul.msk.f32.vlgmr.msra.gmra.mxu0 %vm691_vm0, %v1191_v5  ;;  %v3485_v5 = vld [vmem:[%s5388_s2 + $0x400] sm:$0xff] }
 0x129   : > { %1392 = vmatpush.msrb.mxu0 %v3468_v61  ;;  %1339 = vmatpush.msrb.mxu2 %v3457_v29  ;;  %v1479_v61 = vld [vmem:[#allocation4 + $0xe8] sm:$0xff]  ;;  %v1460_v29 = vld [vmem:[#allocation4 + $0x50] sm:$0xff] }
 0x12a   : > { %1370 = vmatpush.msrb.mxu3 %v3485_v5 }
 0x12b   : > { %1393 = vmatpush.msrb.mxu0 %v3466_v63  ;;  %1340 = vmatpush.msrb.mxu2 %v3455_v33  ;;  %v1478_v63 = vld [vmem:[#allocation4 + $0xe0] sm:$0xff]  ;;  %v1459_v33 = vld [vmem:[#allocation4 + $0x48] sm:$0xff] }
 0x12c   : > { %1522 = vmatpush.msra.mxu3 %v1481_v59 }
 0x12d   : > { %1394 = vmatpush.msrb.mxu0 %v3464_v19  ;;  %1341 = vmatpush.msrb.mxu2 %v3453_v0  ;;  %v1471_v0 = vld [vmem:[#allocation4 + $0xa8] sm:$0xff] }
 0x12e   : > { %1523 = vmatpush.msra.mxu3 %v1480_v60 }
 0x12f   : > { %1395 = vmatpush.msrb.mxu0 %v3462_v23  ;;  %1502 = vmatpush.msra.mxu2 %v1465_v62  ;;  %v1476_v23 = vld [vmem:[#allocation4 + $0xd0] sm:$0xff] }
 0x130   : > { %3446 = vmatmul.msk.f32.gmra.mxu0 %vm691_vm0, %v1192_v4  ;;  %v3486_v4 = vld [vmem:[%s5388_s2 + $0x408] sm:$0xff]  ;;  %1524 = vmatpush.msra.mxu3 %v1479_v61 }
 0x131   : > { %1396 = vmatpush.msrb.mxu0 %v3460_v27  ;;  %1428 = vmatpush.msra.mxu1 %v3486_v4  ;;  %v1461_v27 = vld [vmem:[#allocation4 + $0x58] sm:$0xff]  ;;  %v1470_v4 = vld [vmem:[#allocation4 + $0xa0] sm:$0xff] }
 0x132   : > { %1525 = vmatpush.msra.mxu3 %v1478_v63  ;;  %1503 = vmatpush.msra.mxu2 %v1464_v17 }
 0x133   : > { %1397 = vmatpush.msrb.mxu0 %v3458_v30  ;;  %1643 = vmatpush.msrb.mxu1 %v1481_v59  ;;  %v1473_v30 = vld [vmem:[#allocation4 + $0xb8] sm:$0xff]  ;;  %v1454_v59 = vld [vmem:[#allocation4 + $0x20] sm:$0xff] }
 0x134   : > { %1526 = vmatpush.msra.mxu3 %v1477_v18  ;;  %1504 = vmatpush.msra.mxu2 %v1463_v22 }
 0x135   : > { %1398 = vmatpush.msrb.mxu0 %v3456_v35  ;;  %1644 = vmatpush.msrb.mxu1 %v1480_v60  ;;  %v1467_v60 = vld [vmem:[#allocation4 + $0x88] sm:$0xff] }
 0x136   : > { %1527 = vmatpush.msra.mxu3 %v1476_v23  ;;  %1505 = vmatpush.msra.mxu2 %v1462_v25 }
 0x137   : > { %1399 = vmatpush.msrb.mxu0 %v3454_v2  ;;  %1645 = vmatpush.msrb.mxu1 %v1479_v61  ;;  %v1457_v2 = vld [vmem:[#allocation4 + $0x38] sm:$0xff] }
 0x138   : > { %3447 = vmatmul.msk.f32.gmra.mxu0 %vm691_vm0, %v1193_v6  ;;  %1528 = vmatpush.msra.mxu3 %v1475_v26  ;;  %v1453_v61 = vld [vmem:[#allocation4 + $0x18] sm:$0xff] }
 0x139   : > { %1623 = vmatpush.msra.mxu0 %v1465_v62  ;;  %1646 = vmatpush.msrb.mxu1 %v1478_v63  ;;  %v1466_v62 = vld [vmem:[#allocation4 + $0x80] sm:$0xff]  ;;  %v1452_v63 = vld [vmem:[#allocation4 + $0x10] sm:$0xff] }
 0x13a   : > { %1506 = vmatpush.msra.mxu2 %v1461_v27  ;;  %1529 = vmatpush.msra.mxu3 %v1474_v28 }
 0x13b   : > { %1624 = vmatpush.msra.mxu0 %v1464_v17  ;;  %1647 = vmatpush.msrb.mxu1 %v1477_v18  ;;  %v1451_v18 = vld [vmem:[#allocation4 + $0x8] sm:$0xff] }
 0x13c   : > { %1507 = vmatpush.msra.mxu2 %v1460_v29  ;;  %1530 = vmatpush.msra.mxu3 %v1473_v30 }
 0x13d   : > { %1625 = vmatpush.msra.mxu0 %v1463_v22  ;;  %1648 = vmatpush.msrb.mxu1 %v1476_v23 }
 0x13e   : > { %1508 = vmatpush.msra.mxu2 %v1459_v33  ;;  %1531 = vmatpush.msra.mxu3 %v1472_v34 }
 0x13f   : > { %1626 = vmatpush.msra.mxu0 %v1462_v25  ;;  %1649 = vmatpush.msrb.mxu1 %v1475_v26  ;;  %v1450_v25 = vld [vmem:[#allocation4] sm:$0xff] }
 0x140   : > { %3448 = vmatmul.msk.f32.gmra.mxu0 %vm691_vm0, %v1194_v7  ;;  %1532 = vmatpush.msra.mxu3 %v1471_v0 }
 0x141   : > { %1627 = vmatpush.msra.mxu0 %v1461_v27  ;;  %1650 = vmatpush.msrb.mxu1 %v1474_v28 }
 0x142   : > { %1533 = vmatpush.msra.mxu3 %v1470_v4 }
 0x143   : > { %1628 = vmatpush.msra.mxu0 %v1460_v29  ;;  %1651 = vmatpush.msrb.mxu1 %v1473_v30 }
 0x145   : > { %1629 = vmatpush.msra.mxu0 %v1459_v33  ;;  %1652 = vmatpush.msrb.mxu1 %v1472_v34 }
 0x147   : > { %1653 = vmatpush.msrb.mxu1 %v1471_v0 }
 0x149   : > { %1654 = vmatpush.msrb.mxu1 %v1470_v4 }
 0x155   : > { %v4707_v8 = vpop.f32.mrf.mxu0  ;;  %v4709_v9 = vpop.f32.mrf.mxu1 }
 0x15c   : > { %v4891_v44 = vpop.f32.mrf.mxu3  ;;  %v4893_v45 = vpop.f32.mrf.mxu2 }
 0x15d   : > { %v4711_v10 = vpop.f32.mrf.mxu0  ;;  %v4713_v11 = vpop.f32.mrf.mxu1  ;;  %v1051_v26 = vadd.f32 %v4891_v44, %v4893_v45 }
 0x164   : > { %v4895_v46 = vpop.f32.mrf.mxu3  ;;  %v4897_v47 = vpop.f32.mrf.mxu2 }
 0x165   : > { %v4715_v12 = vpop.f32.mrf.mxu0  ;;  %v4717_v13 = vpop.f32.mrf.mxu1  ;;  %v1054_v22 = vadd.f32 %v4895_v46, %v4897_v47 }
 0x16c   : > { %v4899_v48 = vpop.f32.mrf.mxu3  ;;  %v4901_v49 = vpop.f32.mrf.mxu2 }
 0x16d   : > { %v4737_v40 = vpop.f32.mrf.mxu0  ;;  %v4739_v41 = vpop.f32.mrf.mxu1  ;;  %v1057_v27 = vadd.f32 %v4899_v48, %v4901_v49  ;;  %v996_v49 = vadd.f32 %v4713_v11, %v4711_v10 }
 0x174   : > { %v4903_v50 = vpop.f32.mrf.mxu3  ;;  %v4905_v51 = vpop.f32.mrf.mxu2 }
 0x175   : > { %v4774_v53 = vpop.f32.mrf.mxu0  ;;  %v4776_v54 = vpop.f32.mrf.mxu1  ;;  %v1060_v47 = vadd.f32 %v4903_v50, %v4905_v51 }
 0x17c   : > { %v4907_v52 = vpop.f32.mrf.mxu3  ;;  %v4909_v55 = vpop.f32.mrf.mxu2 }
 0x17d   : > { %v4817_v20 = vpop.f32.mrf.mxu0  ;;  %v4819_v21 = vpop.f32.mrf.mxu1  ;;  %v1150_v30 = vadd.f32 %v4909_v55, %v1051_v26  ;;  %v999_v55 = vadd.f32 %v4717_v13, %v4715_v12 }
 0x184   : > { %v4911_v56 = vpop.f32.mrf.mxu3  ;;  %v4913_v57 = vpop.f32.mrf.mxu2 }
 0x185   : > { %v4863_v1 = vpop.f32.mrf.mxu0  ;;  %v1253_v3 = vpop.f32.mrf.mxu1  ;;  %v1153_v28 = vadd.f32 %v4913_v57, %v1054_v22 }
 0x186   : > { %3501 = vmatmul.msk.f32.vlgmr.msrb.gmra.mxu3 %vm691_vm0, %v1253_v3  ;;  %3505 = vmatmul.msk.f32.vlgmr.msra.gmra.mxu1 %vm691_vm0, %v1253_v3  ;;  %v1458_v3 = vld [vmem:[#allocation4 + $0x40] sm:$0xff] }
 0x187   : > { %1509 = vmatpush.msra.mxu2 %v1458_v3  ;;  %1630 = vmatpush.msra.mxu0 %v1458_v3  ;;  %v1182_v44 = vadd.f32 %v4911_v56, %v1153_v28  ;;  %v993_v56 = vadd.f32 %v4709_v9, %v4707_v8 }
 0x189   : > { %1510 = vmatpush.msra.mxu2 %v1457_v2  ;;  %1631 = vmatpush.msra.mxu0 %v1457_v2 }
 0x18c   : > { %v4915_v58 = vpop.f32.mrf.mxu3  ;;  %v4917_v16 = vpop.f32.mrf.mxu2 }
 0x18d   : > { %v4879_v6 = vpop.f32.mrf.mxu0  ;;  %v1256_v7 = vpop.f32.mrf.mxu1  ;;  %v1156_v33 = vadd.f32 %v4917_v16, %v1057_v27  ;;  %v1179_v16 = vadd.f32 %v4907_v52, %v1150_v30  ;;  %v1002_v52 = vadd.f32 %v4739_v41, %v4737_v40  ;;  %v1483_v27 = vld [vmem:[#allocation6 + $0x8] sm:$0xff] }
 0x18e   : > { %3502 = vmatmul.msk.f32.gmra.mxu3 %vm691_vm0, %v1256_v7  ;;  %3506 = vmatmul.msk.f32.gmra.mxu1 %vm691_vm0, %v1256_v7  ;;  %v1456_v7 = vld [vmem:[#allocation4 + $0x30] sm:$0xff] }
 0x18f   : > { %1511 = vmatpush.msra.mxu2 %v1456_v7  ;;  %1632 = vmatpush.msra.mxu0 %v1456_v7  ;;  %v1185_v50 = vadd.f32 %v4915_v58, %v1156_v33  ;;  %v1092_v58 = vadd.f32 %v4774_v53, %v993_v56  ;;  %v1101_v4 = vadd.f32 %v4879_v6, %v1002_v52 }
 0x194   : > { %v4919_v19 = vpop.f32.mrf.mxu3  ;;  %v4923_v31 = vpop.f32.mrf.mxu2 }
 0x195   : > { %v4883_v14 = vpop.f32.mrf.mxu0  ;;  %v1259_v15 = vpop.f32.mrf.mxu1  ;;  %v1159_v57 = vadd.f32 %v4923_v31, %v1060_v47 }
 0x196   : > { %3503 = vmatmul.msk.f32.gmra.mxu3 %vm691_vm0, %v1259_v15  ;;  %3507 = vmatmul.msk.f32.gmra.mxu1 %vm691_vm0, %v1259_v15  ;;  %v1469_v15 = vld [vmem:[#allocation4 + $0x98] sm:$0xff]  ;;  %v1121_v40 = vadd.f32 %v4883_v14, %v1092_v58 }
 0x197   : > { %1534 = vmatpush.msra.mxu3 %v1469_v15  ;;  %1655 = vmatpush.msrb.mxu1 %v1469_v15  ;;  %v1188_v31 = vadd.f32 %v4919_v19, %v1159_v57 }
 0x19d   : > { %v4887_v36 = vpop.f32.mrf.mxu0  ;;  %v1262_v37 = vpop.f32.mrf.mxu1 }
 0x19e   : > { %3504 = vmatmul.msk.f32.gmra.mxu3 %vm691_vm0, %v1262_v37  ;;  %3508 = vmatmul.msk.f32.gmra.mxu1 %vm691_vm0, %v1262_v37 }
 0x1a5   : > { %v1224_v38 = vpop.f32.mrf.mxu0 }
 0x1a6   : > { %1342 = vmatmul.f32.vlgmr.msrb.gmra.mxu2 %v1224_v38  ;;  %1400 = vmatmul.f32.vlgmr.msrb.gmra.mxu0 %v1224_v38  ;;  %v1455_v38 = vld [vmem:[#allocation4 + $0x28] sm:$0xff] }
 0x1a7   : > { %1512 = vmatpush.msra.mxu2 %v1455_v38  ;;  %1633 = vmatpush.msra.mxu0 %v1455_v38 }
 0x1a9   : > { %1513 = vmatpush.msra.mxu2 %v1454_v59  ;;  %1634 = vmatpush.msra.mxu0 %v1454_v59 }
 0x1ab   : > { %1514 = vmatpush.msra.mxu2 %v1453_v61  ;;  %1635 = vmatpush.msra.mxu0 %v1453_v61 }
 0x1ad   : > { %v1227_v39 = vpop.f32.mrf.mxu0  ;;  %1515 = vmatpush.msra.mxu2 %v1452_v63  ;;  %1636 = vmatpush.msra.mxu0 %v1452_v63 }
 0x1ae   : > { %1345 = vmatmul.f32.gmra.mxu2 %v1227_v39  ;;  %1403 = vmatmul.f32.gmra.mxu0 %v1227_v39  ;;  %v1468_v39 = vld [vmem:[#allocation4 + $0x90] sm:$0xff] }
 0x1af   : > { %1535 = vmatpush.msra.mxu3 %v1468_v39  ;;  %1656 = vmatpush.msrb.mxu1 %v1468_v39 }
 0x1b0   : > { %1516 = vmatpush.msra.mxu2 %v1451_v18  ;;  %1637 = vmatpush.msra.mxu0 %v1451_v18 }
 0x1b1   : > { %1536 = vmatpush.msra.mxu3 %v1467_v60  ;;  %1657 = vmatpush.msrb.mxu1 %v1467_v60 }
 0x1b2   : > { %1517 = vmatpush.msra.mxu2 %v1450_v25  ;;  %1638 = vmatpush.msra.mxu0 %v1450_v25 }
 0x1b3   : > { %1537 = vmatpush.msra.mxu3 %v1466_v62  ;;  %1658 = vmatpush.msrb.mxu1 %v1466_v62 }
 0x1b5   : > { %v1230_v42 = vpop.f32.mrf.mxu0  ;;  %1582 = vmatpush.msrb.mxu3 %v1483_v27 }
 0x1b6   : > { %1348 = vmatmul.f32.gmra.mxu2 %v1230_v42  ;;  %1406 = vmatmul.f32.gmra.mxu0 %v1230_v42 }
 0x1bd   : > { %v1233_v43 = vpop.f32.mrf.mxu0 }
 0x1be   : > { %1351 = vmatmul.f32.gmra.mxu2 %v1233_v43  ;;  %1409 = vmatmul.f32.gmra.mxu0 %v1233_v43 }
 0x203   : > { %v4921_v24 = vpop.f32.mrf.mxu1 }
 0x209   : > { %v4925_v32 = vpop.f32.mrf.mxu3 }
 0x20b   : > { %v1433_v5 = vpop.f32.mrf.mxu1 }
 0x211   : > { %v1375_v43 = vpop.f32.mrf.mxu3 }
 0x213   : > { %v1436_v17 = vpop.f32.mrf.mxu1 }
 0x219   : > { %v1378_v34 = vpop.f32.mrf.mxu3 }
 0x21b   : > { %v1439_v10 = vpop.f32.mrf.mxu1 }
 0x223   : > { %v4927_v35 = vpop.f32.mrf.mxu0 }
 0x224   : > { %v1431_v45 = vadd.f32 %v4921_v24, %v4927_v35  ;;  %v1095_v24 = vadd.f32 %v4817_v20, %v996_v49  ;;  %v1098_v35 = vadd.f32 %v4863_v1, %v999_v55 }
 0x226   : > { %v4958_v11 = vadd.f32 %v1431_v45, %v1179_v16  ;;  %v1124_v8 = vadd.f32 %v4887_v36, %v1095_v24  ;;  %v1127_v2 = vadd.f32 %v4776_v54, %v1098_v35  ;;  %v1381_v36 = vpop.f32.mrf.mxu3 }
 0x229   : > { %v4929_v37 = vpop.f32.mrf.mxu2 }
 0x22a   : > { %v1373_v20 = vadd.f32 %v4925_v32, %v4929_v37  ;;  %v1130_v37 = vadd.f32 %v4819_v21, %v1101_v4  ;;  %v1482_v21 = vld [vmem:[#allocation6] sm:$0xff] }
 0x22b   : > { %v1404_v42 = vpop.f32.mrf.mxu0  ;;  %1562 = vmatpush.msrb.mxu2 %v1482_v21 }
 0x22c   : > { %v1434_v46 = vadd.f32 %v1433_v5, %v1404_v42  ;;  %v1442_v7 = vadd.f32 %v1373_v20, %v1121_v40 }
 0x22e   : > { %v4952_v51 = vadd.f32 %v1434_v46, %v1182_v44 }
 0x230   : > { %v1493_v1 = vadd.f32 %v4952_v51, %v4958_v11 }
 0x231   : > { %v1346_v23 = vpop.f32.mrf.mxu2 }
 0x232   : > { %v1376_v12 = vadd.f32 %v1375_v43, %v1346_v23 }
 0x233   : > { %v1407_v29 = vpop.f32.mrf.mxu0 }
 0x234   : > { %v1437_v48 = vadd.f32 %v1436_v17, %v1407_v29  ;;  %v1444_v41 = vadd.f32 %v1376_v12, %v1124_v8 }
 0x236   : > { %v4960_v13 = vadd.f32 %v1437_v48, %v1185_v50  ;;  %v1484_v39 = vadd.f32 %v1444_v41, %v1442_v7 }
 0x238   : > { %v1494_v53 = vadd.f32 %v1493_v1, %v4960_v13 }
 0x239   : > { %v1349_v3 = vpop.f32.mrf.mxu2 }
 0x23a   : > { %v1379_v0 = vadd.f32 %v1378_v34, %v1349_v3 }
 0x23b   : > { %v1410_v9 = vpop.f32.mrf.mxu0 }
 0x23c   : > { %v1440_v5 = vadd.f32 %v1439_v10, %v1410_v9  ;;  %v1446_v15 = vadd.f32 %v1379_v0, %v1127_v2 }
 0x23e   : > { %v1449_v19 = vadd.f32 %v1440_v5, %v1188_v31  ;;  %v1485_v59 = vadd.f32 %v1484_v39, %v1446_v15 }
 0x240   : > { %v1495_v38 = vadd.f32 %v1494_v53, %v1449_v19 }
 0x241   : > { %v1352_v32 = vpop.f32.mrf.mxu2 }
 0x242   : > { %v1496_v42 = vrot.slane %v1495_v38, 4  ;;  %v1382_v43 = vadd.f32 %v1381_v36, %v1352_v32 }
 0x244   : > { %v1497_v54 = vadd.f32 %v1496_v42, %v1495_v38  ;;  %v1448_v60 = vadd.f32 %v1382_v43, %v1130_v37 }
 0x246   : > { %v1498_v6 = vrot.slane %v1497_v54, 2  ;;  %v1486_v61 = vadd.f32 %v1485_v59, %v1448_v60 }
 0x248   : > { %v1499_v14 = vadd.f32 %v1498_v6, %v1497_v54  ;;  %v1487_v62 = vrot.slane %v1486_v61, 4 }
 0x24a   : > { %v1488_v63 = vadd.f32 %v1487_v62, %v1486_v61  ;;  %v1500_v17 = vrot.slane %v1499_v14, 1 }
 0x24c   : > { %v1489_v18 = vrot.slane %v1488_v63, 2  ;;  %v1501_v22 = vadd.f32 %v1500_v17, %v1499_v14 }
 0x24e   : > { %v1490_v23 = vadd.f32 %v1489_v18, %v1488_v63  ;;  %1538 = vmatmul.f32.vlgmr.msra.gmra.mxu3 %v1501_v22 }
 0x24f   : > { %1713 = vmatpush.msra.mxu3 %v1483_v27 }
 0x250   : > { %v1491_v25 = vrot.slane %v1490_v23, 1 }
 0x252   : > { %v1492_v26 = vadd.f32 %v1491_v25, %v1490_v23 }
 0x254   : > { %1518 = vmatmul.f32.vlgmr.msra.gmra.mxu2 %v1492_v26 }
 0x255   : > { %1693 = vmatpush.msra.mxu2 %v1482_v21 }
 0x2d1   : > { %v1539_v28 = vpop.f32.mrf.mxu3 }
 0x2d7   : > { %v1519_v29 = vpop.f32.mrf.mxu2 }
 0x2d8   : > { %v1540_v30 = vadd.f32 %v1539_v28, %v1519_v29 }
 0x2da   : > { %v1542_v33 = vmul.f32 0.0009765625, %v1540_v30 }
 0x2dc   : > { %3509 = vmatmul.msk.f32.vlgmr.msrb.gmra.mxu2 %vm1543_vm1, %v1542_v33  ;;  %3510 = vmatmul.msk.f32.vlgmr.msrb.gmra.mxu3 %vm1543_vm1, %v1542_v33 }
 0x35f   : > { %v1564_v46 = vpop.f32.mrf.mxu2  ;;  %v1584_v47 = vpop.f32.mrf.mxu3 }
 0x360   : > { %v1587_v34 = vperm.slane %v1564_v46, 0  ;;  %v1588_v44 = vperm.slane %v1584_v47, 0 }
 0x362   : > { %v4978_v45 = vsub.f32 %v1442_v7, %v1587_v34  ;;  %v4980_v48 = vsub.f32 %v1444_v41, %v1587_v34  ;;  %v1593_v49 = vsub.f32 %v1446_v15, %v1587_v34  ;;  %v4983_v55 = vsub.f32 %v4958_v11, %v1588_v44 }
 0x363   : > { %v1592_v57 = vsub.f32 %v4952_v51, %v1588_v44  ;;  %v1594_v16 = vsub.f32 %v4960_v13, %v1588_v44  ;;  %v1595_v50 = vsub.f32 %v1448_v60, %v1587_v34  ;;  %v1596_v35 = vsub.f32 %v1449_v19, %v1588_v44 }
 0x364   : > { %v1597_v56 = vmul.f32 %v4978_v45, %v4978_v45  ;;  %v1599_v24 = vmul.f32 %v4980_v48, %v4980_v48  ;;  %v1598_v3 = vmul.f32 %v4983_v55, %v4983_v55  ;;  %v1601_v12 = vmul.f32 %v1593_v49, %v1593_v49 }
 0x365   : > { %v1600_v10 = vmul.f32 %v1592_v57, %v1592_v57  ;;  %v1602_v11 = vmul.f32 %v1594_v16, %v1594_v16  ;;  %v1603_v31 = vmul.f32 %v1595_v50, %v1595_v50  ;;  %v1604_v8 = vmul.f32 %v1596_v35, %v1596_v35 }
 0x366   : > { %v1605_v52 = vadd.f32 %v1599_v24, %v1597_v56  ;;  %v1974_v56 = vld [vmem:[#allocation9 + $0x3f8] sm:$0xff]  ;;  %v1939_v24 = vld [vmem:[#allocation9 + $0x2e0] sm:$0xff] }
 0x367   : > { %v1614_v58 = vadd.f32 %v1600_v10, %v1598_v3  ;;  %v1940_v3 = vld [vmem:[#allocation9 + $0x2e8] sm:$0xff] }
 0x368   : > { %v1606_v51 = vadd.f32 %v1605_v52, %v1601_v12  ;;  %v1972_v10 = vld [vmem:[#allocation9 + $0x3e8] sm:$0xff]  ;;  %v1937_v12 = vld [vmem:[#allocation9 + $0x2d0] sm:$0xff] }
 0x369   : > { %v1615_v13 = vadd.f32 %v1614_v58, %v1602_v11  ;;  %v1969_v52 = vld [vmem:[#allocation9 + $0x3d0] sm:$0xff]  ;;  %v1938_v11 = vld [vmem:[#allocation9 + $0x2d8] sm:$0xff] }
 0x36a   : > { %v1607_v9 = vadd.f32 %v1606_v51, %v1603_v31  ;;  %v1970_v58 = vld [vmem:[#allocation9 + $0x3d8] sm:$0xff]  ;;  %v1857_v31 = vld [vmem:[#allocation7 + $0x18] sm:$0xff] }
 0x36b   : > { %v1616_v20 = vadd.f32 %v1615_v13, %v1604_v8  ;;  %v1737_v51 = vld [vmem:[#allocation7 + $0x8] sm:$0xff]  ;;  %v1935_v8 = vld [vmem:[#allocation9 + $0x2c0] sm:$0xff] }
 0x36c   : > { %v1608_v1 = vrot.slane %v1607_v9, 4  ;;  %v1967_v13 = vld [vmem:[#allocation9 + $0x3c0] sm:$0xff] }
 0x36d   : > { %v1617_v0 = vrot.slane %v1616_v20, 4 }
 0x36e   : > { %v1609_v5 = vadd.f32 %v1608_v1, %v1607_v9  ;;  %v1936_v9 = vld [vmem:[#allocation9 + $0x2c8] sm:$0xff]  ;;  %v1933_v1 = vld [vmem:[#allocation9 + $0x2b0] sm:$0xff] }
 0x36f   : > { %v1618_v2 = vadd.f32 %v1617_v0, %v1616_v20  ;;  %v1968_v20 = vld [vmem:[#allocation9 + $0x3c8] sm:$0xff]  ;;  %v1965_v0 = vld [vmem:[#allocation9 + $0x3b0] sm:$0xff] }
 0x370   : > { %v1610_v4 = vrot.slane %v1609_v5, 2 }
 0x371   : > { %v1619_v40 = vrot.slane %v1618_v2, 2 }
 0x372   : > { %v1611_v41 = vadd.f32 %v1610_v4, %v1609_v5  ;;  %v1934_v5 = vld [vmem:[#allocation9 + $0x2b8] sm:$0xff]  ;;  %v1931_v4 = vld [vmem:[#allocation9 + $0x2a0] sm:$0xff] }
 0x373   : > { %v1620_v53 = vadd.f32 %v1619_v40, %v1618_v2  ;;  %v1966_v2 = vld [vmem:[#allocation9 + $0x3b8] sm:$0xff]  ;;  %v1963_v40 = vld [vmem:[#allocation9 + $0x3a0] sm:$0xff] }
 0x374   : > { %v1612_v19 = vrot.slane %v1611_v41, 1 }
 0x375   : > { %v1621_v36 = vrot.slane %v1620_v53, 1 }
 0x376   : > { %v1613_v7 = vadd.f32 %v1612_v19, %v1611_v41  ;;  %v1932_v41 = vld [vmem:[#allocation9 + $0x2a8] sm:$0xff]  ;;  %v1929_v19 = vld [vmem:[#allocation9 + $0x290] sm:$0xff] }
 0x377   : > { %v1622_v15 = vadd.f32 %v1621_v36, %v1620_v53  ;;  %v1964_v53 = vld [vmem:[#allocation9 + $0x3a8] sm:$0xff]  ;;  %v1961_v36 = vld [vmem:[#allocation9 + $0x390] sm:$0xff] }
 0x378   : > { %1639 = vmatmul.f32.vlgmr.msra.gmra.mxu0 %v1613_v7  ;;  %v1930_v7 = vld [vmem:[#allocation9 + $0x298] sm:$0xff] }
 0x379   : > { %1659 = vmatmul.f32.vlgmr.msrb.gmra.mxu1 %v1622_v15  ;;  %v1962_v15 = vld [vmem:[#allocation9 + $0x398] sm:$0xff] }
 0x3f5   : > { %v1640_v38 = vpop.f32.mrf.mxu0 }
 0x3f6   : > { %v1660_v32 = vpop.f32.mrf.mxu1 }
 0x3f7   : > { %v1661_v37 = vadd.f32 %v1660_v32, %v1640_v38  ;;  %v1927_v38 = vld [vmem:[#allocation9 + $0x280] sm:$0xff] }
 0x3f8   : > { %v1959_v32 = vld [vmem:[#allocation9 + $0x380] sm:$0xff] }
 0x3f9   : > { %v1663_v39 = vmul.f32 0.0009765625, %v1661_v37  ;;  %v1928_v37 = vld [vmem:[#allocation9 + $0x288] sm:$0xff] }
 0x3fb   : > { %v1664_v42 = vadd.f32 1e-05, %v1663_v39  ;;  %v1960_v39 = vld [vmem:[#allocation9 + $0x388] sm:$0xff] }
 0x3fd   : > { %3672 = vrsqrt.f32 %v1664_v42  ;;  %vm1671_vm3 = vweird.f32 %v1664_v42 }
 0x403   : > { %v3673_v43 = vpop.eup %3672 }
 0x404   : > { %v1666_v59 = vmul.f32 %v3673_v43, %v1664_v42  ;;  %vm1672_vm2 = vweird.f32 %v3673_v43  ;;  %v1925_v42 = vld [vmem:[#allocation9 + $0x270] sm:$0xff] }
 0x405   : > { %vm1673_vm4 = vmor %vm1671_vm3, %vm1672_vm2 }
 0x406   : > { %v1667_v54 = vmul.f32 %v3673_v43, %v1666_v59  ;;  %v1926_v59 = vld [vmem:[#allocation9 + $0x278] sm:$0xff] }
 0x408   : > { %v1668_v60 = vmul.f32 0.5, %v1667_v54  ;;  %v1958_v54 = vld [vmem:[#allocation9 + $0x378] sm:$0xff] }
 0x40a   : > { %v1669_v6 = vsub.f32 1.5, %v1668_v60  ;;  %v1923_v60 = vld [vmem:[#allocation9 + $0x260] sm:$0xff] }
 0x40c   : > { %v1670_v61 = vmul.f32 %v3673_v43, %v1669_v6  ;;  %v1955_v6 = vld [vmem:[#allocation9 + $0x360] sm:$0xff] }
 0x40e   : > { %v1674_v14 = vsel %vm1673_vm4, %v3673_v43, %v1670_v61  ;;  %v1957_v43 = vld [vmem:[#allocation9 + $0x370] sm:$0xff]  ;;  %v1924_v61 = vld [vmem:[#allocation9 + $0x268] sm:$0xff] }
 0x40f   : > { %3511 = vmatmul.msk.f32.vlgmr.msra.gmra.mxu2 %vm1543_vm1, %v1674_v14  ;;  %3512 = vmatmul.msk.f32.vlgmr.msra.gmra.mxu3 %vm1543_vm1, %v1674_v14  ;;  %v1956_v14 = vld [vmem:[#allocation9 + $0x368] sm:$0xff] }
 0x492   : > { %v1695_v62 = vpop.f32.mrf.mxu2  ;;  %v1715_v63 = vpop.f32.mrf.mxu3 }
 0x493   : > { %v1718_v17 = vperm.slane %v1695_v62, 0  ;;  %v1719_v18 = vperm.slane %v1715_v63, 0  ;;  %v1921_v62 = vld [vmem:[#allocation9 + $0x250] sm:$0xff] }
 0x494   : > { %v1953_v63 = vld [vmem:[#allocation9 + $0x350] sm:$0xff] }
 0x495   : > { %v1726_v22 = vmul.f32 %v1718_v17, %v1595_v50  ;;  %v1727_v23 = vmul.f32 %v1719_v18, %v1596_v35  ;;  %v1724_v25 = vmul.f32 %v1718_v17, %v1593_v49  ;;  %v1725_v26 = vmul.f32 %v1719_v18, %v1594_v16  ;;  %v1856_v49 = vld [vmem:[#allocation7 + $0x10] sm:$0xff]  ;;  %v1973_v16 = vld [vmem:[#allocation9 + $0x3f0] sm:$0xff]  ;;  %v1942_v50 = vld [vmem:[#allocation9 + $0x2f8] sm:$0xff] }
 0x496   : > { %v1722_v28 = vmul.f32 %v1718_v17, %v4980_v48  ;;  %v1723_v29 = vmul.f32 %v1719_v18, %v1592_v57  ;;  %v1720_v46 = vmul.f32 %v1718_v17, %v4978_v45  ;;  %v1721_v47 = vmul.f32 %v1719_v18, %v4983_v55  ;;  %v1736_v55 = vld [vmem:[#allocation7] sm:$0xff]  ;;  %v1971_v35 = vld [vmem:[#allocation9 + $0x3e0] sm:$0xff]  ;;  %v1922_v17 = vld [vmem:[#allocation9 + $0x258] sm:$0xff] }
 0x497   : > { %v4995_v21 = vmax.f32 %v1726_v22, 0.0  ;;  %v4997_v27 = vmax.f32 %v1727_v23, 0.0  ;;  %v5002_v30 = vmax.f32 %v1724_v25, 0.0  ;;  %v5004_v33 = vmax.f32 %v1725_v26, 0.0  ;;  %v1941_v57 = vld [vmem:[#allocation9 + $0x2f0] sm:$0xff]  ;;  %v1954_v18 = vld [vmem:[#allocation9 + $0x358] sm:$0xff] }
 0x498   : > { %v5012_v34 = vmax.f32 %v1722_v28, 0.0  ;;  %v5014_v44 = vmax.f32 %v1723_v29, 0.0  ;;  %v5020_v45 = vmax.f32 %v1720_v46, 0.0  ;;  %v5022_v48 = vmax.f32 %v1721_v47, 0.0  ;;  %v1919_v22 = vld [vmem:[#allocation9 + $0x240] sm:$0xff]  ;;  %v1920_v25 = vld [vmem:[#allocation9 + $0x248] sm:$0xff] }
 0x499   : > { %1757 = vmatpush.msrb.mxu2 %v4995_v21  ;;  %1780 = vmatpush.msrb.mxu3 %v4997_v27  ;;  %v1951_v23 = vld [vmem:[#allocation9 + $0x340] sm:$0xff]  ;;  %v1952_v26 = vld [vmem:[#allocation9 + $0x348] sm:$0xff]  ;;  %v1917_v28 = vld [vmem:[#allocation9 + $0x230] sm:$0xff] }
 0x49a   : > { %1876 = vmatpush.msrb.mxu0 %v4995_v21  ;;  %1899 = vmatpush.msra.mxu1 %v4997_v27  ;;  %v1949_v29 = vld [vmem:[#allocation9 + $0x330] sm:$0xff]  ;;  %v1918_v46 = vld [vmem:[#allocation9 + $0x238] sm:$0xff] }
 0x49b   : > { %1758 = vmatpush.msrb.mxu2 %v5002_v30  ;;  %1781 = vmatpush.msrb.mxu3 %v5004_v33  ;;  %v1950_v47 = vld [vmem:[#allocation9 + $0x338] sm:$0xff] }
 0x49c   : > { %1877 = vmatpush.msrb.mxu0 %v5002_v30  ;;  %1900 = vmatpush.msra.mxu1 %v5004_v33 }
 0x49d   : > { %1759 = vmatpush.msrb.mxu2 %v5012_v34  ;;  %1782 = vmatpush.msrb.mxu3 %v5014_v44 }
 0x49e   : > { %1878 = vmatpush.msrb.mxu0 %v5012_v34  ;;  %1901 = vmatpush.msra.mxu1 %v5014_v44 }
 0x49f   : > { %1760 = vmatpush.msrb.mxu2 %v5020_v45  ;;  %1783 = vmatpush.msrb.mxu3 %v5022_v48 }
 0x4a0   : > { %1879 = vmatpush.msrb.mxu0 %v5020_v45  ;;  %1902 = vmatpush.msra.mxu1 %v5022_v48 }
 0x4a1   : > { %3517 = vmatmul.msk.f32.vlgmr.msrb.gmra.mxu0 %vm1738_vm5, %v1856_v49  ;;  %3519 = vmatmul.msk.f32.vlgmr.msra.gmra.mxu1 %vm1738_vm5, %v1856_v49  ;;  %v1915_v49 = vld [vmem:[#allocation9 + $0x220] sm:$0xff] }
 0x4a2   : > { %3513 = vmatmul.msk.f32.vlgmr.msrb.gmra.mxu2 %vm1738_vm5, %v1736_v55  ;;  %3515 = vmatmul.msk.f32.vlgmr.msrb.gmra.mxu3 %vm1738_vm5, %v1736_v55  ;;  %v1947_v55 = vld [vmem:[#allocation9 + $0x320] sm:$0xff] }
 0x4a3   : > { %1975 = vmatpush.msra.mxu2 %v1941_v57  ;;  %1998 = vmatpush.msra.mxu3 %v1973_v16  ;;  %v1916_v57 = vld [vmem:[#allocation9 + $0x228] sm:$0xff] }
 0x4a4   : > { %2021 = vmatpush.msra.mxu0 %v1942_v50  ;;  %2044 = vmatpush.msrb.mxu1 %v1974_v56  ;;  %v1948_v16 = vld [vmem:[#allocation9 + $0x328] sm:$0xff]  ;;  %v1913_v50 = vld [vmem:[#allocation9 + $0x210] sm:$0xff] }
 0x4a5   : > { %1976 = vmatpush.msra.mxu2 %v1939_v24  ;;  %1999 = vmatpush.msra.mxu3 %v1971_v35  ;;  %v1945_v56 = vld [vmem:[#allocation9 + $0x310] sm:$0xff]  ;;  %v1914_v24 = vld [vmem:[#allocation9 + $0x218] sm:$0xff] }
 0x4a6   : > { %2022 = vmatpush.msra.mxu0 %v1940_v3  ;;  %2045 = vmatpush.msrb.mxu1 %v1972_v10  ;;  %v1946_v35 = vld [vmem:[#allocation9 + $0x318] sm:$0xff]  ;;  %v1911_v3 = vld [vmem:[#allocation9 + $0x200] sm:$0xff] }
 0x4a7   : > { %1977 = vmatpush.msra.mxu2 %v1937_v12  ;;  %2000 = vmatpush.msra.mxu3 %v1969_v52  ;;  %v1943_v10 = vld [vmem:[#allocation9 + $0x300] sm:$0xff]  ;;  %v1821_v12 = vld [vmem:[#allocation9 + $0xf0] sm:$0xff] }
 0x4a8   : > { %2023 = vmatpush.msra.mxu0 %v1938_v11  ;;  %2046 = vmatpush.msrb.mxu1 %v1970_v58  ;;  %v1853_v52 = vld [vmem:[#allocation9 + $0x1f0] sm:$0xff]  ;;  %v1912_v11 = vld [vmem:[#allocation9 + $0x208] sm:$0xff] }
 0x4a9   : > { %3518 = vmatmul.msk.f32.gmra.mxu0 %vm1738_vm5, %v1857_v31  ;;  %3520 = vmatmul.msk.f32.gmra.mxu1 %vm1738_vm5, %v1857_v31  ;;  %v1944_v58 = vld [vmem:[#allocation9 + $0x308] sm:$0xff]  ;;  %v1819_v31 = vld [vmem:[#allocation9 + $0xe0] sm:$0xff] }
 0x4aa   : > { %3514 = vmatmul.msk.f32.gmra.mxu2 %vm1738_vm5, %v1737_v51  ;;  %3516 = vmatmul.msk.f32.gmra.mxu3 %vm1738_vm5, %v1737_v51  ;;  %v1851_v51 = vld [vmem:[#allocation9 + $0x1e0] sm:$0xff] }
 0x4ab   : > { %1978 = vmatpush.msra.mxu2 %v1935_v8  ;;  %2001 = vmatpush.msra.mxu3 %v1967_v13  ;;  %v1822_v8 = vld [vmem:[#allocation9 + $0xf8] sm:$0xff] }
 0x4ac   : > { %2024 = vmatpush.msra.mxu0 %v1936_v9  ;;  %2047 = vmatpush.msrb.mxu1 %v1968_v20  ;;  %v1854_v13 = vld [vmem:[#allocation9 + $0x1f8] sm:$0xff]  ;;  %v1817_v9 = vld [vmem:[#allocation9 + $0xd0] sm:$0xff] }
 0x4ad   : > { %1979 = vmatpush.msra.mxu2 %v1933_v1  ;;  %2002 = vmatpush.msra.mxu3 %v1965_v0  ;;  %v1849_v20 = vld [vmem:[#allocation9 + $0x1d0] sm:$0xff]  ;;  %v1820_v1 = vld [vmem:[#allocation9 + $0xe8] sm:$0xff] }
 0x4ae   : > { %2025 = vmatpush.msra.mxu0 %v1934_v5  ;;  %2048 = vmatpush.msrb.mxu1 %v1966_v2  ;;  %v1852_v0 = vld [vmem:[#allocation9 + $0x1e8] sm:$0xff]  ;;  %v1815_v5 = vld [vmem:[#allocation9 + $0xc0] sm:$0xff] }
 0x4af   : > { %1980 = vmatpush.msra.mxu2 %v1931_v4  ;;  %2003 = vmatpush.msra.mxu3 %v1963_v40  ;;  %v1847_v2 = vld [vmem:[#allocation9 + $0x1c0] sm:$0xff]  ;;  %v1818_v4 = vld [vmem:[#allocation9 + $0xd8] sm:$0xff] }
 0x4b0   : > { %2026 = vmatpush.msra.mxu0 %v1932_v41  ;;  %2049 = vmatpush.msrb.mxu1 %v1964_v53  ;;  %v1850_v40 = vld [vmem:[#allocation9 + $0x1d8] sm:$0xff]  ;;  %v1813_v41 = vld [vmem:[#allocation9 + $0xb0] sm:$0xff] }
 0x4b1   : > { %1981 = vmatpush.msra.mxu2 %v1929_v19  ;;  %2004 = vmatpush.msra.mxu3 %v1961_v36  ;;  %v1845_v53 = vld [vmem:[#allocation9 + $0x1b0] sm:$0xff]  ;;  %v1816_v19 = vld [vmem:[#allocation9 + $0xc8] sm:$0xff] }
 0x4b2   : > { %2027 = vmatpush.msra.mxu0 %v1930_v7  ;;  %2050 = vmatpush.msrb.mxu1 %v1962_v15  ;;  %v1848_v36 = vld [vmem:[#allocation9 + $0x1c8] sm:$0xff]  ;;  %v1811_v7 = vld [vmem:[#allocation9 + $0xa0] sm:$0xff] }
 0x4b3   : > { %1982 = vmatpush.msra.mxu2 %v1927_v38  ;;  %2005 = vmatpush.msra.mxu3 %v1959_v32  ;;  %v1843_v15 = vld [vmem:[#allocation9 + $0x1a0] sm:$0xff]  ;;  %v1814_v38 = vld [vmem:[#allocation9 + $0xb8] sm:$0xff] }
 0x4b4   : > { %2028 = vmatpush.msra.mxu0 %v1928_v37  ;;  %2051 = vmatpush.msrb.mxu1 %v1960_v39  ;;  %v1846_v32 = vld [vmem:[#allocation9 + $0x1b8] sm:$0xff]  ;;  %v1809_v37 = vld [vmem:[#allocation9 + $0x90] sm:$0xff] }
 0x4b5   : > { %1983 = vmatpush.msra.mxu2 %v1925_v42  ;;  %2006 = vmatpush.msra.mxu3 %v1957_v43  ;;  %v1841_v39 = vld [vmem:[#allocation9 + $0x190] sm:$0xff]  ;;  %v1812_v42 = vld [vmem:[#allocation9 + $0xa8] sm:$0xff] }
 0x4b6   : > { %2029 = vmatpush.msra.mxu0 %v1926_v59  ;;  %2052 = vmatpush.msrb.mxu1 %v1958_v54  ;;  %v1844_v43 = vld [vmem:[#allocation9 + $0x1a8] sm:$0xff]  ;;  %v1807_v59 = vld [vmem:[#allocation9 + $0x80] sm:$0xff] }
 0x4b7   : > { %1984 = vmatpush.msra.mxu2 %v1923_v60  ;;  %2007 = vmatpush.msra.mxu3 %v1955_v6  ;;  %v1839_v54 = vld [vmem:[#allocation9 + $0x180] sm:$0xff]  ;;  %v1810_v60 = vld [vmem:[#allocation9 + $0x98] sm:$0xff] }
 0x4b8   : > { %2030 = vmatpush.msra.mxu0 %v1924_v61  ;;  %2053 = vmatpush.msrb.mxu1 %v1956_v14  ;;  %v1842_v6 = vld [vmem:[#allocation9 + $0x198] sm:$0xff]  ;;  %v1805_v61 = vld [vmem:[#allocation9 + $0x70] sm:$0xff] }
 0x4b9   : > { %1985 = vmatpush.msra.mxu2 %v1921_v62  ;;  %2008 = vmatpush.msra.mxu3 %v1953_v63  ;;  %v1837_v14 = vld [vmem:[#allocation9 + $0x170] sm:$0xff]  ;;  %v1803_v62 = vld [vmem:[#allocation9 + $0x60] sm:$0xff] }
 0x4ba   : > { %2031 = vmatpush.msra.mxu0 %v1922_v17  ;;  %2054 = vmatpush.msrb.mxu1 %v1954_v18  ;;  %v1835_v63 = vld [vmem:[#allocation9 + $0x160] sm:$0xff]  ;;  %v1801_v17 = vld [vmem:[#allocation9 + $0x50] sm:$0xff] }
 0x4bb   : > { %1986 = vmatpush.msra.mxu2 %v1919_v22  ;;  %2009 = vmatpush.msra.mxu3 %v1951_v23  ;;  %v1833_v18 = vld [vmem:[#allocation9 + $0x150] sm:$0xff]  ;;  %v1799_v22 = vld [vmem:[#allocation9 + $0x40] sm:$0xff] }
 0x4bc   : > { %2032 = vmatpush.msra.mxu0 %v1920_v25  ;;  %2055 = vmatpush.msrb.mxu1 %v1952_v26  ;;  %v1831_v23 = vld [vmem:[#allocation9 + $0x140] sm:$0xff]  ;;  %v1797_v25 = vld [vmem:[#allocation9 + $0x30] sm:$0xff] }
 0x4bd   : > { %1987 = vmatpush.msra.mxu2 %v1917_v28  ;;  %2010 = vmatpush.msra.mxu3 %v1949_v29  ;;  %v1829_v26 = vld [vmem:[#allocation9 + $0x130] sm:$0xff]  ;;  %v1795_v28 = vld [vmem:[#allocation9 + $0x20] sm:$0xff] }
 0x4be   : > { %2033 = vmatpush.msra.mxu0 %v1918_v46  ;;  %2056 = vmatpush.msrb.mxu1 %v1950_v47  ;;  %v1827_v29 = vld [vmem:[#allocation9 + $0x120] sm:$0xff]  ;;  %v1793_v46 = vld [vmem:[#allocation9 + $0x10] sm:$0xff] }
 0x4bf   : > { %1988 = vmatpush.msra.mxu2 %v1915_v49  ;;  %2011 = vmatpush.msra.mxu3 %v1947_v55  ;;  %v1825_v47 = vld [vmem:[#allocation9 + $0x110] sm:$0xff]  ;;  %v1791_v49 = vld [vmem:[#allocation9] sm:$0xff] }
 0x4c0   : > { %2034 = vmatpush.msra.mxu0 %v1916_v57  ;;  %2057 = vmatpush.msrb.mxu1 %v1948_v16  ;;  %v1823_v55 = vld [vmem:[#allocation9 + $0x100] sm:$0xff]  ;;  %v1808_v57 = vld [vmem:[#allocation9 + $0x88] sm:$0xff] }
 0x4c1   : > { %1989 = vmatpush.msra.mxu2 %v1913_v50  ;;  %2012 = vmatpush.msra.mxu3 %v1945_v56  ;;  %v1840_v16 = vld [vmem:[#allocation9 + $0x188] sm:$0xff]  ;;  %v1806_v50 = vld [vmem:[#allocation9 + $0x78] sm:$0xff] }
 0x4c2   : > { %2035 = vmatpush.msra.mxu0 %v1914_v24  ;;  %2058 = vmatpush.msrb.mxu1 %v1946_v35  ;;  %v1838_v56 = vld [vmem:[#allocation9 + $0x178] sm:$0xff]  ;;  %v1804_v24 = vld [vmem:[#allocation9 + $0x68] sm:$0xff] }
 0x4c3   : > { %1990 = vmatpush.msra.mxu2 %v1911_v3  ;;  %2013 = vmatpush.msra.mxu3 %v1943_v10  ;;  %v1836_v35 = vld [vmem:[#allocation9 + $0x168] sm:$0xff]  ;;  %v1802_v3 = vld [vmem:[#allocation9 + $0x58] sm:$0xff] }
 0x4c4   : > { %2036 = vmatpush.msra.mxu0 %v1912_v11  ;;  %2059 = vmatpush.msrb.mxu1 %v1944_v58  ;;  %v1834_v10 = vld [vmem:[#allocation9 + $0x158] sm:$0xff] }
 0x4c5   : > { %2067 = vmatpush.msrb.mxu2 %v1821_v12  ;;  %2090 = vmatpush.msrb.mxu3 %v1853_v52  ;;  %v1800_v12 = vld [vmem:[#allocation9 + $0x48] sm:$0xff]  ;;  %v1798_v11 = vld [vmem:[#allocation9 + $0x38] sm:$0xff] }
 0x4c6   : > { %2113 = vmatpush.msrb.mxu0 %v1822_v8  ;;  %2136 = vmatpush.msra.mxu1 %v1854_v13  ;;  %v1832_v52 = vld [vmem:[#allocation9 + $0x148] sm:$0xff]  ;;  %v1830_v58 = vld [vmem:[#allocation9 + $0x138] sm:$0xff] }
 0x4c7   : > { %2068 = vmatpush.msrb.mxu2 %v1819_v31  ;;  %2091 = vmatpush.msrb.mxu3 %v1851_v51  ;;  %v1796_v31 = vld [vmem:[#allocation9 + $0x28] sm:$0xff]  ;;  %v1794_v8 = vld [vmem:[#allocation9 + $0x18] sm:$0xff] }
 0x4c8   : > { %2114 = vmatpush.msrb.mxu0 %v1820_v1  ;;  %2137 = vmatpush.msra.mxu1 %v1852_v0  ;;  %v1828_v51 = vld [vmem:[#allocation9 + $0x128] sm:$0xff]  ;;  %v1826_v13 = vld [vmem:[#allocation9 + $0x118] sm:$0xff] }
 0x4c9   : > { %2069 = vmatpush.msrb.mxu2 %v1817_v9  ;;  %2092 = vmatpush.msrb.mxu3 %v1849_v20  ;;  %v1792_v9 = vld [vmem:[#allocation9 + $0x8] sm:$0xff] }
 0x4ca   : > { %2115 = vmatpush.msrb.mxu0 %v1818_v4  ;;  %2138 = vmatpush.msra.mxu1 %v1850_v40  ;;  %v1824_v20 = vld [vmem:[#allocation9 + $0x108] sm:$0xff]  ;;  %v2246_v4 = vld [vmem:[#allocation9 + $0x4f8] sm:$0xff] }
 0x4cb   : > { %2070 = vmatpush.msrb.mxu2 %v1815_v5  ;;  %2093 = vmatpush.msrb.mxu3 %v1847_v2  ;;  %v2278_v40 = vld [vmem:[#allocation9 + $0x5f8] sm:$0xff] }
 0x4cc   : > { %2116 = vmatpush.msrb.mxu0 %v1816_v19  ;;  %2139 = vmatpush.msra.mxu1 %v1848_v36  ;;  %v2244_v19 = vld [vmem:[#allocation9 + $0x4e8] sm:$0xff] }
 0x4cd   : > { %2071 = vmatpush.msrb.mxu2 %v1813_v41  ;;  %2094 = vmatpush.msrb.mxu3 %v1845_v53  ;;  %v2243_v41 = vld [vmem:[#allocation9 + $0x4e0] sm:$0xff]  ;;  %v2276_v36 = vld [vmem:[#allocation9 + $0x5e8] sm:$0xff] }
 0x4ce   : > { %2117 = vmatpush.msrb.mxu0 %v1814_v38  ;;  %2140 = vmatpush.msra.mxu1 %v1846_v32  ;;  %v2275_v53 = vld [vmem:[#allocation9 + $0x5e0] sm:$0xff]  ;;  %v2242_v38 = vld [vmem:[#allocation9 + $0x4d8] sm:$0xff] }
 0x4cf   : > { %2072 = vmatpush.msrb.mxu2 %v1811_v7  ;;  %2095 = vmatpush.msrb.mxu3 %v1843_v15  ;;  %v2241_v7 = vld [vmem:[#allocation9 + $0x4d0] sm:$0xff]  ;;  %v2274_v32 = vld [vmem:[#allocation9 + $0x5d8] sm:$0xff] }
 0x4d0   : > { %2118 = vmatpush.msrb.mxu0 %v1812_v42  ;;  %2141 = vmatpush.msra.mxu1 %v1844_v43  ;;  %v2273_v15 = vld [vmem:[#allocation9 + $0x5d0] sm:$0xff]  ;;  %v2240_v42 = vld [vmem:[#allocation9 + $0x4c8] sm:$0xff] }
 0x4d1   : > { %2073 = vmatpush.msrb.mxu2 %v1809_v37  ;;  %2096 = vmatpush.msrb.mxu3 %v1841_v39  ;;  %v2239_v37 = vld [vmem:[#allocation9 + $0x4c0] sm:$0xff]  ;;  %v2272_v43 = vld [vmem:[#allocation9 + $0x5c8] sm:$0xff] }
 0x4d2   : > { %2119 = vmatpush.msrb.mxu0 %v1810_v60  ;;  %2142 = vmatpush.msra.mxu1 %v1842_v6  ;;  %v2271_v39 = vld [vmem:[#allocation9 + $0x5c0] sm:$0xff]  ;;  %v2238_v60 = vld [vmem:[#allocation9 + $0x4b8] sm:$0xff] }
 0x4d3   : > { %2074 = vmatpush.msrb.mxu2 %v1807_v59  ;;  %2097 = vmatpush.msrb.mxu3 %v1839_v54  ;;  %v2237_v59 = vld [vmem:[#allocation9 + $0x4b0] sm:$0xff]  ;;  %v2270_v6 = vld [vmem:[#allocation9 + $0x5b8] sm:$0xff] }
 0x4d4   : > { %2120 = vmatpush.msrb.mxu0 %v1808_v57  ;;  %2143 = vmatpush.msra.mxu1 %v1840_v16  ;;  %v2269_v54 = vld [vmem:[#allocation9 + $0x5b0] sm:$0xff]  ;;  %v2227_v57 = vld [vmem:[#allocation9 + $0x460] sm:$0xff] }
 0x4d5   : > { %2075 = vmatpush.msrb.mxu2 %v1805_v61  ;;  %2098 = vmatpush.msrb.mxu3 %v1837_v14  ;;  %v2235_v61 = vld [vmem:[#allocation9 + $0x4a0] sm:$0xff] }
 0x4d6   : > { %2121 = vmatpush.msrb.mxu0 %v1806_v50  ;;  %2144 = vmatpush.msra.mxu1 %v1838_v56  ;;  %v2267_v14 = vld [vmem:[#allocation9 + $0x5a0] sm:$0xff]  ;;  %v2228_v50 = vld [vmem:[#allocation9 + $0x468] sm:$0xff] }
 0x4d7   : > { %2076 = vmatpush.msrb.mxu2 %v1803_v62  ;;  %2099 = vmatpush.msrb.mxu3 %v1835_v63  ;;  %v2236_v62 = vld [vmem:[#allocation9 + $0x4a8] sm:$0xff]  ;;  %v2259_v16 = vld [vmem:[#allocation9 + $0x560] sm:$0xff] }
 0x4d8   : > { %2122 = vmatpush.msrb.mxu0 %v1804_v24  ;;  %2145 = vmatpush.msra.mxu1 %v1836_v35  ;;  %v2268_v63 = vld [vmem:[#allocation9 + $0x5a8] sm:$0xff]  ;;  %v2225_v24 = vld [vmem:[#allocation9 + $0x450] sm:$0xff] }
 0x4d9   : > { %2077 = vmatpush.msrb.mxu2 %v1801_v17  ;;  %2100 = vmatpush.msrb.mxu3 %v1833_v18  ;;  %v2233_v17 = vld [vmem:[#allocation9 + $0x490] sm:$0xff]  ;;  %v2260_v56 = vld [vmem:[#allocation9 + $0x568] sm:$0xff] }
 0x4da   : > { %2123 = vmatpush.msrb.mxu0 %v1802_v3  ;;  %2146 = vmatpush.msra.mxu1 %v1834_v10  ;;  %v2265_v18 = vld [vmem:[#allocation9 + $0x590] sm:$0xff]  ;;  %v2226_v3 = vld [vmem:[#allocation9 + $0x458] sm:$0xff] }
 0x4db   : > { %2078 = vmatpush.msrb.mxu2 %v1799_v22  ;;  %2101 = vmatpush.msrb.mxu3 %v1831_v23  ;;  %v2234_v22 = vld [vmem:[#allocation9 + $0x498] sm:$0xff]  ;;  %v2257_v35 = vld [vmem:[#allocation9 + $0x550] sm:$0xff] }
 0x4dc   : > { %2124 = vmatpush.msrb.mxu0 %v1800_v12  ;;  %2147 = vmatpush.msra.mxu1 %v1832_v52  ;;  %v2266_v23 = vld [vmem:[#allocation9 + $0x598] sm:$0xff]  ;;  %v2223_v12 = vld [vmem:[#allocation9 + $0x440] sm:$0xff] }
 0x4dd   : > { %2079 = vmatpush.msrb.mxu2 %v1797_v25  ;;  %2102 = vmatpush.msrb.mxu3 %v1829_v26  ;;  %v2231_v25 = vld [vmem:[#allocation9 + $0x480] sm:$0xff]  ;;  %v2258_v10 = vld [vmem:[#allocation9 + $0x558] sm:$0xff] }
 0x4de   : > { %2125 = vmatpush.msrb.mxu0 %v1798_v11  ;;  %2148 = vmatpush.msra.mxu1 %v1830_v58  ;;  %v2263_v26 = vld [vmem:[#allocation9 + $0x580] sm:$0xff]  ;;  %v2224_v11 = vld [vmem:[#allocation9 + $0x448] sm:$0xff] }
 0x4df   : > { %2080 = vmatpush.msrb.mxu2 %v1795_v28  ;;  %2103 = vmatpush.msrb.mxu3 %v1827_v29  ;;  %v2232_v28 = vld [vmem:[#allocation9 + $0x488] sm:$0xff]  ;;  %v2255_v52 = vld [vmem:[#allocation9 + $0x540] sm:$0xff] }
 0x4e0   : > { %2126 = vmatpush.msrb.mxu0 %v1796_v31  ;;  %2149 = vmatpush.msra.mxu1 %v1828_v51  ;;  %v2264_v29 = vld [vmem:[#allocation9 + $0x588] sm:$0xff]  ;;  %v2221_v31 = vld [vmem:[#allocation9 + $0x430] sm:$0xff] }
 0x4e1   : > { %2081 = vmatpush.msrb.mxu2 %v1793_v46  ;;  %2104 = vmatpush.msrb.mxu3 %v1825_v47  ;;  %v2229_v46 = vld [vmem:[#allocation9 + $0x470] sm:$0xff]  ;;  %v2256_v58 = vld [vmem:[#allocation9 + $0x548] sm:$0xff] }
 0x4e2   : > { %2127 = vmatpush.msrb.mxu0 %v1794_v8  ;;  %2150 = vmatpush.msra.mxu1 %v1826_v13  ;;  %v2261_v47 = vld [vmem:[#allocation9 + $0x570] sm:$0xff]  ;;  %v2222_v8 = vld [vmem:[#allocation9 + $0x438] sm:$0xff] }
 0x4e3   : > { %2082 = vmatpush.msrb.mxu2 %v1791_v49  ;;  %2105 = vmatpush.msrb.mxu3 %v1823_v55  ;;  %v2230_v49 = vld [vmem:[#allocation9 + $0x478] sm:$0xff]  ;;  %v2253_v51 = vld [vmem:[#allocation9 + $0x530] sm:$0xff] }
 0x4e4   : > { %2128 = vmatpush.msrb.mxu0 %v1792_v9  ;;  %2151 = vmatpush.msra.mxu1 %v1824_v20  ;;  %v2262_v55 = vld [vmem:[#allocation9 + $0x578] sm:$0xff]  ;;  %v2219_v9 = vld [vmem:[#allocation9 + $0x420] sm:$0xff] }
 0x4e5   : > { %v2254_v13 = vld [vmem:[#allocation9 + $0x538] sm:$0xff]  ;;  %v2251_v20 = vld [vmem:[#allocation9 + $0x520] sm:$0xff] }
 0x51e   : > { %v1881_v1 = vpop.f32.mrf.mxu0  ;;  %v1904_v0 = vpop.f32.mrf.mxu1 }
 0x51f   : > { %1991 = vmatmul.f32.vlgmr.msra.gmra.mxu2 %v1881_v1  ;;  %2014 = vmatmul.f32.vlgmr.msra.gmra.mxu3 %v1904_v0 }
 0x520   : > { %2037 = vmatmul.f32.vlgmr.msra.gmra.mxu0 %v1881_v1  ;;  %2060 = vmatmul.f32.vlgmr.msrb.gmra.mxu1 %v1904_v0  ;;  %v2220_v1 = vld [vmem:[#allocation9 + $0x428] sm:$0xff] }
 0x521   : > { %2180 = vmatpush.msra.mxu2 %v4995_v21  ;;  %2203 = vmatpush.msra.mxu3 %v4997_v27  ;;  %v2252_v0 = vld [vmem:[#allocation9 + $0x528] sm:$0xff] }
 0x523   : > { %2181 = vmatpush.msra.mxu2 %v5002_v30  ;;  %2204 = vmatpush.msra.mxu3 %v5004_v33 }
 0x525   : > { %2182 = vmatpush.msra.mxu2 %v5012_v34  ;;  %2205 = vmatpush.msra.mxu3 %v5014_v44  ;;  %v1762_v21 = vpop.f32.mrf.mxu2  ;;  %v1785_v27 = vpop.f32.mrf.mxu3  ;;  %v2160_v34 = vld [vmem:[#allocation7 + $0x20] sm:$0xff]  ;;  %v2161_v44 = vld [vmem:[#allocation7 + $0x28] sm:$0xff] }
 0x526   : > { %v1884_v5 = vpop.f32.mrf.mxu0  ;;  %v1907_v2 = vpop.f32.mrf.mxu1 }
 0x527   : > { %2183 = vmatpush.msra.mxu2 %v5020_v45  ;;  %2206 = vmatpush.msra.mxu3 %v5022_v48  ;;  %v2245_v45 = vld [vmem:[#allocation9 + $0x4f0] sm:$0xff] }
 0x528   : > { %1994 = vmatmul.f32.gmra.mxu2 %v1884_v5  ;;  %2017 = vmatmul.f32.gmra.mxu3 %v1907_v2  ;;  %v2277_v48 = vld [vmem:[#allocation9 + $0x5f0] sm:$0xff] }
 0x529   : > { %2040 = vmatmul.f32.gmra.mxu0 %v1884_v5  ;;  %2063 = vmatmul.f32.gmra.mxu1 %v1907_v2  ;;  %v2217_v5 = vld [vmem:[#allocation9 + $0x410] sm:$0xff] }
 0x52a   : > { %2279 = vmatpush.msra.mxu0 %v2245_v45  ;;  %2302 = vmatpush.msrb.mxu1 %v2277_v48  ;;  %v2249_v2 = vld [vmem:[#allocation9 + $0x510] sm:$0xff]  ;;  %v2247_v45 = vld [vmem:[#allocation9 + $0x500] sm:$0xff]  ;;  %v2216_v48 = vld [vmem:[#allocation9 + $0x408] sm:$0xff] }
 0x52c   : > { %2280 = vmatpush.msra.mxu0 %v2243_v41  ;;  %2303 = vmatpush.msrb.mxu1 %v2275_v53 }
 0x52d   : > { %v1765_v30 = vpop.f32.mrf.mxu2  ;;  %v1788_v33 = vpop.f32.mrf.mxu3 }
 0x52e   : > { %2281 = vmatpush.msra.mxu0 %v2241_v7  ;;  %2304 = vmatpush.msrb.mxu1 %v2273_v15 }
 0x530   : > { %2083 = vmatmul.f32.vlgmr.msrb.gmra.mxu2 %v1762_v21  ;;  %2106 = vmatmul.f32.vlgmr.msrb.gmra.mxu3 %v1785_v27 }
 0x531   : > { %2129 = vmatmul.f32.vlgmr.msrb.gmra.mxu0 %v1762_v21  ;;  %2152 = vmatmul.f32.vlgmr.msra.gmra.mxu1 %v1785_v27  ;;  %v2218_v21 = vld [vmem:[#allocation9 + $0x418] sm:$0xff] }
 0x532   : > { %2325 = vmatpush.msrb.mxu2 %v2246_v4  ;;  %2348 = vmatpush.msrb.mxu3 %v2278_v40  ;;  %v2250_v27 = vld [vmem:[#allocation9 + $0x518] sm:$0xff]  ;;  %v2248_v4 = vld [vmem:[#allocation9 + $0x508] sm:$0xff] }
 0x533   : > { %2282 = vmatpush.msra.mxu0 %v2239_v37  ;;  %2305 = vmatpush.msrb.mxu1 %v2271_v39 }
 0x534   : > { %2326 = vmatpush.msrb.mxu2 %v2244_v19  ;;  %2349 = vmatpush.msrb.mxu3 %v2276_v36  ;;  %v5053_v19 = vld [vmem:[%s5393_s7 + $0x78] sm:$0xff]  ;;  %v5058_v36 = vld [vmem:[%s5393_s7 + $0x70] sm:$0xff] }
 0x535   : > { %2283 = vmatpush.msra.mxu0 %v2237_v59  ;;  %2306 = vmatpush.msrb.mxu1 %v2269_v54 }
 0x536   : > { %2327 = vmatpush.msrb.mxu2 %v2242_v38  ;;  %2350 = vmatpush.msrb.mxu3 %v2274_v32 }
 0x537   : > { %2284 = vmatpush.msra.mxu0 %v2235_v61  ;;  %2307 = vmatpush.msrb.mxu1 %v2267_v14 }
 0x538   : > { %2086 = vmatmul.f32.gmra.mxu2 %v1765_v30  ;;  %2109 = vmatmul.f32.gmra.mxu3 %v1788_v33 }
 0x539   : > { %2132 = vmatmul.f32.gmra.mxu0 %v1765_v30  ;;  %2155 = vmatmul.f32.gmra.mxu1 %v1788_v33 }
 0x53a   : > { %2328 = vmatpush.msrb.mxu2 %v2240_v42  ;;  %2351 = vmatpush.msrb.mxu3 %v2272_v43 }
 0x53b   : > { %2285 = vmatpush.msra.mxu0 %v2233_v17  ;;  %2308 = vmatpush.msrb.mxu1 %v2265_v18  ;;  %v5084_v17 = vld [vmem:[%s5393_s7 + $0xf8] sm:$0xff] }
 0x53c   : > { %2329 = vmatpush.msrb.mxu2 %v2238_v60  ;;  %2352 = vmatpush.msrb.mxu3 %v2270_v6  ;;  %v5091_v18 = vld [vmem:[%s5393_s7 + $0x58] sm:$0xff] }
 0x53d   : > { %2286 = vmatpush.msra.mxu0 %v2231_v25  ;;  %2309 = vmatpush.msrb.mxu1 %v2263_v26  ;;  %v5107_v26 = vld [vmem:[%s5393_s7 + $0x50] sm:$0xff] }
 0x53e   : > { %2330 = vmatpush.msrb.mxu2 %v2236_v62  ;;  %2353 = vmatpush.msrb.mxu3 %v2268_v63  ;;  %v5073_v62 = vld [vmem:[%s5393_s7 + $0x68] sm:$0xff]  ;;  %v5079_v63 = vld [vmem:[%s5393_s7 + $0x60] sm:$0xff] }
 0x53f   : > { %2287 = vmatpush.msra.mxu0 %v2229_v46  ;;  %2310 = vmatpush.msrb.mxu1 %v2261_v47  ;;  %v5124_v46 = vld [vmem:[%s5393_s7 + $0xe0] sm:$0xff] }
 0x540   : > { %3521 = vmatmul.msk.f32.vlgmr.msra.gmra.mxu2 %vm1738_vm5, %v2160_v34  ;;  %3523 = vmatmul.msk.f32.vlgmr.msra.gmra.mxu3 %vm1738_vm5, %v2160_v34  ;;  %v5131_v47 = vld [vmem:[%s5393_s7 + $0x40] sm:$0xff] }
 0x541   : > { %2331 = vmatpush.msrb.mxu2 %v2234_v22  ;;  %2354 = vmatpush.msrb.mxu3 %v2266_v23  ;;  %v5096_v22 = vld [vmem:[%s5393_s7 + $0xf0] sm:$0xff] }
 0x542   : > { %2288 = vmatpush.msra.mxu0 %v2227_v57  ;;  %2311 = vmatpush.msrb.mxu1 %v2259_v16  ;;  %v5148_v57 = vld [vmem:[%s5393_s7 + $0xd0] sm:$0xff] }
 0x543   : > { %2332 = vmatpush.msrb.mxu2 %v2232_v28  ;;  %2355 = vmatpush.msrb.mxu3 %v2264_v29  ;;  %v5112_v28 = vld [vmem:[%s5393_s7 + $0xe8] sm:$0xff] }
 0x544   : > { %2289 = vmatpush.msra.mxu0 %v2225_v24  ;;  %2312 = vmatpush.msrb.mxu1 %v2257_v35  ;;  %v5119_v29 = vld [vmem:[%s5393_s7 + $0x48] sm:$0xff] }
 0x545   : > { %2333 = vmatpush.msrb.mxu2 %v2230_v49  ;;  %2356 = vmatpush.msrb.mxu3 %v2262_v55  ;;  %v5136_v49 = vld [vmem:[%s5393_s7 + $0xd8] sm:$0xff]  ;;  %v5160_v24 = vld [vmem:[%s5393_s7 + $0xc8] sm:$0xff] }
 0x546   : > { %2290 = vmatpush.msra.mxu0 %v2223_v12  ;;  %2313 = vmatpush.msrb.mxu1 %v2255_v52  ;;  %v5143_v55 = vld [vmem:[%s5393_s7 + $0x38] sm:$0xff]  ;;  %v5167_v35 = vld [vmem:[%s5393_s7 + $0x28] sm:$0xff] }
 0x547   : > { %2334 = vmatpush.msrb.mxu2 %v2228_v50  ;;  %2357 = vmatpush.msrb.mxu3 %v2260_v56  ;;  %v5155_v56 = vld [vmem:[%s5393_s7 + $0x30] sm:$0xff]  ;;  %v5184_v12 = vld [vmem:[%s5393_s7 + $0xb8] sm:$0xff] }
 0x548   : > { %3522 = vmatmul.msk.f32.gmra.mxu2 %vm1738_vm5, %v2161_v44  ;;  %3524 = vmatmul.msk.f32.gmra.mxu3 %vm1738_vm5, %v2161_v44  ;;  %v2215_v44 = vld [vmem:[#allocation9 + $0x400] sm:$0xff]  ;;  %v5191_v52 = vld [vmem:[%s5393_s7 + $0x18] sm:$0xff] }
 0x549   : > { %2335 = vmatpush.msrb.mxu2 %v2226_v3  ;;  %2358 = vmatpush.msrb.mxu3 %v2258_v10  ;;  %v5172_v3 = vld [vmem:[%s5393_s7 + $0xc0] sm:$0xff] }
 0x54a   : > { %2291 = vmatpush.msra.mxu0 %v2221_v31  ;;  %2314 = vmatpush.msrb.mxu1 %v2253_v51  ;;  %v5179_v10 = vld [vmem:[%s5393_s7 + $0x20] sm:$0xff]  ;;  %v5208_v31 = vld [vmem:[%s5393_s7 + $0xa8] sm:$0xff] }
 0x54b   : > { %2336 = vmatpush.msrb.mxu2 %v2224_v11  ;;  %2359 = vmatpush.msrb.mxu3 %v2256_v58  ;;  %v5196_v11 = vld [vmem:[%s5393_s7 + $0xb0] sm:$0xff] }
 0x54c   : > { %2292 = vmatpush.msra.mxu0 %v2219_v9  ;;  %2315 = vmatpush.msrb.mxu1 %v2251_v20  ;;  %v5203_v58 = vld [vmem:[%s5393_s7 + $0x10] sm:$0xff]  ;;  %v5220_v9 = vld [vmem:[%s5393_s7 + $0xa0] sm:$0xff] }
 0x54d   : > { %2337 = vmatpush.msrb.mxu2 %v2222_v8  ;;  %2360 = vmatpush.msrb.mxu3 %v2254_v13  ;;  %v5215_v13 = vld [vmem:[%s5393_s7 + $0x8] sm:$0xff]  ;;  %v5227_v20 = vld [vmem:[%s5393_s7] sm:$0xff] }
 0x54e   : > { %2293 = vmatpush.msra.mxu0 %v2217_v5  ;;  %2316 = vmatpush.msrb.mxu1 %v2249_v2  ;;  %v5245_v5 = vld [vmem:[%s5393_s7 + $0x88] sm:$0xff] }
 0x54f   : > { %2338 = vmatpush.msrb.mxu2 %v2220_v1  ;;  %2361 = vmatpush.msrb.mxu3 %v2252_v0  ;;  %v5232_v1 = vld [vmem:[%s5393_s7 + $0x98] sm:$0xff]  ;;  %v5239_v0 = vld [vmem:[%s5393_s7 + $0x90] sm:$0xff] }
 0x550   : > { %2294 = vmatpush.msra.mxu0 %v2215_v44  ;;  %2317 = vmatpush.msrb.mxu1 %v2247_v45 }
 0x551   : > { %2339 = vmatpush.msrb.mxu2 %v2218_v21  ;;  %2362 = vmatpush.msrb.mxu3 %v2250_v27  ;;  %v5251_v27 = vld [vmem:[%s5393_s7 + $0x80] sm:$0xff] }
 0x552   : > { %2425 = vmatpush.msrb.mxu0 %v5053_v19  ;;  %2445 = vmatpush.msra.mxu1 %v5084_v17 }
 0x553   : > { %2340 = vmatpush.msrb.mxu2 %v2216_v48  ;;  %2363 = vmatpush.msrb.mxu3 %v2248_v4 }
 0x554   : > { %2426 = vmatpush.msrb.mxu0 %v5058_v36  ;;  %2446 = vmatpush.msra.mxu1 %v5096_v22 }
 0x556   : > { %2427 = vmatpush.msrb.mxu0 %v5073_v62  ;;  %2447 = vmatpush.msra.mxu1 %v5112_v28 }
 0x558   : > { %2428 = vmatpush.msrb.mxu0 %v5079_v63  ;;  %2448 = vmatpush.msra.mxu1 %v5124_v46 }
 0x55a   : > { %2429 = vmatpush.msrb.mxu0 %v5091_v18  ;;  %2449 = vmatpush.msra.mxu1 %v5136_v49 }
 0x55c   : > { %2430 = vmatpush.msrb.mxu0 %v5107_v26  ;;  %2450 = vmatpush.msra.mxu1 %v5148_v57 }
 0x55e   : > { %2431 = vmatpush.msrb.mxu0 %v5119_v29  ;;  %2451 = vmatpush.msra.mxu1 %v5160_v24 }
 0x560   : > { %2432 = vmatpush.msrb.mxu0 %v5131_v47  ;;  %2452 = vmatpush.msra.mxu1 %v5172_v3 }
 0x562   : > { %2433 = vmatpush.msrb.mxu0 %v5143_v55  ;;  %2453 = vmatpush.msra.mxu1 %v5184_v12 }
 0x564   : > { %2434 = vmatpush.msrb.mxu0 %v5155_v56  ;;  %2454 = vmatpush.msra.mxu1 %v5196_v11 }
 0x566   : > { %2435 = vmatpush.msrb.mxu0 %v5167_v35  ;;  %2455 = vmatpush.msra.mxu1 %v5208_v31 }
 0x568   : > { %2436 = vmatpush.msrb.mxu0 %v5179_v10  ;;  %2456 = vmatpush.msra.mxu1 %v5220_v9 }
 0x56a   : > { %2437 = vmatpush.msrb.mxu0 %v5191_v52  ;;  %2457 = vmatpush.msra.mxu1 %v5232_v1 }
 0x56c   : > { %2438 = vmatpush.msrb.mxu0 %v5203_v58  ;;  %2458 = vmatpush.msra.mxu1 %v5239_v0 }
 0x56e   : > { %2439 = vmatpush.msrb.mxu0 %v5215_v13  ;;  %2459 = vmatpush.msra.mxu1 %v5245_v5 }
 0x570   : > { %2440 = vmatpush.msrb.mxu0 %v5227_v20  ;;  %2460 = vmatpush.msra.mxu1 %v5251_v27 }
 0x59d   : > { %v5066_v61 = vpop.f32.mrf.mxu0  ;;  %v5068_v14 = vpop.f32.mrf.mxu1 }
 0x59e   : > { %v2062_v4 = vadd.f32 %v5068_v14, %v5066_v61 }
 0x5a2   : > { %v1992_v30 = vpop.f32.mrf.mxu2  ;;  %v2015_v33 = vpop.f32.mrf.mxu3 }
 0x5a3   : > { %v2016_v34 = vadd.f32 %v2015_v33, %v1992_v30 }
 0x5a6   : > { %v5098_v23 = vpop.f32.mrf.mxu0  ;;  %v5100_v25 = vpop.f32.mrf.mxu1 }
 0x5ab   : > { %v1995_v40 = vpop.f32.mrf.mxu2  ;;  %v2018_v41 = vpop.f32.mrf.mxu3 }
 0x5ac   : > { %v2019_v53 = vadd.f32 %v2018_v41, %v1995_v40  ;;  %v2065_v40 = vadd.f32 %v5100_v25, %v5098_v23 }
 0x5ae   : > { %v2130_v16 = vpop.f32.mrf.mxu0  ;;  %v2153_v50 = vpop.f32.mrf.mxu1 }
 0x5b3   : > { %v2084_v7 = vpop.f32.mrf.mxu2  ;;  %v2107_v15 = vpop.f32.mrf.mxu3 }
 0x5b4   : > { %v2085_v38 = vadd.f32 %v2084_v7, %v2016_v34  ;;  %v2131_v7 = vadd.f32 %v2130_v16, %v2062_v4  ;;  %v2776_v4 = vld [vmem:[#allocation13 + $0x178] sm:$0xff] }
 0x5b6   : > { %v5062_v32 = vadd.f32 %v2107_v15, %v2085_v38  ;;  %v2133_v51 = vpop.f32.mrf.mxu0  ;;  %v2156_v8 = vpop.f32.mrf.mxu1 }
 0x5b7   : > { %v2134_v15 = vadd.f32 %v2133_v51, %v2065_v40  ;;  %v2775_v40 = vld [vmem:[#allocation13 + $0x170] sm:$0xff] }
 0x5bb   : > { %v2087_v37 = vpop.f32.mrf.mxu2  ;;  %v2110_v39 = vpop.f32.mrf.mxu3 }
 0x5bc   : > { %v2088_v42 = vadd.f32 %v2087_v37, %v2019_v53 }
 0x5be   : > { %v5064_v43 = vadd.f32 %v2110_v39, %v2088_v42 }
 0x5c3   : > { %v2185_v59 = vpop.f32.mrf.mxu2  ;;  %v2208_v54 = vpop.f32.mrf.mxu3 }
 0x5c4   : > { %2295 = vmatmul.f32.vlgmr.msra.gmra.mxu0 %v2185_v59  ;;  %2318 = vmatmul.f32.vlgmr.msrb.gmra.mxu1 %v2208_v54 }
 0x5c5   : > { %2341 = vmatmul.f32.vlgmr.msrb.gmra.mxu2 %v2185_v59  ;;  %2364 = vmatmul.f32.vlgmr.msrb.gmra.mxu3 %v2208_v54  ;;  %v2154_v54 = vadd.f32 %v2153_v50, %v2131_v7  ;;  %v2789_v7 = vld [vmem:[#allocation13 + $0x1e0] sm:$0xff] }
 0x5cb   : > { %v2188_v60 = vpop.f32.mrf.mxu2  ;;  %v2211_v6 = vpop.f32.mrf.mxu3 }
 0x5cc   : > { %2298 = vmatmul.f32.gmra.mxu0 %v2188_v60  ;;  %2321 = vmatmul.f32.gmra.mxu1 %v2211_v6 }
 0x5cd   : > { %2344 = vmatmul.f32.gmra.mxu2 %v2188_v60  ;;  %2367 = vmatmul.f32.gmra.mxu3 %v2211_v6  ;;  %v2157_v60 = vadd.f32 %v2156_v8, %v2134_v15  ;;  %v2773_v15 = vld [vmem:[#allocation13 + $0x160] sm:$0xff] }
 0x641   : > { %v2296_v2 = vpop.f32.mrf.mxu0  ;;  %v2319_v21 = vpop.f32.mrf.mxu1 }
 0x642   : > { %v2320_v30 = vadd.f32 %v2319_v21, %v2296_v2 }
 0x644   : > { %v5259_v41 = vadd.f32 %v2320_v30, %v5062_v32 }
 0x648   : > { %v2342_v33 = vpop.f32.mrf.mxu2  ;;  %v2365_v34 = vpop.f32.mrf.mxu3 }
 0x649   : > { %v2299_v44 = vpop.f32.mrf.mxu0  ;;  %v2322_v45 = vpop.f32.mrf.mxu1  ;;  %v2366_v37 = vadd.f32 %v2365_v34, %v2342_v33  ;;  %v2409_v34 = vld [vmem:[#allocation10 + $0x10] sm:$0xff] }
 0x64a   : > { %v2323_v48 = vadd.f32 %v2322_v45, %v2299_v44  ;;  %v2410_v44 = vld [vmem:[#allocation10 + $0x18] sm:$0xff]  ;;  %2484 = vmatpush.msra.mxu2 %v2409_v34  ;;  %v2407_v45 = vld [vmem:[#allocation10] sm:$0xff] }
 0x64b   : > { %v5266_v14 = vadd.f32 %v2366_v37, %v2154_v54  ;;  %2504 = vmatpush.msra.mxu3 %v2410_v44  ;;  %2623 = vmatpush.msrb.mxu1 %v2410_v44  ;;  %v2787_v54 = vld [vmem:[#allocation13 + $0x1d0] sm:$0xff] }
 0x64c   : > { %v5262_v53 = vadd.f32 %v2323_v48, %v5064_v43  ;;  %v2408_v48 = vld [vmem:[#allocation10 + $0x8] sm:$0xff]  ;;  %2485 = vmatpush.msra.mxu2 %v2407_v45 }
 0x64d   : > { %2505 = vmatpush.msra.mxu3 %v2408_v48  ;;  %2624 = vmatpush.msrb.mxu1 %v2408_v48  ;;  %v2767_v48 = vld [vmem:[#allocation13 + $0x130] sm:$0xff] }
 0x64e   : > { %v2411_v38 = vadd.f32 %v5262_v53, %v5259_v41  ;;  %2534 = vmatpush.msrb.mxu2 %v5053_v19 }
 0x64f   : > { %2554 = vmatpush.msrb.mxu3 %v5084_v17 }
 0x650   : > { %v2412_v39 = vrot.slane %v2411_v38, 4  ;;  %v2345_v42 = vpop.f32.mrf.mxu2  ;;  %v2368_v59 = vpop.f32.mrf.mxu3  ;;  %2535 = vmatpush.msrb.mxu2 %v5058_v36 }
 0x651   : > { %v2369_v6 = vadd.f32 %v2368_v59, %v2345_v42  ;;  %2555 = vmatpush.msrb.mxu3 %v5096_v22  ;;  %v2772_v42 = vld [vmem:[#allocation13 + $0x158] sm:$0xff] }
 0x652   : > { %v2413_v61 = vadd.f32 %v2412_v39, %v2411_v38  ;;  %2536 = vmatpush.msrb.mxu2 %v5073_v62  ;;  %v2788_v38 = vld [vmem:[#allocation13 + $0x1d8] sm:$0xff] }
 0x653   : > { %v5268_v32 = vadd.f32 %v2369_v6, %v2157_v60  ;;  %2556 = vmatpush.msrb.mxu3 %v5112_v28  ;;  %v2771_v60 = vld [vmem:[#allocation13 + $0x150] sm:$0xff] }
 0x654   : > { %v2414_v23 = vrot.slane %v2413_v61, 2  ;;  %2537 = vmatpush.msrb.mxu2 %v5079_v63 }
 0x655   : > { %v2418_v43 = vadd.f32 %v5268_v32, %v5266_v14  ;;  %2557 = vmatpush.msrb.mxu3 %v5124_v46 }
 0x656   : > { %v2415_v25 = vadd.f32 %v2414_v23, %v2413_v61  ;;  %2538 = vmatpush.msrb.mxu2 %v5091_v18  ;;  %v2786_v61 = vld [vmem:[#allocation13 + $0x1c8] sm:$0xff]  ;;  %v2785_v23 = vld [vmem:[#allocation13 + $0x1c0] sm:$0xff] }
 0x657   : > { %v2419_v16 = vrot.slane %v2418_v43, 4  ;;  %2558 = vmatpush.msrb.mxu3 %v5136_v49 }
 0x658   : > { %v2416_v51 = vrot.slane %v2415_v25, 1  ;;  %2539 = vmatpush.msrb.mxu2 %v5107_v26 }
 0x659   : > { %v2420_v2 = vadd.f32 %v2419_v16, %v2418_v43  ;;  %2559 = vmatpush.msrb.mxu3 %v5148_v57  ;;  %v2769_v43 = vld [vmem:[#allocation13 + $0x140] sm:$0xff]  ;;  %v2768_v16 = vld [vmem:[#allocation13 + $0x138] sm:$0xff] }
 0x65a   : > { %v2417_v21 = vadd.f32 %v2416_v51, %v2415_v25  ;;  %2540 = vmatpush.msrb.mxu2 %v5119_v29  ;;  %v2784_v25 = vld [vmem:[#allocation13 + $0x1b8] sm:$0xff]  ;;  %v2783_v51 = vld [vmem:[#allocation13 + $0x1b0] sm:$0xff] }
 0x65b   : > { %v2421_v30 = vrot.slane %v2420_v2, 2  ;;  %2560 = vmatpush.msrb.mxu3 %v5160_v24 }
 0x65c   : > { %2441 = vmatmul.f32.vlgmr.msrb.gmra.mxu0 %v2417_v21  ;;  %2541 = vmatpush.msrb.mxu2 %v5131_v47 }
 0x65d   : > { %v2422_v33 = vadd.f32 %v2421_v30, %v2420_v2  ;;  %2561 = vmatpush.msrb.mxu3 %v5172_v3  ;;  %v2782_v2 = vld [vmem:[#allocation13 + $0x1a8] sm:$0xff]  ;;  %v2781_v30 = vld [vmem:[#allocation13 + $0x1a0] sm:$0xff] }
 0x65e   : > { %2542 = vmatpush.msrb.mxu2 %v5143_v55 }
 0x65f   : > { %v2423_v50 = vrot.slane %v2422_v33, 1  ;;  %2562 = vmatpush.msrb.mxu3 %v5184_v12 }
 0x660   : > { %2543 = vmatpush.msrb.mxu2 %v5155_v56 }
 0x661   : > { %v2424_v8 = vadd.f32 %v2423_v50, %v2422_v33  ;;  %2563 = vmatpush.msrb.mxu3 %v5196_v11 }
 0x662   : > { %2544 = vmatpush.msrb.mxu2 %v5167_v35 }
 0x663   : > { %2461 = vmatmul.f32.vlgmr.msra.gmra.mxu1 %v2424_v8  ;;  %2564 = vmatpush.msrb.mxu3 %v5208_v31 }
 0x664   : > { %2545 = vmatpush.msrb.mxu2 %v5179_v10 }
 0x665   : > { %2565 = vmatpush.msrb.mxu3 %v5220_v9 }
 0x666   : > { %2546 = vmatpush.msrb.mxu2 %v5191_v52 }
 0x667   : > { %2566 = vmatpush.msrb.mxu3 %v5232_v1 }
 0x668   : > { %2547 = vmatpush.msrb.mxu2 %v5203_v58 }
 0x669   : > { %2567 = vmatpush.msrb.mxu3 %v5239_v0 }
 0x66a   : > { %2548 = vmatpush.msrb.mxu2 %v5215_v13 }
 0x66b   : > { %2568 = vmatpush.msrb.mxu3 %v5245_v5  ;;  %v2792_v5 = vld [vmem:[#allocation13 + $0x1f8] sm:$0xff] }
 0x66c   : > { %2549 = vmatpush.msrb.mxu2 %v5227_v20 }
 0x66d   : > { %2569 = vmatpush.msrb.mxu3 %v5251_v27  ;;  %v2791_v27 = vld [vmem:[#allocation13 + $0x1f0] sm:$0xff] }
 0x6d9   : > { %v2442_v19 = vpop.f32.mrf.mxu0 }
 0x6e0   : > { %v2462_v36 = vpop.f32.mrf.mxu1 }
 0x6e1   : > { %v2463_v62 = vadd.f32 %v2462_v36, %v2442_v19  ;;  %v2780_v19 = vld [vmem:[#allocation13 + $0x198] sm:$0xff]  ;;  %v2766_v36 = vld [vmem:[#allocation13 + $0x128] sm:$0xff] }
 0x6e3   : > { %v2465_v63 = vmul.f32 0.00390625, %v2463_v62  ;;  %v2779_v62 = vld [vmem:[#allocation13 + $0x190] sm:$0xff] }
 0x6e5   : > { %3525 = vmatmul.msk.f32.vlgmr.msra.gmra.mxu2 %vm2466_vm6, %v2465_v63  ;;  %3526 = vmatmul.msk.f32.vlgmr.msra.gmra.mxu3 %vm2466_vm6, %v2465_v63  ;;  %v2765_v63 = vld [vmem:[#allocation13 + $0x120] sm:$0xff] }
 0x6e6   : > { %2603 = vmatpush.msra.mxu2 %v2409_v34  ;;  %2813 = vmatpush.msra.mxu3 %v2792_v5  ;;  %v2710_v5 = vld [vmem:[#allocation13 + $0xd8] sm:$0xff] }
 0x6e8   : > { %2604 = vmatpush.msra.mxu2 %v2407_v45  ;;  %2814 = vmatpush.msra.mxu3 %v2791_v27  ;;  %v2709_v27 = vld [vmem:[#allocation13 + $0xd0] sm:$0xff] }
 0x768   : > { %v2487_v17 = vpop.f32.mrf.mxu2  ;;  %v2507_v18 = vpop.f32.mrf.mxu3 }
 0x769   : > { %v2510_v22 = vperm.slane %v2487_v17, 0  ;;  %v2511_v26 = vperm.slane %v2507_v18, 0  ;;  %v2778_v17 = vld [vmem:[#allocation13 + $0x188] sm:$0xff]  ;;  %v2764_v18 = vld [vmem:[#allocation13 + $0x118] sm:$0xff] }
 0x76b   : > { %v5307_v28 = vsub.f32 %v5259_v41, %v2510_v22  ;;  %v5310_v29 = vsub.f32 %v5262_v53, %v2510_v22  ;;  %v5313_v46 = vsub.f32 %v5266_v14, %v2511_v26  ;;  %v5316_v47 = vsub.f32 %v5268_v32, %v2511_v26  ;;  %v2790_v41 = vld [vmem:[#allocation13 + $0x1e8] sm:$0xff]  ;;  %v2777_v22 = vld [vmem:[#allocation13 + $0x180] sm:$0xff]  ;;  %v2763_v26 = vld [vmem:[#allocation13 + $0x110] sm:$0xff] }
 0x76c   : > { %v2774_v53 = vld [vmem:[#allocation13 + $0x168] sm:$0xff]  ;;  %2815 = vmatpush.msra.mxu3 %v2790_v41  ;;  %v2695_v41 = vld [vmem:[#allocation13 + $0x60] sm:$0xff] }
 0x76d   : > { %v2516_v49 = vmul.f32 %v5307_v28, %v5307_v28  ;;  %v2518_v55 = vmul.f32 %v5310_v29, %v5310_v29  ;;  %v2517_v57 = vmul.f32 %v5313_v46, %v5313_v46  ;;  %v2519_v56 = vmul.f32 %v5316_v47, %v5316_v47  ;;  %v2770_v14 = vld [vmem:[#allocation13 + $0x148] sm:$0xff] }
 0x76e   : > { %2816 = vmatpush.msra.mxu3 %v2789_v7  ;;  %v2694_v7 = vld [vmem:[#allocation13 + $0x58] sm:$0xff] }
 0x76f   : > { %v2520_v24 = vadd.f32 %v2518_v55, %v2516_v49  ;;  %v2527_v35 = vadd.f32 %v2519_v56, %v2517_v57  ;;  %v2762_v49 = vld [vmem:[#allocation13 + $0x108] sm:$0xff]  ;;  %v2761_v55 = vld [vmem:[#allocation13 + $0x100] sm:$0xff] }
 0x770   : > { %2817 = vmatpush.msra.mxu3 %v2788_v38  ;;  %v2693_v38 = vld [vmem:[#allocation13 + $0x50] sm:$0xff] }
 0x771   : > { %v2521_v3 = vrot.slane %v2520_v24, 4  ;;  %v2528_v10 = vrot.slane %v2527_v35, 4 }
 0x772   : > { %2818 = vmatpush.msra.mxu3 %v2787_v54  ;;  %v2703_v54 = vld [vmem:[#allocation13 + $0xa0] sm:$0xff] }
 0x773   : > { %v2522_v12 = vadd.f32 %v2521_v3, %v2520_v24  ;;  %v2529_v52 = vadd.f32 %v2528_v10, %v2527_v35 }
 0x774   : > { %2819 = vmatpush.msra.mxu3 %v2786_v61  ;;  %v2689_v61 = vld [vmem:[#allocation13 + $0x30] sm:$0xff] }
 0x775   : > { %v2523_v11 = vrot.slane %v2522_v12, 2  ;;  %v2530_v58 = vrot.slane %v2529_v52, 2 }
 0x776   : > { %2820 = vmatpush.msra.mxu3 %v2785_v23  ;;  %v2686_v23 = vld [vmem:[#allocation13 + $0x18] sm:$0xff] }
 0x777   : > { %v2524_v31 = vadd.f32 %v2523_v11, %v2522_v12  ;;  %v2531_v13 = vadd.f32 %v2530_v58, %v2529_v52  ;;  %v2639_v11 = vld [vmem:[#allocation12] sm:$0xff] }
 0x778   : > { %2821 = vmatpush.msra.mxu3 %v2784_v25  ;;  %v2701_v25 = vld [vmem:[#allocation13 + $0x90] sm:$0xff] }
 0x779   : > { %v2525_v9 = vrot.slane %v2524_v31, 1  ;;  %v2532_v20 = vrot.slane %v2531_v13, 1 }
 0x77a   : > { %2822 = vmatpush.msra.mxu3 %v2783_v51  ;;  %v2700_v51 = vld [vmem:[#allocation13 + $0x88] sm:$0xff] }
 0x77b   : > { %v2526_v1 = vadd.f32 %v2525_v9, %v2524_v31  ;;  %v2533_v0 = vadd.f32 %v2532_v20, %v2531_v13  ;;  %v2713_v9 = vld [vmem:[#allocation13 + $0xf0] sm:$0xff]  ;;  %v2712_v20 = vld [vmem:[#allocation13 + $0xe8] sm:$0xff] }
 0x77c   : > { %2823 = vmatpush.msra.mxu3 %v2782_v2  ;;  %v2683_v2 = vld [vmem:[#allocation13] sm:$0xff] }
 0x77d   : > { %2550 = vmatmul.f32.vlgmr.msrb.gmra.mxu2 %v2526_v1  ;;  %2570 = vmatmul.f32.vlgmr.msrb.gmra.mxu3 %v2533_v0  ;;  %v2711_v1 = vld [vmem:[#allocation13 + $0xe0] sm:$0xff]  ;;  %v2697_v0 = vld [vmem:[#allocation13 + $0x70] sm:$0xff] }
 0x77e   : > { %2793 = vmatpush.msrb.mxu2 %v2776_v4  ;;  %2824 = vmatpush.msra.mxu3 %v2781_v30  ;;  %v2696_v4 = vld [vmem:[#allocation13 + $0x68] sm:$0xff]  ;;  %v2934_v30 = vld [vmem:[#allocation13 + $0x278] sm:$0xff] }
 0x780   : > { %2794 = vmatpush.msrb.mxu2 %v2775_v40  ;;  %2825 = vmatpush.msra.mxu3 %v2780_v19  ;;  %v2708_v40 = vld [vmem:[#allocation13 + $0xc8] sm:$0xff]  ;;  %v2930_v19 = vld [vmem:[#allocation13 + $0x258] sm:$0xff] }
 0x782   : > { %2795 = vmatpush.msrb.mxu2 %v2774_v53  ;;  %2826 = vmatpush.msra.mxu3 %v2779_v62  ;;  %v2707_v53 = vld [vmem:[#allocation13 + $0xc0] sm:$0xff]  ;;  %v2929_v62 = vld [vmem:[#allocation13 + $0x250] sm:$0xff] }
 0x784   : > { %2796 = vmatpush.msrb.mxu2 %v2773_v15  ;;  %2827 = vmatpush.msra.mxu3 %v2778_v17  ;;  %v2706_v15 = vld [vmem:[#allocation13 + $0xb8] sm:$0xff] }
 0x786   : > { %2797 = vmatpush.msrb.mxu2 %v2772_v42  ;;  %2828 = vmatpush.msra.mxu3 %v2777_v22  ;;  %v2704_v42 = vld [vmem:[#allocation13 + $0xa8] sm:$0xff] }
 0x787   : > { %v2944_v22 = vld [vmem:[#allocation13 + $0x2c8] sm:$0xff] }
 0x788   : > { %2798 = vmatpush.msrb.mxu2 %v2771_v60  ;;  %v2690_v60 = vld [vmem:[#allocation13 + $0x38] sm:$0xff] }
 0x78a   : > { %2799 = vmatpush.msrb.mxu2 %v2770_v14  ;;  %v2688_v14 = vld [vmem:[#allocation13 + $0x28] sm:$0xff] }
 0x78c   : > { %2800 = vmatpush.msrb.mxu2 %v2769_v43  ;;  %v2685_v43 = vld [vmem:[#allocation13 + $0x10] sm:$0xff] }
 0x78e   : > { %2801 = vmatpush.msrb.mxu2 %v2768_v16  ;;  %v2684_v16 = vld [vmem:[#allocation13 + $0x8] sm:$0xff] }
 0x790   : > { %2802 = vmatpush.msrb.mxu2 %v2767_v48  ;;  %v2947_v48 = vld [vmem:[#allocation13 + $0x2e0] sm:$0xff] }
 0x792   : > { %2803 = vmatpush.msrb.mxu2 %v2766_v36  ;;  %v2946_v36 = vld [vmem:[#allocation13 + $0x2d8] sm:$0xff] }
 0x794   : > { %2804 = vmatpush.msrb.mxu2 %v2765_v63  ;;  %v2945_v63 = vld [vmem:[#allocation13 + $0x2d0] sm:$0xff] }
 0x796   : > { %2805 = vmatpush.msrb.mxu2 %v2764_v18  ;;  %v2928_v18 = vld [vmem:[#allocation13 + $0x248] sm:$0xff] }
 0x798   : > { %2806 = vmatpush.msrb.mxu2 %v2763_v26 }
 0x79a   : > { %2807 = vmatpush.msrb.mxu2 %v2762_v49 }
 0x79c   : > { %2808 = vmatpush.msrb.mxu2 %v2761_v55 }
 0x800   : > { %v2551_v37 = vpop.f32.mrf.mxu2  ;;  %v2571_v39 = vpop.f32.mrf.mxu3 }
 0x801   : > { %v2572_v59 = vadd.f32 %v2571_v39, %v2551_v37  ;;  %v2705_v37 = vld [vmem:[#allocation13 + $0xb0] sm:$0xff]  ;;  %v2692_v39 = vld [vmem:[#allocation13 + $0x48] sm:$0xff] }
 0x803   : > { %v2574_v6 = vmul.f32 0.00390625, %v2572_v59  ;;  %v2691_v59 = vld [vmem:[#allocation13 + $0x40] sm:$0xff] }
 0x805   : > { %v2575_v32 = vadd.f32 1e-05, %v2574_v6  ;;  %v2702_v6 = vld [vmem:[#allocation13 + $0x98] sm:$0xff] }
 0x807   : > { %3674 = vrsqrt.f32 %v2575_v32  ;;  %vm2582_vm8 = vweird.f32 %v2575_v32 }
 0x80d   : > { %v3675_v21 = vpop.eup %3674 }
 0x80e   : > { %v2577_v33 = vmul.f32 %v3675_v21, %v2575_v32  ;;  %vm2583_vm7 = vweird.f32 %v3675_v21  ;;  %v2687_v32 = vld [vmem:[#allocation13 + $0x20] sm:$0xff] }
 0x80f   : > { %vm2584_vm9 = vmor %vm2582_vm8, %vm2583_vm7 }
 0x810   : > { %v2578_v50 = vmul.f32 %v3675_v21, %v2577_v33  ;;  %v2950_v33 = vld [vmem:[#allocation13 + $0x2f8] sm:$0xff] }
 0x812   : > { %v2579_v8 = vmul.f32 0.5, %v2578_v50  ;;  %v2933_v50 = vld [vmem:[#allocation13 + $0x270] sm:$0xff] }
 0x814   : > { %v2580_v34 = vsub.f32 1.5, %v2579_v8  ;;  %v2949_v8 = vld [vmem:[#allocation13 + $0x2f0] sm:$0xff] }
 0x816   : > { %v2581_v44 = vmul.f32 %v3675_v21, %v2580_v34  ;;  %v2932_v34 = vld [vmem:[#allocation13 + $0x268] sm:$0xff] }
 0x818   : > { %v2585_v45 = vsel %vm2584_vm9, %v3675_v21, %v2581_v44  ;;  %v2699_v21 = vld [vmem:[#allocation13 + $0x80] sm:$0xff]  ;;  %v2948_v44 = vld [vmem:[#allocation13 + $0x2e8] sm:$0xff] }
 0x819   : > { %3527 = vmatmul.msk.f32.vlgmr.msra.gmra.mxu2 %vm2466_vm6, %v2585_v45  ;;  %3528 = vmatmul.msk.f32.vlgmr.msrb.gmra.mxu1 %vm2466_vm6, %v2585_v45  ;;  %v2931_v45 = vld [vmem:[#allocation13 + $0x260] sm:$0xff] }
 0x896   : > { %v2626_v57 = vpop.f32.mrf.mxu1 }
 0x897   : > { %v2630_v56 = vperm.slane %v2626_v57, 0  ;;  %v2874_v57 = vld [vmem:[#allocation12 + $0x10] sm:$0xff] }
 0x899   : > { %v2632_v24 = vmul.f32 %v2630_v56, %v5313_v46  ;;  %v2634_v35 = vmul.f32 %v2630_v56, %v5316_v47  ;;  %v2714_v46 = vld [vmem:[#allocation13 + $0xf8] sm:$0xff]  ;;  %v2927_v56 = vld [vmem:[#allocation13 + $0x240] sm:$0xff] }
 0x89b   : > { %v2638_v3 = vmax.f32 %v2634_v35, 0.0  ;;  %v2636_v12 = vmax.f32 %v2632_v24, 0.0  ;;  %v2943_v24 = vld [vmem:[#allocation13 + $0x2c0] sm:$0xff]  ;;  %v2926_v35 = vld [vmem:[#allocation13 + $0x238] sm:$0xff] }
 0x89c   : > { %v2606_v10 = vpop.f32.mrf.mxu2 }
 0x89d   : > { %v2629_v52 = vperm.slane %v2606_v10, 0  ;;  %2677 = vmatpush.msra.mxu1 %v2638_v3  ;;  %2912 = vmatpush.msrb.mxu3 %v2638_v3  ;;  %v2925_v10 = vld [vmem:[#allocation13 + $0x230] sm:$0xff] }
 0x89f   : > { %v2631_v58 = vmul.f32 %v2629_v52, %v5307_v28  ;;  %v2633_v31 = vmul.f32 %v2629_v52, %v5310_v29  ;;  %2678 = vmatpush.msra.mxu1 %v2636_v12  ;;  %2913 = vmatpush.msrb.mxu3 %v2636_v12  ;;  %v2716_v28 = vld [vmem:[#allocation12 + $0x8] sm:$0xff]  ;;  %v2698_v29 = vld [vmem:[#allocation13 + $0x78] sm:$0xff]  ;;  %v2924_v52 = vld [vmem:[#allocation13 + $0x228] sm:$0xff] }
 0x8a0   : > { %3530 = vmatmul.msk.f32.vlgmr.msra.gmra.mxu1 %vm2466_vm6, %v2639_v11 }
 0x8a1   : > { %2754 = vmatpush.msrb.mxu1 %v2638_v3  ;;  %v2637_v13 = vmax.f32 %v2633_v31, 0.0  ;;  %v2635_v47 = vmax.f32 %v2631_v58, 0.0  ;;  %v2942_v3 = vld [vmem:[#allocation13 + $0x2b8] sm:$0xff]  ;;  %v2923_v58 = vld [vmem:[#allocation13 + $0x220] sm:$0xff] }
 0x8a2   : > { %v2939_v31 = vld [vmem:[#allocation13 + $0x2a0] sm:$0xff] }
 0x8a3   : > { %2755 = vmatpush.msrb.mxu1 %v2636_v12  ;;  %2657 = vmatpush.msra.mxu0 %v2637_v13  ;;  %v2941_v12 = vld [vmem:[#allocation13 + $0x2b0] sm:$0xff] }
 0x8a4   : > { %2892 = vmatpush.msra.mxu2 %v2637_v13 }
 0x8a5   : > { %2853 = vmatpush.msra.mxu1 %v2714_v46  ;;  %2658 = vmatpush.msra.mxu0 %v2635_v47  ;;  %v2938_v46 = vld [vmem:[#allocation13 + $0x298] sm:$0xff] }
 0x8a6   : > { %2893 = vmatpush.msra.mxu2 %v2635_v47  ;;  %3529 = vmatmul.msk.f32.vlgmr.msra.gmra.mxu0 %vm2466_vm6, %v2639_v11  ;;  %v2940_v11 = vld [vmem:[#allocation13 + $0x2a8] sm:$0xff] }
 0x8a7   : > { %2854 = vmatpush.msra.mxu1 %v2713_v9  ;;  %2734 = vmatpush.msrb.mxu0 %v2637_v13  ;;  %v2922_v13 = vld [vmem:[#allocation13 + $0x218] sm:$0xff]  ;;  %v2937_v9 = vld [vmem:[#allocation13 + $0x290] sm:$0xff] }
 0x8a8   : > { %3532 = vmatmul.msk.f32.vlgmr.msrb.gmra.mxu1 %vm2466_vm6, %v2716_v28 }
 0x8a9   : > { %2855 = vmatpush.msra.mxu1 %v2712_v20  ;;  %2735 = vmatpush.msrb.mxu0 %v2635_v47  ;;  %v2921_v47 = vld [vmem:[#allocation13 + $0x210] sm:$0xff]  ;;  %v2920_v20 = vld [vmem:[#allocation13 + $0x208] sm:$0xff] }
 0x8ab   : > { %2833 = vmatpush.msra.mxu0 %v2698_v29  ;;  %2856 = vmatpush.msra.mxu1 %v2711_v1  ;;  %v2919_v29 = vld [vmem:[#allocation13 + $0x200] sm:$0xff] }
 0x8ac   : > { %v2935_v1 = vld [vmem:[#allocation13 + $0x280] sm:$0xff] }
 0x8ad   : > { %2834 = vmatpush.msra.mxu0 %v2697_v0  ;;  %2857 = vmatpush.msra.mxu1 %v2710_v5  ;;  %v5338_v0 = vld [vmem:[#allocation15 + $0x78] sm:$0xff]  ;;  %v5340_v5 = vld [vmem:[#allocation15 + $0x70] sm:$0xff] }
 0x8ae   : > { %3531 = vmatmul.msk.f32.vlgmr.msrb.gmra.mxu0 %vm2466_vm6, %v2716_v28  ;;  %v2936_v28 = vld [vmem:[#allocation13 + $0x288] sm:$0xff] }
 0x8af   : > { %2858 = vmatpush.msra.mxu1 %v2709_v27  ;;  %2835 = vmatpush.msra.mxu0 %v2696_v4  ;;  %v5344_v27 = vld [vmem:[#allocation15 + $0x68] sm:$0xff]  ;;  %v5348_v4 = vld [vmem:[#allocation15 + $0x60] sm:$0xff] }
 0x8b1   : > { %2859 = vmatpush.msra.mxu1 %v2708_v40  ;;  %2836 = vmatpush.msra.mxu0 %v2695_v41  ;;  %v5352_v40 = vld [vmem:[#allocation15 + $0x58] sm:$0xff]  ;;  %v5356_v41 = vld [vmem:[#allocation15 + $0x50] sm:$0xff] }
 0x8b3   : > { %2860 = vmatpush.msra.mxu1 %v2707_v53  ;;  %2837 = vmatpush.msra.mxu0 %v2694_v7  ;;  %v5360_v53 = vld [vmem:[#allocation15 + $0x48] sm:$0xff] }
 0x8b5   : > { %2861 = vmatpush.msra.mxu1 %v2706_v15  ;;  %2838 = vmatpush.msra.mxu0 %v2693_v38 }
 0x8b7   : > { %2862 = vmatpush.msra.mxu1 %v2705_v37  ;;  %2839 = vmatpush.msra.mxu0 %v2692_v39 }
 0x8b9   : > { %2863 = vmatpush.msra.mxu1 %v2704_v42  ;;  %2840 = vmatpush.msra.mxu0 %v2691_v59  ;;  %v3000_v42 = vld [vmem:[#allocation15 + $0x40] sm:$0xff]  ;;  %v2999_v59 = vld [vmem:[#allocation15 + $0x38] sm:$0xff] }
 0x8bb   : > { %2864 = vmatpush.msra.mxu1 %v2703_v54  ;;  %2841 = vmatpush.msra.mxu0 %v2690_v60  ;;  %v2998_v54 = vld [vmem:[#allocation15 + $0x30] sm:$0xff]  ;;  %v2997_v60 = vld [vmem:[#allocation15 + $0x28] sm:$0xff] }
 0x8bd   : > { %2865 = vmatpush.msra.mxu1 %v2702_v6  ;;  %2842 = vmatpush.msra.mxu0 %v2689_v61  ;;  %v2996_v6 = vld [vmem:[#allocation15 + $0x20] sm:$0xff]  ;;  %v2995_v61 = vld [vmem:[#allocation15 + $0x18] sm:$0xff] }
 0x8bf   : > { %2843 = vmatpush.msra.mxu0 %v2688_v14  ;;  %2866 = vmatpush.msra.mxu1 %v2701_v25  ;;  %v2994_v14 = vld [vmem:[#allocation15 + $0x10] sm:$0xff] }
 0x8c1   : > { %2844 = vmatpush.msra.mxu0 %v2687_v32  ;;  %2867 = vmatpush.msra.mxu1 %v2700_v51  ;;  %v2993_v32 = vld [vmem:[#allocation15 + $0x8] sm:$0xff] }
 0x8c3   : > { %2845 = vmatpush.msra.mxu0 %v2686_v23  ;;  %2868 = vmatpush.msra.mxu1 %v2699_v21  ;;  %v2992_v23 = vld [vmem:[#allocation15] sm:$0xff] }
 0x8c5   : > { %2846 = vmatpush.msra.mxu0 %v2685_v43  ;;  %2971 = vmatpush.msrb.mxu1 %v2950_v33 }
 0x8c7   : > { %2847 = vmatpush.msra.mxu0 %v2684_v16  ;;  %2972 = vmatpush.msrb.mxu1 %v2949_v8 }
 0x8c9   : > { %2848 = vmatpush.msra.mxu0 %v2683_v2  ;;  %2973 = vmatpush.msrb.mxu1 %v2948_v44 }
 0x8cb   : > { %2951 = vmatpush.msrb.mxu0 %v2934_v30  ;;  %2974 = vmatpush.msrb.mxu1 %v2947_v48 }
 0x8cd   : > { %2952 = vmatpush.msrb.mxu0 %v2933_v50  ;;  %2975 = vmatpush.msrb.mxu1 %v2946_v36  ;;  %v3008_v36 = vld [vmem:[#allocation16] sm:$0xff] }
 0x8cf   : > { %2953 = vmatpush.msrb.mxu0 %v2932_v34  ;;  %2976 = vmatpush.msrb.mxu1 %v2945_v63 }
 0x8d1   : > { %2954 = vmatpush.msrb.mxu0 %v2931_v45  ;;  %2977 = vmatpush.msrb.mxu1 %v2944_v22 }
 0x8d3   : > { %2955 = vmatpush.msrb.mxu0 %v2930_v19  ;;  %2978 = vmatpush.msrb.mxu1 %v2943_v24  ;;  %v3009_v19 = vld [vmem:[#allocation16 + $0x8] sm:$0xff] }
 0x8d5   : > { %2956 = vmatpush.msrb.mxu0 %v2929_v62  ;;  %2979 = vmatpush.msrb.mxu1 %v2942_v3 }
 0x8d7   : > { %2957 = vmatpush.msrb.mxu0 %v2928_v18  ;;  %2980 = vmatpush.msrb.mxu1 %v2941_v12 }
 0x8d9   : > { %2958 = vmatpush.msrb.mxu0 %v2927_v56  ;;  %2981 = vmatpush.msrb.mxu1 %v2940_v11 }
 0x8db   : > { %2959 = vmatpush.msrb.mxu0 %v2926_v35  ;;  %2982 = vmatpush.msrb.mxu1 %v2939_v31 }
 0x8dd   : > { %2960 = vmatpush.msrb.mxu0 %v2925_v10  ;;  %2983 = vmatpush.msrb.mxu1 %v2938_v46 }
 0x8df   : > { %2961 = vmatpush.msrb.mxu0 %v2924_v52  ;;  %2984 = vmatpush.msrb.mxu1 %v2937_v9 }
 0x8e1   : > { %2962 = vmatpush.msrb.mxu0 %v2923_v58  ;;  %2985 = vmatpush.msrb.mxu1 %v2936_v28 }
 0x8e3   : > { %2963 = vmatpush.msrb.mxu0 %v2922_v13  ;;  %2986 = vmatpush.msrb.mxu1 %v2935_v1 }
 0x8e5   : > { %2964 = vmatpush.msrb.mxu0 %v2921_v47 }
 0x8e7   : > { %2965 = vmatpush.msrb.mxu0 %v2920_v20 }
 0x8e9   : > { %2966 = vmatpush.msrb.mxu0 %v2919_v29 }
 0x91d   : > { %v2680_v17 = vpop.f32.mrf.mxu1 }
 0x91e   : > { %2869 = vmatmul.f32.vlgmr.msra.gmra.mxu1 %v2680_v17 }
 0x91f   : > { %3133 = vmatpush.msra.mxu1 %v5338_v0 }
 0x921   : > { %3134 = vmatpush.msra.mxu1 %v5340_v5 }
 0x923   : > { %v2660_v26 = vpop.f32.mrf.mxu0  ;;  %3135 = vmatpush.msra.mxu1 %v5344_v27 }
 0x924   : > { %2849 = vmatmul.f32.vlgmr.msra.gmra.mxu0 %v2660_v26 }
 0x925   : > { %v2757_v49 = vpop.f32.mrf.mxu1  ;;  %3136 = vmatpush.msra.mxu1 %v5348_v4  ;;  %3118 = vmatpush.msra.mxu0 %v3009_v19 }
 0x926   : > { %2829 = vmatmul.f32.vlgmr.msra.gmra.mxu3 %v2757_v49 }
 0x927   : > { %3137 = vmatpush.msra.mxu1 %v5352_v40  ;;  %3054 = vmatpush.msra.mxu3 %v3009_v19 }
 0x928   : > { %3119 = vmatpush.msra.mxu0 %v3008_v36 }
 0x929   : > { %3138 = vmatpush.msra.mxu1 %v5356_v41  ;;  %3055 = vmatpush.msra.mxu3 %v3008_v36 }
 0x92b   : > { %v2737_v55 = vpop.f32.mrf.mxu0  ;;  %3139 = vmatpush.msra.mxu1 %v5360_v53 }
 0x92c   : > { %2809 = vmatmul.f32.vlgmr.msrb.gmra.mxu2 %v2737_v55 }
 0x92d   : > { %3016 = vmatpush.msrb.mxu2 %v5338_v0  ;;  %3140 = vmatpush.msra.mxu1 %v3000_v42 }
 0x92e   : > { %3534 = vmatmul.msk.f32.vlgmr.msrb.gmra.mxu3 %vm2466_vm6, %v2874_v57 }
 0x92f   : > { %3017 = vmatpush.msrb.mxu2 %v5340_v5  ;;  %3141 = vmatpush.msra.mxu1 %v2999_v59 }
 0x930   : > { %3069 = vmatpush.msrb.mxu3 %v5338_v0 }
 0x931   : > { %3018 = vmatpush.msrb.mxu2 %v5344_v27  ;;  %3142 = vmatpush.msra.mxu1 %v2998_v54 }
 0x932   : > { %3070 = vmatpush.msrb.mxu3 %v5340_v5 }
 0x933   : > { %3019 = vmatpush.msrb.mxu2 %v5348_v4  ;;  %3143 = vmatpush.msra.mxu1 %v2997_v60 }
 0x934   : > { %3533 = vmatmul.msk.f32.vlgmr.msra.gmra.mxu2 %vm2466_vm6, %v2874_v57  ;;  %3071 = vmatpush.msrb.mxu3 %v5344_v27 }
 0x935   : > { %3020 = vmatpush.msrb.mxu2 %v5352_v40  ;;  %3144 = vmatpush.msra.mxu1 %v2996_v6 }
 0x936   : > { %3072 = vmatpush.msrb.mxu3 %v5348_v4 }
 0x937   : > { %3021 = vmatpush.msrb.mxu2 %v5356_v41  ;;  %3145 = vmatpush.msra.mxu1 %v2995_v61 }
 0x938   : > { %3073 = vmatpush.msrb.mxu3 %v5352_v40 }
 0x939   : > { %3022 = vmatpush.msrb.mxu2 %v5360_v53  ;;  %3146 = vmatpush.msra.mxu1 %v2994_v14 }
 0x93a   : > { %3074 = vmatpush.msrb.mxu3 %v5356_v41  ;;  %v3155_v41 = vld [vmem:[#allocation18 + $0x8] sm:$0xff] }
 0x93b   : > { %3023 = vmatpush.msrb.mxu2 %v3000_v42  ;;  %3147 = vmatpush.msra.mxu1 %v2993_v32 }
 0x93c   : > { %3075 = vmatpush.msrb.mxu3 %v5360_v53  ;;  %v3154_v53 = vld [vmem:[#allocation18] sm:$0xff] }
 0x93d   : > { %3024 = vmatpush.msrb.mxu2 %v2999_v59  ;;  %3148 = vmatpush.msra.mxu1 %v2992_v23 }
 0x93e   : > { %3076 = vmatpush.msrb.mxu3 %v3000_v42 }
 0x93f   : > { %3025 = vmatpush.msrb.mxu2 %v2998_v54 }
 0x940   : > { %3077 = vmatpush.msrb.mxu3 %v2999_v59 }
 0x941   : > { %3026 = vmatpush.msrb.mxu2 %v2997_v60 }
 0x942   : > { %3078 = vmatpush.msrb.mxu3 %v2998_v54 }
 0x943   : > { %3027 = vmatpush.msrb.mxu2 %v2996_v6 }
 0x944   : > { %3079 = vmatpush.msrb.mxu3 %v2997_v60 }
 0x945   : > { %3028 = vmatpush.msrb.mxu2 %v2995_v61 }
 0x946   : > { %3080 = vmatpush.msrb.mxu3 %v2996_v6 }
 0x947   : > { %3029 = vmatpush.msrb.mxu2 %v2994_v14 }
 0x948   : > { %3081 = vmatpush.msrb.mxu3 %v2995_v61 }
 0x949   : > { %3030 = vmatpush.msrb.mxu2 %v2993_v32 }
 0x94a   : > { %3082 = vmatpush.msrb.mxu3 %v2994_v14 }
 0x94b   : > { %3031 = vmatpush.msrb.mxu2 %v2992_v23 }
 0x94c   : > { %3083 = vmatpush.msrb.mxu3 %v2993_v32 }
 0x94d   : > { %3174 = vmatpush.msra.mxu2 %v3155_v41 }
 0x94e   : > { %3084 = vmatpush.msrb.mxu3 %v2992_v23 }
 0x94f   : > { %3175 = vmatpush.msra.mxu2 %v3154_v53 }
 0x99b   : > { %v2870_v43 = vpop.f32.mrf.mxu1 }
 0x9a1   : > { %v2850_v25 = vpop.f32.mrf.mxu0 }
 0x9a9   : > { %v2830_v7 = vpop.f32.mrf.mxu3 }
 0x9af   : > { %v2810_v15 = vpop.f32.mrf.mxu2 }
 0x9b0   : > { %v2831_v38 = vadd.f32 %v2830_v7, %v2810_v15 }
 0x9b1   : > { %v2915_v37 = vpop.f32.mrf.mxu3 }
 0x9b2   : > { %2987 = vmatmul.f32.vlgmr.msrb.gmra.mxu1 %v2915_v37  ;;  %v2851_v16 = vadd.f32 %v2850_v25, %v2831_v38  ;;  %v3156_v38 = vld [vmem:[%s5400_s14] sm:$0x1] }
 0x9b4   : > { %v2871_v21 = vadd.f32 %v2870_v43, %v2851_v16 }
 0x9b7   : > { %v2895_v39 = vpop.f32.mrf.mxu2 }
 0x9b8   : > { %2967 = vmatmul.f32.vlgmr.msrb.gmra.mxu0 %v2895_v39 }
 0xa2f   : > { %v2988_v51 = vpop.f32.mrf.mxu1 }
 0xa35   : > { %v2968_v2 = vpop.f32.mrf.mxu0 }
 0xa36   : > { %v2989_v30 = vadd.f32 %v2988_v51, %v2968_v2 }
 0xa38   : > { %v2991_v33 = vadd.f32 %v2989_v30, %v2871_v21 }
 0xa3a   : > { %v3010_v50 = vrot.slane %v2991_v33, 4 }
 0xa3c   : > { %v3011_v8 = vadd.f32 %v3010_v50, %v2991_v33 }
 0xa3e   : > { %v3012_v34 = vrot.slane %v3011_v8, 2 }
 0xa40   : > { %v3013_v44 = vadd.f32 %v3012_v34, %v3011_v8 }
 0xa42   : > { %v3014_v45 = vrot.slane %v3013_v44, 1 }
 0xa44   : > { %v3015_v48 = vadd.f32 %v3014_v45, %v3013_v44 }
 0xa46   : > { %3032 = vmatmul.f32.vlgmr.msrb.gmra.mxu2 %v3015_v48 }
 0xac9   : > { %v3033_v62 = vpop.f32.mrf.mxu2 }
 0xaca   : > { %v3036_v63 = vmul.f32 0.015625, %v3033_v62 }
 0xacc   : > { %3535 = vmatmul.msk.f32.vlgmr.msra.gmra.mxu3 %vm2466_vm6, %v3036_v63 }
 0xb4f   : > { %v3057_v17 = vpop.f32.mrf.mxu3 }
 0xb50   : > { %v3060_v18 = vperm.slane %v3057_v17, 0 }
 0xb52   : > { %v3061_v22 = vsub.f32 %v2991_v33, %v3060_v18 }
 0xb54   : > { %v3062_v26 = vmul.f32 %v3061_v22, %v3061_v22 }
 0xb56   : > { %v3063_v49 = vrot.slane %v3062_v26, 4 }
 0xb58   : > { %v3064_v55 = vadd.f32 %v3063_v49, %v3062_v26 }
 0xb5a   : > { %v3065_v57 = vrot.slane %v3064_v55, 2 }
 0xb5c   : > { %v3066_v56 = vadd.f32 %v3065_v57, %v3064_v55 }
 0xb5e   : > { %v3067_v24 = vrot.slane %v3066_v56, 1 }
 0xb60   : > { %v3068_v35 = vadd.f32 %v3067_v24, %v3066_v56 }
 0xb62   : > { %3085 = vmatmul.f32.vlgmr.msrb.gmra.mxu3 %v3068_v35 }
 0xbe5   : > { %v3086_v3 = vpop.f32.mrf.mxu3 }
 0xbe6   : > { %v3089_v10 = vmul.f32 0.015625, %v3086_v3 }
 0xbe8   : > { %v3090_v12 = vadd.f32 1e-05, %v3089_v10 }
 0xbea   : > { %3676 = vrsqrt.f32 %v3090_v12  ;;  %vm3097_vm11 = vweird.f32 %v3090_v12 }
 0xbf0   : > { %v3677_v52 = vpop.eup %3676 }
 0xbf1   : > { %v3092_v11 = vmul.f32 %v3677_v52, %v3090_v12  ;;  %vm3098_vm10 = vweird.f32 %v3677_v52 }
 0xbf2   : > { %vm3099_vm12 = vmor %vm3097_vm11, %vm3098_vm10 }
 0xbf3   : > { %v3093_v58 = vmul.f32 %v3677_v52, %v3092_v11 }
 0xbf5   : > { %v3094_v31 = vmul.f32 0.5, %v3093_v58 }
 0xbf7   : > { %v3095_v13 = vsub.f32 1.5, %v3094_v31 }
 0xbf9   : > { %v3096_v46 = vmul.f32 %v3677_v52, %v3095_v13 }
 0xbfb   : > { %v3100_v47 = vsel %vm3099_vm12, %v3677_v52, %v3096_v46 }
 0xbfc   : > { %3536 = vmatmul.msk.f32.vlgmr.msra.gmra.mxu0 %vm2466_vm6, %v3100_v47 }
 0xc79   : > { %v3121_v9 = vpop.f32.mrf.mxu0 }
 0xc7a   : > { %v3124_v20 = vperm.slane %v3121_v9, 0 }
 0xc7c   : > { %v3125_v28 = vmul.f32 %v3124_v20, %v3061_v22 }
 0xc7e   : > { %v3126_v29 = vmax.f32 %v3125_v28, 0.0 }
 0xc80   : > { %v3127_v1 = vrot.slane %v3126_v29, 4 }
 0xc82   : > { %v3128_v0 = vadd.f32 %v3127_v1, %v3126_v29 }
 0xc84   : > { %v3129_v5 = vrot.slane %v3128_v0, 2 }
 0xc86   : > { %v3130_v27 = vadd.f32 %v3129_v5, %v3128_v0 }
 0xc88   : > { %v3131_v4 = vrot.slane %v3130_v27, 1 }
 0xc8a   : > { %v3132_v40 = vadd.f32 %v3131_v4, %v3130_v27 }
 0xc8c   : > { %3149 = vmatmul.f32.vlgmr.msra.gmra.mxu1 %v3132_v40 }
 0xd09   : > { %v3150_v7 = vpop.f32.mrf.mxu1 }
 0xd0a   : > { %v3153_v15 = vmul.f32 0.015625, %v3150_v7 }
 0xd0c   : > { %3537 = vmatmul.msk.f32.vlgmr.msra.gmra.mxu2 %vm2466_vm6, %v3153_v15 }
 0xd8f   : > { %v3177_v37 = vpop.f32.mrf.mxu2 }
 0xd90   : > { %v3178_v39 = vadd.f32 %v3177_v37, %v3156_v38 }
 0xd92   : > { %3181 = vst.msk [vmem:[%s670_s23] sm:$0x1] %vm3180_vm13, %v3178_v39 }
 0xd93 PF: > { %s5416_s29 = sld [smem:[#allocation25_spill]] }
 0xd99   : > { %s31_s18 = sadd.s32 1, %s5416_s29  }
 0xd9a   : > { %p28_p7 = scmp.ge.s32.totalorder %s31_s18, 4  }
 0xd9c   :  { %30 = sbr.rel (!%p28_p7) target bundleno = 11 (0xb), region = 167 }
 0xda1   :  { %3199 = vsyncpa [#allocation3], 1 }
 0xda2   :  { %3201 = vsyncpa [#allocation3 + $0x1], 1 }
 0xda3   :  { %3202 = vsyncpa [#allocation5], 1 }
 0xda4   :  { %3203 = vsyncpa [#allocation8], 1 }
 0xda5   :  { %3204 = vsyncpa [#allocation11], 1 }
 0xda6   :  { %3205 = vsyncpa [#allocation14], 1 }
 0xda7   :  { %3206 = vsyncpa [#allocation17], 1 }

</bundles_post_ra>
